<compile_context>
chip_gen: v7x
topology: tpu7x:2x2x1
jax: 0.10.0
libtpu: 0.0.40
codegen_flags: <defaults>
</compile_context>

<pallas_src>
import jax
import jax.numpy as jnp
from jax.experimental import pallas as pl
from jax.experimental.pallas import tpu as pltpu

DIM_TRANS_IN = 768       # transformer token dim
DIM_FASTER = 1024        # trans_project / mlp output dim
DIM_BOX_IN = 256         # faster-rcnn box feature dim (input_dim)
NUM_CLASSES = 80         # e.g. AVA
PADDED_CLASSES = 128     # lane-dense class dim used inside the kernel
NEG_INF = -1e30          # bias value for padded classes -> exp() == 0


def roi_head_kernel(inputs_ref, idx_ref, feat_ref,
                    wtp_hbm, btp_ref,          # trans_project  (bf16 W in HBM, f32 b)
                    wmlp_hbm, bmlp_ref,        # mlp (Linear + ReLU)
                    wpt_hbm, wpb_hbm, bp_ref,  # projection, split + class-padded
                    out_ref,
                    wtp_v, wmlp_v, wpt_v, wpb_v, sems):
    B, T, _ = inputs_ref.shape
    N = feat_ref.shape[0]

    # ---- start all weight DMAs immediately; wait on each only just before its dot ----
    cp_tp = pltpu.make_async_copy(wtp_hbm, wtp_v, sems.at[0])
    cp_mlp = pltpu.make_async_copy(wmlp_hbm, wmlp_v, sems.at[1])
    cp_pt = pltpu.make_async_copy(wpt_hbm, wpt_v, sems.at[2])
    cp_pb = pltpu.make_async_copy(wpb_hbm, wpb_v, sems.at[3])
    cp_tp.start(); cp_mlp.start(); cp_pt.start(); cp_pb.start()

    # ---- fused temporal mean + scatter: scat[n, b*T + t] = 1/T  iff  idx[n] == b ----
    # (replaces mean(axis=1) + one-hot scatter with a single bf16 MXU dot; 1/T=0.125 is
    #  exact in bf16 for T=8)
    col = jax.lax.broadcasted_iota(jnp.int32, (N, B * T), 1)
    lo = idx_ref[...] * T                                        # (N, 1)
    scat = jnp.where((col >= lo) & (col < lo + T),
                     1.0 / T, 0.0).astype(jnp.bfloat16)          # (N, B*T)
    x_flat = inputs_ref[...].reshape(B * T, DIM_TRANS_IN).astype(jnp.bfloat16)
    pooled_boxes = jnp.dot(scat, x_flat,
                           preferred_element_type=jnp.float32)   # (N, 768) f32

    # ---- trans_project folded after the scatter (rows of scat sum to 1 -> bias commutes) ----
    cp_tp.wait()
    x_boxes = jnp.dot(pooled_boxes.astype(jnp.bfloat16), wtp_v[...],
                      preferred_element_type=jnp.float32) + btp_ref[...]   # (N, 1024)

    # ---- mlp on box features: relu((N, 256) @ (256, 1024) + b) ----
    cp_mlp.wait()
    feat = jnp.dot(feat_ref[...].astype(jnp.bfloat16), wmlp_v[...],
                   preferred_element_type=jnp.float32) + bmlp_ref[...]
    feat = jnp.maximum(feat, 0.0)

    # ---- projection on the (virtual) concat [x_boxes, feat] -> (N, 128) logits ----
    # padded class columns get weight 0 and bias -1e30, so the softmax is unaffected.
    cp_pt.wait(); cp_pb.wait()
    logits = (jnp.dot(x_boxes.astype(jnp.bfloat16), wpt_v[...],
                      preferred_element_type=jnp.float32)
              + jnp.dot(feat.astype(jnp.bfloat16), wpb_v[...],
                        preferred_element_type=jnp.float32)
              + bp_ref[...])

    # ---- softmax over classes (exact f32 normalization; lane-dense 128-wide store) ----
    m = jnp.max(logits, axis=1, keepdims=True)
    e = jnp.exp(logits - m)                       # padded cols -> exp(-1e30 - m) == 0
    denom = jnp.sum(e, axis=1, keepdims=True)
    out_ref[...] = e / denom


def transformer_roi_head(inputs, idx, features, params):
    """inputs: (B, T, 768) f32; idx: (N,) int32; features: (N, 256) f32."""
    B, T, _ = inputs.shape
    N = features.shape[0]
    idx2d = idx.reshape(N, 1).astype(jnp.int32)

    vmem = pl.BlockSpec(memory_space=pltpu.MemorySpace.VMEM)
    hbm = pl.BlockSpec(memory_space=pl.ANY)    # big weights: manual DMA inside the kernel

    weight_bytes = 2 * (DIM_TRANS_IN * DIM_FASTER
                        + DIM_BOX_IN * DIM_FASTER
                        + 2 * DIM_FASTER * PADDED_CLASSES)          # bf16
    act_bytes = 4 * (B * T * DIM_TRANS_IN + N * DIM_BOX_IN
                     + N * PADDED_CLASSES + 3 * DIM_FASTER + PADDED_CLASSES)
    flops = 2 * N * (B * T * DIM_TRANS_IN
                     + DIM_TRANS_IN * DIM_FASTER
                     + DIM_BOX_IN * DIM_FASTER
                     + 2 * DIM_FASTER * PADDED_CLASSES)

    out_padded = pl.pallas_call(
        roi_head_kernel,
        out_shape=jax.ShapeDtypeStruct((N, PADDED_CLASSES), jnp.float32),
        in_specs=[vmem, vmem, vmem,
                  hbm, vmem,
                  hbm, vmem,
                  hbm, hbm, vmem],
        out_specs=vmem,
        scratch_shapes=[
            pltpu.VMEM((DIM_TRANS_IN, DIM_FASTER), jnp.bfloat16),
            pltpu.VMEM((DIM_BOX_IN, DIM_FASTER), jnp.bfloat16),
            pltpu.VMEM((DIM_FASTER, PADDED_CLASSES), jnp.bfloat16),
            pltpu.VMEM((DIM_FASTER, PADDED_CLASSES), jnp.bfloat16),
            pltpu.SemaphoreType.DMA((4,)),
        ],
        cost_estimate=pl.CostEstimate(
            flops=flops,
            transcendentals=N * PADDED_CLASSES,
            bytes_accessed=weight_bytes + act_bytes),
    )(
        inputs, idx2d, features,
        params["w_tp"], params["b_tp"],
        params["w_mlp"], params["b_mlp"],
        params["wp_top"], params["wp_bot"], params["b_proj_padded"],
    )
    # slice the lane-padded classes back to the real 80
    return out_padded[:, :NUM_CLASSES]


def init_params(key):
    ks = jax.random.split(key, 6)
    s = 0.02
    w_tp = s * jax.random.normal(ks[0], (DIM_TRANS_IN, DIM_FASTER), jnp.float32)
    b_tp = s * jax.random.normal(ks[1], (DIM_FASTER,), jnp.float32)
    w_mlp = s * jax.random.normal(ks[2], (DIM_BOX_IN, DIM_FASTER), jnp.float32)
    b_mlp = s * jax.random.normal(ks[3], (DIM_FASTER,), jnp.float32)
    w_proj = s * jax.random.normal(ks[4], (2 * DIM_FASTER, NUM_CLASSES), jnp.float32)
    b_proj = s * jax.random.normal(ks[5], (NUM_CLASSES,), jnp.float32)

    # Pre-split the projection weight into the halves hitting x_boxes / mlp(features),
    # pad the class dim 80 -> 128 (zero weight cols, -1e30 f32 bias), store weights as bf16.
    pad = PADDED_CLASSES - NUM_CLASSES
    wp_top = jnp.pad(w_proj[:DIM_FASTER], ((0, 0), (0, pad)))
    wp_bot = jnp.pad(w_proj[DIM_FASTER:], ((0, 0), (0, pad)))
    b_proj_padded = jnp.pad(b_proj, (0, pad), constant_values=NEG_INF)

    return {
        "w_tp": w_tp.astype(jnp.bfloat16),
        "b_tp": b_tp.reshape(1, DIM_FASTER),
        "w_mlp": w_mlp.astype(jnp.bfloat16),
        "b_mlp": b_mlp.reshape(1, DIM_FASTER),
        "wp_top": wp_top.astype(jnp.bfloat16),
        "wp_bot": wp_bot.astype(jnp.bfloat16),
        "b_proj_padded": b_proj_padded.reshape(1, PADDED_CLASSES),
    }


def reference(inputs, idx, features, params):
    """Pure-JAX reference of the intended forward (same bf16 weights, f32 math)."""
    w_tp = params["w_tp"].astype(jnp.float32)
    w_mlp = params["w_mlp"].astype(jnp.float32)
    wp_top = params["wp_top"][:, :NUM_CLASSES].astype(jnp.float32)
    wp_bot = params["wp_bot"][:, :NUM_CLASSES].astype(jnp.float32)
    b_proj = params["b_proj_padded"][0, :NUM_CLASSES]

    x = inputs.mean(axis=1)
    x = x @ w_tp + params["b_tp"][0]
    x_boxes = x[idx]                                     # intended scatter
    feat = jnp.maximum(features @ w_mlp + params["b_mlp"][0], 0.0)
    logits = x_boxes @ wp_top + feat @ wp_bot + b_proj
    return jax.nn.softmax(logits, axis=1)


if __name__ == "__main__":
    key = jax.random.PRNGKey(0)
    k_in, k_feat, k_idx, k_par = jax.random.split(key, 4)

    B, T, N = 2, 8, 16
    inputs = jax.random.normal(k_in, (B, T, DIM_TRANS_IN), jnp.float32)
    features = jax.random.normal(k_feat, (N, DIM_BOX_IN), jnp.float32)
    idx = jax.random.randint(k_idx, (N,), 0, B, jnp.int32)
    params = init_params(k_par)

    out = transformer_roi_head(inputs, idx, features, params)
    out = jax.block_until_ready(out)

    ref = reference(inputs, idx, features, params)
    assert out.shape == (N, NUM_CLASSES)
    # exact f32 normalization -> rows sum to 1 (padded classes contribute exactly 0)
    assert jnp.allclose(jnp.sum(out, axis=1), 1.0, atol=1e-3)
    # bf16 matmul inputs -> compare with a small tolerance
    assert jnp.allclose(out, ref, atol=2e-3, rtol=2e-2), "mismatch vs JAX reference"
    # TODO(synk): nn.Dropout is declared in __init__ but never applied in forward, so it is omitted.
    print("KERNEL_OK")
</pallas_src>

<mosaic_0001>
module attributes {stable_mosaic.version = 11 : i64} {
  func.func @roi_head_kernel(%arg0: memref<2x8x768xf32, #tpu.memory_space<vmem>>, %arg1: memref<16x1xi32, #tpu.memory_space<vmem>>, %arg2: memref<16x256xf32, #tpu.memory_space<vmem>>, %arg3: memref<768x1024xbf16, #tpu.memory_space<any>>, %arg4: memref<1x1024xf32, #tpu.memory_space<vmem>>, %arg5: memref<256x1024xbf16, #tpu.memory_space<any>>, %arg6: memref<1x1024xf32, #tpu.memory_space<vmem>>, %arg7: memref<1024x128xbf16, #tpu.memory_space<any>>, %arg8: memref<1024x128xbf16, #tpu.memory_space<any>>, %arg9: memref<1x128xf32, #tpu.memory_space<vmem>>, %arg10: memref<16x128xf32, #tpu.memory_space<vmem>>, %arg11: memref<768x1024xbf16, #tpu.memory_space<vmem>>, %arg12: memref<256x1024xbf16, #tpu.memory_space<vmem>>, %arg13: memref<1024x128xbf16, #tpu.memory_space<vmem>>, %arg14: memref<1024x128xbf16, #tpu.memory_space<vmem>>, %arg15: memref<4x!tpu.dma_semaphore, #tpu.memory_space<semaphore_mem>>) attributes {dimension_semantics = [], scalar_prefetch = 0 : i64, scratch_operands = 5 : i64, tpu.core_type = #tpu.core_type<tc>} {
    %c0_i32 = arith.constant 0 : i32
    %0 = tpu.memref_slice %arg15[%c0_i32] : memref<4x!tpu.dma_semaphore, #tpu.memory_space<semaphore_mem>> -> memref<1x!tpu.dma_semaphore, #tpu.memory_space<semaphore_mem>>
    %1 = tpu.memref_squeeze %0 : memref<1x!tpu.dma_semaphore, #tpu.memory_space<semaphore_mem>> -> memref<!tpu.dma_semaphore, #tpu.memory_space<semaphore_mem>>
    tpu.enqueue_dma source(%arg3 : memref<768x1024xbf16, #tpu.memory_space<any>>) target(%arg11 : memref<768x1024xbf16, #tpu.memory_space<vmem>>) target_semaphore(%1 : memref<!tpu.dma_semaphore, #tpu.memory_space<semaphore_mem>>)
    %c1_i32 = arith.constant 1 : i32
    %2 = tpu.memref_slice %arg15[%c1_i32] : memref<4x!tpu.dma_semaphore, #tpu.memory_space<semaphore_mem>> -> memref<1x!tpu.dma_semaphore, #tpu.memory_space<semaphore_mem>>
    %3 = tpu.memref_squeeze %2 : memref<1x!tpu.dma_semaphore, #tpu.memory_space<semaphore_mem>> -> memref<!tpu.dma_semaphore, #tpu.memory_space<semaphore_mem>>
    tpu.enqueue_dma source(%arg5 : memref<256x1024xbf16, #tpu.memory_space<any>>) target(%arg12 : memref<256x1024xbf16, #tpu.memory_space<vmem>>) target_semaphore(%3 : memref<!tpu.dma_semaphore, #tpu.memory_space<semaphore_mem>>)
    %c2_i32 = arith.constant 2 : i32
    %4 = tpu.memref_slice %arg15[%c2_i32] : memref<4x!tpu.dma_semaphore, #tpu.memory_space<semaphore_mem>> -> memref<1x!tpu.dma_semaphore, #tpu.memory_space<semaphore_mem>>
    %5 = tpu.memref_squeeze %4 : memref<1x!tpu.dma_semaphore, #tpu.memory_space<semaphore_mem>> -> memref<!tpu.dma_semaphore, #tpu.memory_space<semaphore_mem>>
    tpu.enqueue_dma source(%arg7 : memref<1024x128xbf16, #tpu.memory_space<any>>) target(%arg13 : memref<1024x128xbf16, #tpu.memory_space<vmem>>) target_semaphore(%5 : memref<!tpu.dma_semaphore, #tpu.memory_space<semaphore_mem>>)
    %c3_i32 = arith.constant 3 : i32
    %6 = tpu.memref_slice %arg15[%c3_i32] : memref<4x!tpu.dma_semaphore, #tpu.memory_space<semaphore_mem>> -> memref<1x!tpu.dma_semaphore, #tpu.memory_space<semaphore_mem>>
    %7 = tpu.memref_squeeze %6 : memref<1x!tpu.dma_semaphore, #tpu.memory_space<semaphore_mem>> -> memref<!tpu.dma_semaphore, #tpu.memory_space<semaphore_mem>>
    tpu.enqueue_dma source(%arg8 : memref<1024x128xbf16, #tpu.memory_space<any>>) target(%arg14 : memref<1024x128xbf16, #tpu.memory_space<vmem>>) target_semaphore(%7 : memref<!tpu.dma_semaphore, #tpu.memory_space<semaphore_mem>>)
    %8 = tpu.iota {dimensions = array<i32: 1>} : vector<16x16xi32>
    %c0 = arith.constant 0 : index
    %c0_0 = arith.constant 0 : index
    %9 = vector.load %arg1[%c0, %c0_0] : memref<16x1xi32, #tpu.memory_space<vmem>>, vector<16x1xi32>
    %c8_i32 = arith.constant 8 : i32
    %10 = vector.broadcast %c8_i32 : i32 to vector<16x1xi32>
    %11 = arith.muli %9, %10 : vector<16x1xi32>
    %12 = vector.broadcast %11 : vector<16x1xi32> to vector<16x16xi32>
    %13 = arith.cmpi sge, %8, %12 : vector<16x16xi32>
    %c8_i32_1 = arith.constant 8 : i32
    %14 = vector.broadcast %c8_i32_1 : i32 to vector<16x1xi32>
    %15 = arith.addi %11, %14 : vector<16x1xi32>
    %16 = vector.broadcast %15 : vector<16x1xi32> to vector<16x16xi32>
    %17 = arith.cmpi slt, %8, %16 : vector<16x16xi32>
    %18 = arith.andi %13, %17 : vector<16x16xi1>
    %cst = arith.constant 1.250000e-01 : f32
    %cst_2 = arith.constant 0.000000e+00 : f32
    %19 = vector.broadcast %cst : f32 to vector<16x16xf32>
    %20 = vector.broadcast %cst_2 : f32 to vector<16x16xf32>
    %21 = arith.select %18, %19, %20 : vector<16x16xi1>, vector<16x16xf32>
    %22 = arith.truncf %21 : vector<16x16xf32> to vector<16x16xbf16>
    %c0_3 = arith.constant 0 : index
    %c0_4 = arith.constant 0 : index
    %c0_5 = arith.constant 0 : index
    %23 = vector.load %arg0[%c0_3, %c0_4, %c0_5] : memref<2x8x768xf32, #tpu.memory_space<vmem>>, vector<2x8x768xf32>
    %24 = vector.shape_cast %23 : vector<2x8x768xf32> to vector<16x768xf32>
    %25 = arith.truncf %24 : vector<16x768xf32> to vector<16x768xbf16>
    %cst_6 = arith.constant dense<0.000000e+00> : vector<16x768xf32>
    %26 = tpu.matmul %22, %25, %cst_6 {dimension_numbers = #tpu.dot_dimension_numbers<[1], [0], [0], [1], [0, 0, 1, 1], [], []>} : vector<16x16xbf16>, vector<16x768xbf16>, vector<16x768xf32> -> vector<16x768xf32>
    %c0_i32_7 = arith.constant 0 : i32
    %27 = tpu.memref_slice %arg15[%c0_i32_7] : memref<4x!tpu.dma_semaphore, #tpu.memory_space<semaphore_mem>> -> memref<1x!tpu.dma_semaphore, #tpu.memory_space<semaphore_mem>>
    %28 = tpu.memref_squeeze %27 : memref<1x!tpu.dma_semaphore, #tpu.memory_space<semaphore_mem>> -> memref<!tpu.dma_semaphore, #tpu.memory_space<semaphore_mem>>
    tpu.wait_dma2 semaphore(%28 : memref<!tpu.dma_semaphore, #tpu.memory_space<semaphore_mem>>) src(%arg3 : memref<768x1024xbf16, #tpu.memory_space<any>>) dst(%arg11 : memref<768x1024xbf16, #tpu.memory_space<vmem>>)
    %29 = arith.truncf %26 : vector<16x768xf32> to vector<16x768xbf16>
    %c0_8 = arith.constant 0 : index
    %c0_9 = arith.constant 0 : index
    %30 = vector.load %arg11[%c0_8, %c0_9] : memref<768x1024xbf16, #tpu.memory_space<vmem>>, vector<768x1024xbf16>
    %cst_10 = arith.constant dense<0.000000e+00> : vector<16x1024xf32>
    %31 = tpu.matmul %29, %30, %cst_10 {dimension_numbers = #tpu.dot_dimension_numbers<[1], [0], [0], [1], [0, 0, 1, 1], [], []>} : vector<16x768xbf16>, vector<768x1024xbf16>, vector<16x1024xf32> -> vector<16x1024xf32>
    %c0_11 = arith.constant 0 : index
    %c0_12 = arith.constant 0 : index
    %32 = vector.load %arg4[%c0_11, %c0_12] : memref<1x1024xf32, #tpu.memory_space<vmem>>, vector<1x1024xf32>
    %33 = vector.broadcast %32 : vector<1x1024xf32> to vector<16x1024xf32>
    %34 = arith.addf %31, %33 : vector<16x1024xf32>
    %c1_i32_13 = arith.constant 1 : i32
    %35 = tpu.memref_slice %arg15[%c1_i32_13] : memref<4x!tpu.dma_semaphore, #tpu.memory_space<semaphore_mem>> -> memref<1x!tpu.dma_semaphore, #tpu.memory_space<semaphore_mem>>
    %36 = tpu.memref_squeeze %35 : memref<1x!tpu.dma_semaphore, #tpu.memory_space<semaphore_mem>> -> memref<!tpu.dma_semaphore, #tpu.memory_space<semaphore_mem>>
    tpu.wait_dma2 semaphore(%36 : memref<!tpu.dma_semaphore, #tpu.memory_space<semaphore_mem>>) src(%arg5 : memref<256x1024xbf16, #tpu.memory_space<any>>) dst(%arg12 : memref<256x1024xbf16, #tpu.memory_space<vmem>>)
    %c0_14 = arith.constant 0 : index
    %c0_15 = arith.constant 0 : index
    %37 = vector.load %arg2[%c0_14, %c0_15] : memref<16x256xf32, #tpu.memory_space<vmem>>, vector<16x256xf32>
    %38 = arith.truncf %37 : vector<16x256xf32> to vector<16x256xbf16>
    %c0_16 = arith.constant 0 : index
    %c0_17 = arith.constant 0 : index
    %39 = vector.load %arg12[%c0_16, %c0_17] : memref<256x1024xbf16, #tpu.memory_space<vmem>>, vector<256x1024xbf16>
    %cst_18 = arith.constant dense<0.000000e+00> : vector<16x1024xf32>
    %40 = tpu.matmul %38, %39, %cst_18 {dimension_numbers = #tpu.dot_dimension_numbers<[1], [0], [0], [1], [0, 0, 1, 1], [], []>} : vector<16x256xbf16>, vector<256x1024xbf16>, vector<16x1024xf32> -> vector<16x1024xf32>
    %c0_19 = arith.constant 0 : index
    %c0_20 = arith.constant 0 : index
    %41 = vector.load %arg6[%c0_19, %c0_20] : memref<1x1024xf32, #tpu.memory_space<vmem>>, vector<1x1024xf32>
    %42 = vector.broadcast %41 : vector<1x1024xf32> to vector<16x1024xf32>
    %43 = arith.addf %40, %42 : vector<16x1024xf32>
    %cst_21 = arith.constant 0.000000e+00 : f32
    %44 = vector.broadcast %cst_21 : f32 to vector<16x1024xf32>
    %45 = arith.maximumf %43, %44 : vector<16x1024xf32>
    %c2_i32_22 = arith.constant 2 : i32
    %46 = tpu.memref_slice %arg15[%c2_i32_22] : memref<4x!tpu.dma_semaphore, #tpu.memory_space<semaphore_mem>> -> memref<1x!tpu.dma_semaphore, #tpu.memory_space<semaphore_mem>>
    %47 = tpu.memref_squeeze %46 : memref<1x!tpu.dma_semaphore, #tpu.memory_space<semaphore_mem>> -> memref<!tpu.dma_semaphore, #tpu.memory_space<semaphore_mem>>
    tpu.wait_dma2 semaphore(%47 : memref<!tpu.dma_semaphore, #tpu.memory_space<semaphore_mem>>) src(%arg7 : memref<1024x128xbf16, #tpu.memory_space<any>>) dst(%arg13 : memref<1024x128xbf16, #tpu.memory_space<vmem>>)
    %c3_i32_23 = arith.constant 3 : i32
    %48 = tpu.memref_slice %arg15[%c3_i32_23] : memref<4x!tpu.dma_semaphore, #tpu.memory_space<semaphore_mem>> -> memref<1x!tpu.dma_semaphore, #tpu.memory_space<semaphore_mem>>
    %49 = tpu.memref_squeeze %48 : memref<1x!tpu.dma_semaphore, #tpu.memory_space<semaphore_mem>> -> memref<!tpu.dma_semaphore, #tpu.memory_space<semaphore_mem>>
    tpu.wait_dma2 semaphore(%49 : memref<!tpu.dma_semaphore, #tpu.memory_space<semaphore_mem>>) src(%arg8 : memref<1024x128xbf16, #tpu.memory_space<any>>) dst(%arg14 : memref<1024x128xbf16, #tpu.memory_space<vmem>>)
    %50 = arith.truncf %34 : vector<16x1024xf32> to vector<16x1024xbf16>
    %c0_24 = arith.constant 0 : index
    %c0_25 = arith.constant 0 : index
    %51 = vector.load %arg13[%c0_24, %c0_25] : memref<1024x128xbf16, #tpu.memory_space<vmem>>, vector<1024x128xbf16>
    %cst_26 = arith.constant dense<0.000000e+00> : vector<16x128xf32>
    %52 = tpu.matmul %50, %51, %cst_26 {dimension_numbers = #tpu.dot_dimension_numbers<[1], [0], [0], [1], [0, 0, 1, 1], [], []>} : vector<16x1024xbf16>, vector<1024x128xbf16>, vector<16x128xf32> -> vector<16x128xf32>
    %53 = arith.truncf %45 : vector<16x1024xf32> to vector<16x1024xbf16>
    %c0_27 = arith.constant 0 : index
    %c0_28 = arith.constant 0 : index
    %54 = vector.load %arg14[%c0_27, %c0_28] : memref<1024x128xbf16, #tpu.memory_space<vmem>>, vector<1024x128xbf16>
    %cst_29 = arith.constant dense<0.000000e+00> : vector<16x128xf32>
    %55 = tpu.matmul %53, %54, %cst_29 {dimension_numbers = #tpu.dot_dimension_numbers<[1], [0], [0], [1], [0, 0, 1, 1], [], []>} : vector<16x1024xbf16>, vector<1024x128xbf16>, vector<16x128xf32> -> vector<16x128xf32>
    %56 = arith.addf %52, %55 : vector<16x128xf32>
    %c0_30 = arith.constant 0 : index
    %c0_31 = arith.constant 0 : index
    %57 = vector.load %arg9[%c0_30, %c0_31] : memref<1x128xf32, #tpu.memory_space<vmem>>, vector<1x128xf32>
    %58 = vector.broadcast %57 : vector<1x128xf32> to vector<16x128xf32>
    %59 = arith.addf %56, %58 : vector<16x128xf32>
    %cst_32 = arith.constant dense<0xFF800000> : vector<16xf32>
    %60 = vector.multi_reduction <maximumf>, %59, %cst_32 [1] : vector<16x128xf32> to vector<16xf32>
    %61 = vector.shape_cast %60 : vector<16xf32> to vector<16x1xf32>
    %62 = vector.broadcast %61 : vector<16x1xf32> to vector<16x128xf32>
    %63 = arith.subf %59, %62 : vector<16x128xf32>
    %64 = math.exp %63 : vector<16x128xf32>
    %cst_33 = arith.constant dense<0.000000e+00> : vector<16xf32>
    %65 = vector.multi_reduction <add>, %64, %cst_33 [1] : vector<16x128xf32> to vector<16xf32>
    %66 = vector.shape_cast %65 : vector<16xf32> to vector<16x1xf32>
    %67 = vector.broadcast %66 : vector<16x1xf32> to vector<16x128xf32>
    %68 = arith.divf %64, %67 : vector<16x128xf32>
    %c0_34 = arith.constant 0 : index
    %c0_35 = arith.constant 0 : index
    %69 = vector.load %arg10[%c0_34, %c0_35] : memref<16x128xf32, #tpu.memory_space<vmem>>, vector<16x128xf32>
    tpu.vector_store %arg10[%c0_34, %c0_35], %68 {strides = array<i32>} : memref<16x128xf32, #tpu.memory_space<vmem>>, vector<16x128xf32>,
    return
  }
}

</mosaic_0001>

<bundles_post_ra>
// kernel: tpu_custom_call.1
= control target key start
LH: loop header
LB: loop body
LE: loop exit
PB: predicated region body
PF: predicated region fallthrough
CT: control target
= control target key end

     0   :  { %15 = vsyncpa [#allocation8], 0  ;;  %s3138_s0 = inlined_call_operand.hbm [shape: f32[2,8,768], index: 0, kind: input, shape index: {}]   ;;  %s3139_s1 = inlined_call_operand.vmem [shape: s32[16,1], index: 1, kind: input, shape index: {}]   ;;  %s3140_s2 = inlined_call_operand.hbm [shape: f32[16,256], index: 2, kind: input, shape index: {}]   ;;  %s3141_s3 = inlined_call_operand.hbm [shape: bf16[768,1024], index: 3, kind: input, shape index: {}]   ;;  %s3142_s4 = inlined_call_operand.hbm [shape: f32[1,1024], index: 4, kind: input, shape index: {}]   ;;  %s3143_s5 = inlined_call_operand.hbm [shape: bf16[256,1024], index: 5, kind: input, shape index: {}]   ;;  %s3144_s6 = inlined_call_operand.hbm [shape: f32[1,1024], index: 6, kind: input, shape index: {}]   ;;  %s3145_s7 = inlined_call_operand.hbm [shape: bf16[1024,128], index: 7, kind: input, shape index: {}]   ;;  %s3146_s8 = inlined_call_operand.hbm [shape: bf16[1024,128], index: 8, kind: input, shape index: {}]   ;;  %s3147_s9 = inlined_call_operand.hbm [shape: f32[1,128], index: 9, kind: input, shape index: {}]   ;;  %s3148_s10 = inlined_call_operand.hbm [shape: f32[16,128], index: 10, kind: output, shape index: {}]  }
   0x1   :  { %16 = vsyncpa [#allocation11], 0 }
   0x2   :  { %17 = vsyncpa [#allocation14], 0 }
   0x3   :  { %18 = vsyncpa [#allocation9], 0  ;;  %s2703_s13 = smov [#allocation10]   ;;  %s2511_s17 = scalar_lea.hbm %s3140_s2, 512 }
   0x4   :  { %s38_s14 = sshll.u32 %s2703_s13, 4  ;;  %p2512_p0 = scmp.ne.s32.totalorder %s3140_s2, %s2511_s17  ;;  %s39_s14 = int_to_ptr.vmem [resolvable:$true] %s38_s14 }
   0x5   :  { %p2515_p1 = scmp.lt.u32.totalorder %s2511_s17, %s3140_s2 }
   0x7   :  { %p2517_p2 = pnand %p2515_p1, %p2512_p0 }
   0x9   :  { %2520 = shalt.err (!%p2517_p2)
}
   0xa   :  { %s2521_s22 = scalar_lea.vmem %s39_s14, 512  ;;  %p2526_p4 = scmp.lt.s32.totalorder %s39_s14, %s39_s14 }
   0xb   :  { %p2522_p3 = scmp.ne.s32.totalorder %s39_s14, %s2521_s22  ;;  %p2527_p5 = scmp.lt.s32.totalorder %s2521_s22, %s2521_s22 }
   0xd   :  { %p2528_p6 = por %p2527_p5, %p2526_p4 }
   0xf   :  { %p2529_p7 = pnand %p2528_p6, %p2522_p3 }
  0x11   :  { %2532 = shalt.err (!%p2529_p7)
}
  0x12   :  { %s2704_s23 = smov 256   ;;  %s2705_s24 = smov 16  }
  0x13   :  { %44 = dma.hbm_to_vmem [thread:$0]  %s3140_s2, 512, %s39_s14, [#allocation11], %s2704_s23, %s2704_s23, %s2705_s24  }
  0x14   :  { %s2706_s27 = smov [#allocation13]   ;;  %s2707_s29 = smov [#allocation7]  }
  0x15   :  { %s61_s28 = sshll.u32 %s2706_s27, 4  ;;  %s24_s30 = sshll.u32 %s2707_s29, 4  ;;  %s62_s28 = int_to_ptr.vmem [resolvable:$true] %s61_s28  ;;  %s25_s30 = int_to_ptr.vmem [resolvable:$true] %s24_s30 }
  0x16   :  { %s2533_s13 = scalar_lea.hbm %s3144_s6, 128 }
  0x17   :  { %p2534_p8 = scmp.ne.s32.totalorder %s3144_s6, %s2533_s13  ;;  %p2537_p9 = scmp.lt.u32.totalorder %s2533_s13, %s3144_s6 }
  0x19   :  { %p2539_p10 = pnand %p2537_p9, %p2534_p8 }
  0x1b   :  { %2542 = shalt.err (!%p2539_p10)
}
  0x1c   :  { %s2543_s2 = scalar_lea.vmem %s62_s28, 128  ;;  %p2548_p12 = scmp.lt.s32.totalorder %s62_s28, %s62_s28 }
  0x1d   :  { %p2544_p11 = scmp.ne.s32.totalorder %s62_s28, %s2543_s2  ;;  %p2549_p13 = scmp.lt.s32.totalorder %s2543_s2, %s2543_s2 }
  0x1f   :  { %p2550_p0 = por %p2549_p13, %p2548_p12 }
  0x21   :  { %p2551_p1 = pnand %p2550_p0, %p2544_p11 }
  0x23   :  { %2554 = shalt.err (!%p2551_p1)
}
  0x24   :  { %64 = dma.hbm_to_vmem [thread:$0]  %s3144_s6, 128, %s62_s28, [#allocation14]  }
  0x25   :  { %s2555_s22 = scalar_lea.hbm %s3138_s0, 1536 }
  0x26   :  { %p2556_p2 = scmp.ne.s32.totalorder %s3138_s0, %s2555_s22  ;;  %p2559_p3 = scmp.lt.u32.totalorder %s2555_s22, %s3138_s0 }
  0x28   :  { %p2561_p4 = pnand %p2559_p3, %p2556_p2 }
  0x2a   :  { %2564 = shalt.err (!%p2561_p4)
}
  0x2b   :  { %s2565_s27 = scalar_lea.vmem %s25_s30, 1536  ;;  %p2570_p6 = scmp.lt.s32.totalorder %s25_s30, %s25_s30 }
  0x2c   :  { %p2566_p5 = scmp.ne.s32.totalorder %s25_s30, %s2565_s27  ;;  %p2571_p7 = scmp.lt.s32.totalorder %s2565_s27, %s2565_s27 }
  0x2e   :  { %p2572_p8 = por %p2571_p7, %p2570_p6 }
  0x30   :  { %p2573_p9 = pnand %p2572_p8, %p2566_p5 }
  0x32   :  { %2576 = shalt.err (!%p2573_p9)
}
  0x33   :  { %s2708_s6 = smov 768   ;;  %s2709_s28 = smov 48  }
  0x34   :  { %30 = dma.hbm_to_vmem [thread:$0]  %s3138_s0, 1536, %s25_s30, [#allocation8], %s2708_s6, %s2708_s6, %s2709_s28  }
  0x35   :  { %s2710_s12 = smov [#allocation12]   ;;  %s2711_s15 = smov [#allocation15]  }
  0x36   :  { %s51_s13 = sshll.u32 %s2710_s12, 4  ;;  %s71_s16 = sshll.u32 %s2711_s15, 4  ;;  %s52_s13 = int_to_ptr.vmem [resolvable:$true] %s51_s13  ;;  %s72_s16 = int_to_ptr.vmem [resolvable:$true] %s71_s16 }
  0x37   :  { %s2577_s2 = scalar_lea.hbm %s3142_s4, 128 }
  0x38   :  { %p2578_p10 = scmp.ne.s32.totalorder %s3142_s4, %s2577_s2  ;;  %p2581_p11 = scmp.lt.u32.totalorder %s2577_s2, %s3142_s4 }
  0x3a   :  { %p2583_p12 = pnand %p2581_p11, %p2578_p10 }
  0x3c   :  { %2586 = shalt.err (!%p2583_p12)
}
  0x3d   :  { %s2587_s0 = scalar_lea.vmem %s52_s13, 128  ;;  %p2592_p0 = scmp.lt.s32.totalorder %s52_s13, %s52_s13 }
  0x3e   :  { %p2588_p13 = scmp.ne.s32.totalorder %s52_s13, %s2587_s0  ;;  %p2593_p1 = scmp.lt.s32.totalorder %s2587_s0, %s2587_s0 }
  0x40   :  { %p2594_p2 = por %p2593_p1, %p2592_p0 }
  0x42   :  { %p2595_p3 = pnand %p2594_p2, %p2588_p13 }
  0x44   :  { %2598 = shalt.err (!%p2595_p3)
}
  0x45   :  { %54 = dma.hbm_to_vmem [thread:$0]  %s3142_s4, 128, %s52_s13, [#allocation11]  }
  0x46   :  { %s2599_s25 = scalar_lea.hbm %s3147_s9, 16 }
  0x47   :  { %p2600_p4 = scmp.ne.s32.totalorder %s3147_s9, %s2599_s25  ;;  %p2603_p5 = scmp.lt.u32.totalorder %s2599_s25, %s3147_s9 }
  0x49   :  { %p2605_p6 = pnand %p2603_p5, %p2600_p4 }
  0x4b   :  { %2608 = shalt.err (!%p2605_p6)
}
  0x4c   :  { %s2609_s29 = scalar_lea.vmem %s72_s16, 16  ;;  %s2613_s11 = scalar_lea.vmem %s72_s16, 32 }
  0x4d   :  { %p2610_p7 = scmp.ne.s32.totalorder %s72_s16, %s2609_s29  ;;  %p2614_p8 = scmp.lt.s32.totalorder %s72_s16, %s72_s16 }
  0x4e   :  { %p2615_p9 = scmp.lt.s32.totalorder %s2613_s11, %s2609_s29 }
  0x50   :  { %p2616_p10 = por %p2615_p9, %p2614_p8 }
  0x52   :  { %p2617_p11 = pnand %p2616_p10, %p2610_p7 }
  0x54   :  { %2620 = shalt.err (!%p2617_p11)
}
  0x55   :  { %74 = dma.hbm_to_vmem [thread:$0]  %s3147_s9, 16, %s72_s16, [#allocation14]  }
  0x56   :  { %2687 = dma.done.wait [#allocation8], 1536  }
  0x57   :  { %2688 = vsyncadd [#allocation8], 4294965760 }
  0x58   :  { %2689 = dma.done.wait [#allocation11], 640  }
  0x59   :  { %2690 = vsyncadd [#allocation11], 4294966656 }
  0x5a   :  { %2691 = dma.done.wait [#allocation14], 144  }
  0x5b   :  { %2692 = vsyncadd [#allocation14], 4294967152  ;;  %s95_s13 = sld [smem:[#allocation0]]   ;;  %s2712_s15 = smov [#allocation2]   ;;  %v2713_v0 = vmov 0   ;;  %v185_v22 = vlaneseq  ;;  %v2726_v30 = vmov 0.0  }
  0x5c   :  { %s2845_s17 = sshll.u32 %s2712_s15, 4  ;;  %2501 = vset.pattern.permute.xlu0 %v2713_v0  ;;  %2502 = vset.pattern.permute.xlu1 %v2713_v0  ;;  %s2714_s18 = smov 1024   ;;  %vm232_vm6 = vcmask 130048   ;;  %s104_s17 = int_to_ptr.vmem [resolvable:$true] %s2845_s17 }
  0x5d   :  { %107 = sst [smem:[#allocation18]] %s2714_s18  ;;  %268 = vmatprep.mubr.bf16.mxu0 %v2713_v0  ;;  %311 = vmatprep.mubr.bf16.mxu1 %v2713_v0  ;;  %s2715_s9 = smov 8   ;;  %v186_v23 = vand.u32 127, %v185_v22 }
  0x5e   :  { %109 = sst [smem:[#allocation18 + $0x1]] %s2714_s18  ;;  %s2716_s16 = smov 64  }
  0x5f   :  { %111 = sst [smem:[#allocation18 + $0x2]] %s2715_s9  ;;  %s2717_s2 = smov 128  }
  0x60   :  { %113 = sst [smem:[#allocation18 + $0x3]] %s2716_s16  ;;  %s2718_s19 = smov 2  }
  0x61   :  { %115 = sst [smem:[#allocation18 + $0x4]] %s2717_s2  ;;  %s2238_s14 = sshll.u32 %s95_s13, 26 }
  0x62   :  { %117 = sst [smem:[#allocation18 + $0x5]] %s2718_s19  ;;  %s2239_s20 = sadd.s32 134217728, %s2238_s14 }
  0x63   :  { %s2719_s21 = smov 512   ;;  %121 = sst [smem:[#allocation18 + $0x7]] %s2716_s16 }
  0x64   :  { %119 = sst [smem:[#allocation18 + $0x6]] %s2719_s21  ;;  %s2720_s0 = smov 4  }
  0x65   :  { %123 = sst [smem:[#allocation18 + $0x8]] %s2720_s0  ;;  %s2721_s30 = smov [#allocation6]  }
  0x66   :  { %s2722_s22 = smov [#allocation17]   ;;  %s2723_s25 = smov [#allocation3]  }
  0x67   :  { %125 = dma.general %s3141_s3, 49152, %s104_s17, %s2721_s30, %s2722_s22, [#allocation18], %s2239_s20, 0  }
  0x68   :  { %142 = sst [smem:[#allocation20]] %s2714_s18  ;;  %s138_s26 = sshll.u32 %s2723_s25, 4  ;;  %s139_s26 = int_to_ptr.vmem [resolvable:$true] %s138_s26 }
  0x69   :  { %144 = sst [smem:[#allocation20 + $0x1]] %s2714_s18  ;;  %s2724_s27 = smov [#allocation6 + $0x1]  }
  0x6a   :  { %146 = sst [smem:[#allocation20 + $0x2]] %s2715_s9  ;;  %s2725_s6 = smov [#allocation19]  }
  0x6b   :  { %148 = sst [smem:[#allocation20 + $0x3]] %s2716_s16  ;;  %s2728_s13 = smov [#allocation5]  }
  0x6c   :  { %150 = sst [smem:[#allocation20 + $0x4]] %s2717_s2  ;;  %s181_s15 = sshll.u32 %s2728_s13, 4  ;;  %s182_s15 = int_to_ptr.vmem [resolvable:$true] %s181_s15 }
  0x6d   :  { %152 = sst [smem:[#allocation20 + $0x5]] %s2718_s19 }
  0x6e   :  { %154 = sst [smem:[#allocation20 + $0x6]] %s2719_s21 }
  0x6f   :  { %156 = sst [smem:[#allocation20 + $0x7]] %s2716_s16  ;;  %s2621_s16 = scalar_lea.hbm %s3145_s7, 8192 }
  0x70   :  { %158 = sst [smem:[#allocation20 + $0x8]] %s2720_s0  ;;  %p2622_p12 = scmp.ne.s32.totalorder %s3145_s7, %s2621_s16 }
  0x71   :  { %160 = dma.general %s3143_s5, 16384, %s139_s26, %s2724_s27, %s2725_s6, [#allocation20], %s2239_s20, 0  }
  0x72   :  { %v187_v1 = vld [vmem:[%s3139_s1] sm:$0xff]  ;;  %v188_v2 = vld [vmem:[%s3139_s1 + $0x8] sm:$0xff]  ;;  %v221_v8 = vld [vmem:[#allocation7 + $0x38] sm:$0xff]  ;;  %s2727_s1 = smov [#allocation4]   ;;  %p2625_p13 = scmp.lt.u32.totalorder %s2621_s16, %s3145_s7 }
  0x73   :  { %v189_v3 = vmul.u32 8, %v187_v1  ;;  %v190_v4 = vmul.u32 8, %v188_v2  ;;  %v215_v7 = vld [vmem:[#allocation7 + $0x8] sm:$0xff]  ;;  %v217_v9 = vld [vmem:[#allocation7 + $0x18] sm:$0xff]  ;;  %v214_v11 = vld [vmem:[#allocation7] sm:$0xff]  ;;  %s169_s5 = sshll.u32 %s2727_s1, 4  ;;  %s170_s5 = int_to_ptr.vmem [resolvable:$true] %s169_s5 }
  0x74   :  { %v227_v10 = vpack.c.bf16 %v221_v8, %v215_v7  ;;  %v220_v12 = vld [vmem:[#allocation7 + $0x30] sm:$0xff]  ;;  %v223_v13 = vld [vmem:[#allocation7 + $0x48] sm:$0xff]  ;;  %v222_v17 = vld [vmem:[#allocation7 + $0x40] sm:$0xff]  ;;  %p2627_p0 = pnand %p2625_p13, %p2622_p12 }
  0x75   :  { %192 = vperm.xlu0 %2501, %v189_v3   ;;  %v199_v5 = vadd.s32 8, %v189_v3  ;;  %v200_v6 = vadd.s32 8, %v190_v4  ;;  %v226_v14 = vpack.c.bf16 %v220_v12, %v214_v11  ;;  %v229_v15 = vpack.c.bf16 %v223_v13, %v217_v9  ;;  %v216_v16 = vld [vmem:[#allocation7 + $0x10] sm:$0xff]  ;;  %v219_v19 = vld [vmem:[#allocation7 + $0x28] sm:$0xff]  ;;  %v225_v20 = vld [vmem:[#allocation7 + $0x58] sm:$0xff] }
  0x76   :  { %236 = vmatprep.subr.bf16.mxu0 %v227_v10  ;;  %v228_v18 = vpack.c.bf16 %v222_v17, %v216_v16  ;;  %v231_v21 = vpack.c.bf16 %v225_v20, %v219_v19  ;;  %v218_v28 = vld [vmem:[#allocation7 + $0x20] sm:$0xff]  ;;  %v224_v29 = vld [vmem:[#allocation7 + $0x50] sm:$0xff] }
  0x77   :  { %202 = vperm.xlu1 %2502, %v199_v5   ;;  %237 = vmatpush1.bf16.msra.mxu0 %v226_v14  ;;  %v230_v33 = vpack.c.bf16 %v224_v29, %v218_v28 }
  0x78   :  { %279 = vmatprep.subr.bf16.mxu1 %v229_v15  ;;  %322 = vmatprep.subr.bf16.mxu0 %v231_v21 }
  0x79   :  { %195 = vperm.xlu0 %2501, %v190_v4   ;;  %280 = vmatpush1.bf16.msra.mxu1 %v228_v18 }
  0x7b   :  { %205 = vperm.xlu1 %2502, %v200_v6  }
  0xf4   :  { %v193_v24 = vpop.permute.xlu0 %192 }
  0xf5   :  { %vm197_vm0 = vcmp.ge.s32.totalorder %v186_v23, %v193_v24 }
  0xf6   :  { %v203_v25 = vpop.permute.xlu1 %202 }
  0xf7   :  { %vm207_vm1 = vcmp.lt.s32.totalorder %v186_v23, %v203_v25 }
  0xf8   :  { %v196_v26 = vpop.permute.xlu0 %195  ;;  %vm209_vm2 = vmand %vm197_vm0, %vm207_vm1 }
  0xf9   :  { %vm198_vm3 = vcmp.ge.s32.totalorder %v186_v23, %v196_v26  ;;  %v211_v31 = vsel %vm209_vm2, 0.125, %v2726_v30 }
  0xfa   :  { %v206_v27 = vpop.permute.xlu1 %205 }
  0xfb   :  { %vm208_vm4 = vcmp.lt.s32.totalorder %v186_v23, %v206_v27 }
  0xfc   :  { %vm210_vm5 = vmand %vm198_vm3, %vm208_vm4 }
  0xfd   :  { %v212_v32 = vsel %vm210_vm5, 0.125, %v2726_v30 }
  0xfe   :  { %v213_v34 = vpack.c.bf16 %v212_v32, %v211_v31 }
 0x100   :  { %2242 = vmatmul.mubr.msk.bf16.vlgmr.msra.gmra.mrb[0].mxu0 %vm232_vm6, %v213_v34  ;;  %2243 = vmatmul.mubr.msk.bf16.vlgmr.msra.gmra.mrb[0].mxu1 %vm232_vm6, %v213_v34 }
 0x101   :  { %323 = vmatpush1.bf16.msra.mxu0 %v230_v33  ;;  %354 = vmatprep.mubr.bf16.mxu0 %v2713_v0 }
 0x108   :  { %2244 = vmatmul.mubr.msk.bf16.vlgmr.msra.gmra.mrb[4].mxu0 %vm232_vm6, %v213_v34 }
 0x109   :  { %2630 = shalt.err (!%p2627_p0)  }
 0x10a   :  { %s2631_s0 = scalar_lea.vmem %s170_s5, 8192  ;;  %p2636_p2 = scmp.lt.s32.totalorder %s170_s5, %s170_s5 }
 0x10b   :  { %p2632_p1 = scmp.ne.s32.totalorder %s170_s5, %s2631_s0  ;;  %p2637_p3 = scmp.lt.s32.totalorder %s2631_s0, %s2631_s0 }
 0x10d   :  { %p2638_p4 = por %p2637_p3, %p2636_p2 }
 0x10f   :  { %p2639_p5 = pnand %p2638_p4, %p2632_p1 }
 0x111   :  { %2642 = shalt.err (!%p2639_p5)  }
 0x112   :  { %172 = dma.hbm_to_vmem [thread:$0]  %s3145_s7, 8192, %s170_s5, [#allocation6 + $0x2] }
 0x113   :  { %s2643_s25 = scalar_lea.hbm %s3146_s8, 8192 }
 0x114   :  { %p2644_p6 = scmp.ne.s32.totalorder %s3146_s8, %s2643_s25  ;;  %p2647_p7 = scmp.lt.u32.totalorder %s2643_s25, %s3146_s8 }
 0x116   :  { %p2649_p8 = pnand %p2647_p7, %p2644_p6 }
 0x118   :  { %2652 = shalt.err (!%p2649_p8)  }
 0x119   :  { %s2653_s29 = scalar_lea.vmem %s182_s15, 8192  ;;  %p2658_p10 = scmp.lt.s32.totalorder %s182_s15, %s182_s15 }
 0x11a   :  { %p2654_p9 = scmp.ne.s32.totalorder %s182_s15, %s2653_s29  ;;  %p2659_p11 = scmp.lt.s32.totalorder %s2653_s29, %s2653_s29 }
 0x11c   :  { %p2660_p12 = por %p2659_p11, %p2658_p10 }
 0x11e   :  { %p2661_p13 = pnand %p2660_p12, %p2654_p9 }
 0x120   :  { %2664 = shalt.err (!%p2661_p13)  }
 0x121   :  { %184 = dma.hbm_to_vmem [thread:$0]  %s3146_s8, 8192, %s182_s15, [#allocation6 + $0x3] }
 0x1d3   :  { %v2894_v35 = vpop.f32.mrb[0].mxu0  ;;  %v2896_v36 = vpop.f32.mrb[0].mxu1 }
 0x1d4   :  { %v272_v37 = vpop.f32.mrb[1].mxu0  ;;  %v2898_v38 = vpop.f32.mrb[1].mxu1 }
 0x1d5   :  { %v2900_v39 = vpop.f32.mrb[2].mxu0  ;;  %v2902_v40 = vpop.f32.mrb[2].mxu1 }
 0x1d6   :  { %v276_v41 = vpop.f32.mrb[3].mxu0  ;;  %v2904_v42 = vpop.f32.mrb[3].mxu1 }
 0x1db   :  { %v2906_v43 = vpop.f32.mrb[4].mxu0 }
 0x1dc   :  { %v2908_v44 = vpop.f32.mrb[5].mxu0 }
 0x1dd   :  { %v2910_v45 = vpop.f32.mrb[6].mxu0 }
 0x1de   :  { %v2912_v46 = vpop.f32.mrb[7].mxu0 }
 0x1df   :  { %2693 = dma.done.wait [#allocation6], 49152 }
 0x1e0   :  { %2694 = vsyncadd [#allocation6], 4294918144  ;;  %v2914_v47 = vpack.c.bf16 %v276_v41, %v272_v37  ;;  %v376_v48 = vld [vmem:[#allocation2 + $0x8] sm:$0xff]  ;;  %v378_v49 = vld [vmem:[#allocation2 + $0x18] sm:$0xff] }
 0x1e1   :  { %v375_v50 = vld [vmem:[#allocation2] sm:$0xff]  ;;  %801 = vmatprep.subr.bf16.mxu1 %v376_v48  ;;  %930 = vmatprep.subr.bf16.mxu0 %v378_v49  ;;  %v377_v51 = vld [vmem:[#allocation2 + $0x10] sm:$0xff]  ;;  %v384_v52 = vld [vmem:[#allocation2 + $0x48] sm:$0xff] }
 0x1e2   :  { %833 = vmatprep.mubr.bf16.mxu1 %v2914_v47  ;;  %962 = vmatprep.mubr.bf16.mxu0 %v2914_v47  ;;  %v386_v53 = vld [vmem:[#allocation2 + $0x58] sm:$0xff]  ;;  %v383_v54 = vld [vmem:[#allocation2 + $0x40] sm:$0xff]  ;;  %v385_v55 = vld [vmem:[#allocation2 + $0x50] sm:$0xff] }
 0x1e3   :  { %802 = vmatpush1.bf16.msra.mxu1 %v375_v50  ;;  %931 = vmatpush1.bf16.msra.mxu0 %v377_v51  ;;  %v392_v56 = vld [vmem:[#allocation2 + $0x88] sm:$0xff]  ;;  %v394_v57 = vld [vmem:[#allocation2 + $0x98] sm:$0xff]  ;;  %v391_v58 = vld [vmem:[#allocation2 + $0x80] sm:$0xff] }
 0x1e4   :  { %803 = vmatprep.subr.bf16.mxu1 %v384_v52  ;;  %932 = vmatprep.subr.bf16.mxu0 %v386_v53  ;;  %v393_v59 = vld [vmem:[#allocation2 + $0x90] sm:$0xff]  ;;  %v400_v60 = vld [vmem:[#allocation2 + $0xc8] sm:$0xff]  ;;  %v402_v61 = vld [vmem:[#allocation2 + $0xd8] sm:$0xff] }
 0x1e5   :  { %v399_v62 = vld [vmem:[#allocation2 + $0xc0] sm:$0xff]  ;;  %v401_v63 = vld [vmem:[#allocation2 + $0xd0] sm:$0xff]  ;;  %v408_v0 = vld [vmem:[#allocation2 + $0x108] sm:$0xff] }
 0x1e6   :  { %v410_v1 = vld [vmem:[#allocation2 + $0x118] sm:$0xff]  ;;  %v407_v2 = vld [vmem:[#allocation2 + $0x100] sm:$0xff]  ;;  %v409_v3 = vld [vmem:[#allocation2 + $0x110] sm:$0xff] }
 0x1e7   :  { %804 = vmatpush1.bf16.msra.mxu1 %v383_v54  ;;  %933 = vmatpush1.bf16.msra.mxu0 %v385_v55  ;;  %v416_v4 = vld [vmem:[#allocation2 + $0x148] sm:$0xff]  ;;  %v418_v5 = vld [vmem:[#allocation2 + $0x158] sm:$0xff]  ;;  %v415_v6 = vld [vmem:[#allocation2 + $0x140] sm:$0xff] }
 0x1e8   :  { %805 = vmatprep.subr.bf16.mxu1 %v392_v56  ;;  %934 = vmatprep.subr.bf16.mxu0 %v394_v57  ;;  %v417_v7 = vld [vmem:[#allocation2 + $0x150] sm:$0xff]  ;;  %v424_v8 = vld [vmem:[#allocation2 + $0x188] sm:$0xff]  ;;  %v426_v9 = vld [vmem:[#allocation2 + $0x198] sm:$0xff] }
 0x1e9   :  { %v423_v10 = vld [vmem:[#allocation2 + $0x180] sm:$0xff]  ;;  %v425_v11 = vld [vmem:[#allocation2 + $0x190] sm:$0xff]  ;;  %v432_v12 = vld [vmem:[#allocation2 + $0x1c8] sm:$0xff] }
 0x1ea   :  { %v434_v13 = vld [vmem:[#allocation2 + $0x1d8] sm:$0xff]  ;;  %v431_v14 = vld [vmem:[#allocation2 + $0x1c0] sm:$0xff]  ;;  %v433_v15 = vld [vmem:[#allocation2 + $0x1d0] sm:$0xff] }
 0x1eb   :  { %806 = vmatpush1.bf16.msra.mxu1 %v391_v58  ;;  %935 = vmatpush1.bf16.msra.mxu0 %v393_v59  ;;  %v440_v16 = vld [vmem:[#allocation2 + $0x208] sm:$0xff]  ;;  %v442_v17 = vld [vmem:[#allocation2 + $0x218] sm:$0xff]  ;;  %v439_v18 = vld [vmem:[#allocation2 + $0x200] sm:$0xff] }
 0x1ec   :  { %807 = vmatprep.subr.bf16.mxu1 %v400_v60  ;;  %936 = vmatprep.subr.bf16.mxu0 %v402_v61  ;;  %v441_v19 = vld [vmem:[#allocation2 + $0x210] sm:$0xff]  ;;  %v448_v20 = vld [vmem:[#allocation2 + $0x248] sm:$0xff]  ;;  %v450_v21 = vld [vmem:[#allocation2 + $0x258] sm:$0xff] }
 0x1ed   :  { %v447_v23 = vld [vmem:[#allocation2 + $0x240] sm:$0xff]  ;;  %v449_v24 = vld [vmem:[#allocation2 + $0x250] sm:$0xff]  ;;  %v456_v25 = vld [vmem:[#allocation2 + $0x288] sm:$0xff] }
 0x1ee   :  { %v458_v26 = vld [vmem:[#allocation2 + $0x298] sm:$0xff]  ;;  %v455_v27 = vld [vmem:[#allocation2 + $0x280] sm:$0xff]  ;;  %v457_v28 = vld [vmem:[#allocation2 + $0x290] sm:$0xff] }
 0x1ef   :  { %808 = vmatpush1.bf16.msra.mxu1 %v399_v62  ;;  %937 = vmatpush1.bf16.msra.mxu0 %v401_v63  ;;  %v464_v29 = vld [vmem:[#allocation2 + $0x2c8] sm:$0xff]  ;;  %v466_v30 = vld [vmem:[#allocation2 + $0x2d8] sm:$0xff]  ;;  %v463_v31 = vld [vmem:[#allocation2 + $0x2c0] sm:$0xff]  ;;  %v2920_v62 = vpack.c.bf16 %v2900_v39, %v2894_v35 }
 0x1f0   :  { %809 = vmatprep.subr.bf16.mxu1 %v408_v0  ;;  %938 = vmatprep.subr.bf16.mxu0 %v410_v1  ;;  %v465_v32 = vld [vmem:[#allocation2 + $0x2d0] sm:$0xff]  ;;  %v472_v33 = vld [vmem:[#allocation2 + $0x308] sm:$0xff]  ;;  %v474_v34 = vld [vmem:[#allocation2 + $0x318] sm:$0xff] }
 0x1f1   :  { %v471_v37 = vld [vmem:[#allocation2 + $0x300] sm:$0xff]  ;;  %v473_v41 = vld [vmem:[#allocation2 + $0x310] sm:$0xff]  ;;  %v480_v48 = vld [vmem:[#allocation2 + $0x348] sm:$0xff] }
 0x1f2   :  { %v482_v49 = vld [vmem:[#allocation2 + $0x358] sm:$0xff]  ;;  %v479_v50 = vld [vmem:[#allocation2 + $0x340] sm:$0xff]  ;;  %v481_v51 = vld [vmem:[#allocation2 + $0x350] sm:$0xff] }
 0x1f3   :  { %810 = vmatpush1.bf16.msra.mxu1 %v407_v2  ;;  %939 = vmatpush1.bf16.msra.mxu0 %v409_v3  ;;  %v488_v52 = vld [vmem:[#allocation2 + $0x388] sm:$0xff]  ;;  %v490_v53 = vld [vmem:[#allocation2 + $0x398] sm:$0xff]  ;;  %v487_v54 = vld [vmem:[#allocation2 + $0x380] sm:$0xff]  ;;  %v2924_v3 = vpack.c.bf16 %v2904_v42, %v2898_v38 }
 0x1f4   :  { %811 = vmatprep.subr.bf16.mxu1 %v416_v4  ;;  %940 = vmatprep.subr.bf16.mxu0 %v418_v5  ;;  %v489_v55 = vld [vmem:[#allocation2 + $0x390] sm:$0xff]  ;;  %v496_v56 = vld [vmem:[#allocation2 + $0x3c8] sm:$0xff]  ;;  %v498_v57 = vld [vmem:[#allocation2 + $0x3d8] sm:$0xff] }
 0x1f5   :  { %v495_v58 = vld [vmem:[#allocation2 + $0x3c0] sm:$0xff]  ;;  %v497_v59 = vld [vmem:[#allocation2 + $0x3d0] sm:$0xff]  ;;  %v504_v60 = vld [vmem:[#allocation2 + $0x408] sm:$0xff] }
 0x1f6   :  { %v506_v61 = vld [vmem:[#allocation2 + $0x418] sm:$0xff]  ;;  %v503_v63 = vld [vmem:[#allocation2 + $0x400] sm:$0xff]  ;;  %v505_v0 = vld [vmem:[#allocation2 + $0x410] sm:$0xff] }
 0x1f7   :  { %812 = vmatpush1.bf16.msra.mxu1 %v415_v6  ;;  %941 = vmatpush1.bf16.msra.mxu0 %v417_v7  ;;  %v512_v1 = vld [vmem:[#allocation2 + $0x448] sm:$0xff]  ;;  %v514_v2 = vld [vmem:[#allocation2 + $0x458] sm:$0xff]  ;;  %v511_v35 = vld [vmem:[#allocation2 + $0x440] sm:$0xff] }
 0x1f8   :  { %813 = vmatprep.subr.bf16.mxu1 %v424_v8  ;;  %942 = vmatprep.subr.bf16.mxu0 %v426_v9  ;;  %v513_v39 = vld [vmem:[#allocation2 + $0x450] sm:$0xff]  ;;  %v520_v4 = vld [vmem:[#allocation2 + $0x488] sm:$0xff]  ;;  %v522_v5 = vld [vmem:[#allocation2 + $0x498] sm:$0xff] }
 0x1f9   :  { %v519_v38 = vld [vmem:[#allocation2 + $0x480] sm:$0xff]  ;;  %v521_v42 = vld [vmem:[#allocation2 + $0x490] sm:$0xff]  ;;  %v528_v6 = vld [vmem:[#allocation2 + $0x4c8] sm:$0xff] }
 0x1fa   :  { %v530_v7 = vld [vmem:[#allocation2 + $0x4d8] sm:$0xff]  ;;  %v527_v8 = vld [vmem:[#allocation2 + $0x4c0] sm:$0xff]  ;;  %v529_v9 = vld [vmem:[#allocation2 + $0x4d0] sm:$0xff] }
 0x1fb   :  { %814 = vmatpush1.bf16.msra.mxu1 %v423_v10  ;;  %943 = vmatpush1.bf16.msra.mxu0 %v425_v11  ;;  %v536_v10 = vld [vmem:[#allocation2 + $0x508] sm:$0xff]  ;;  %v538_v11 = vld [vmem:[#allocation2 + $0x518] sm:$0xff] }
 0x1fc   :  { %815 = vmatprep.subr.bf16.mxu1 %v432_v12  ;;  %944 = vmatprep.subr.bf16.mxu0 %v434_v13  ;;  %v535_v12 = vld [vmem:[#allocation2 + $0x500] sm:$0xff]  ;;  %v537_v13 = vld [vmem:[#allocation2 + $0x510] sm:$0xff] }
 0x1ff   :  { %816 = vmatpush1.bf16.msra.mxu1 %v431_v14  ;;  %945 = vmatpush1.bf16.msra.mxu0 %v433_v15  ;;  %v544_v14 = vld [vmem:[#allocation2 + $0x548] sm:$0xff]  ;;  %v546_v15 = vld [vmem:[#allocation2 + $0x558] sm:$0xff] }
 0x200   :  { %817 = vmatprep.subr.bf16.mxu1 %v440_v16  ;;  %946 = vmatprep.subr.bf16.mxu0 %v442_v17  ;;  %v543_v16 = vld [vmem:[#allocation2 + $0x540] sm:$0xff]  ;;  %v545_v17 = vld [vmem:[#allocation2 + $0x550] sm:$0xff] }
 0x203   :  { %818 = vmatpush1.bf16.msra.mxu1 %v439_v18  ;;  %947 = vmatpush1.bf16.msra.mxu0 %v441_v19  ;;  %v552_v18 = vld [vmem:[#allocation2 + $0x588] sm:$0xff]  ;;  %v554_v19 = vld [vmem:[#allocation2 + $0x598] sm:$0xff] }
 0x204   :  { %819 = vmatprep.subr.bf16.mxu1 %v448_v20  ;;  %948 = vmatprep.subr.bf16.mxu0 %v450_v21  ;;  %v551_v20 = vld [vmem:[#allocation2 + $0x580] sm:$0xff]  ;;  %v553_v21 = vld [vmem:[#allocation2 + $0x590] sm:$0xff] }
 0x207   :  { %820 = vmatpush1.bf16.msra.mxu1 %v447_v23  ;;  %949 = vmatpush1.bf16.msra.mxu0 %v449_v24  ;;  %v560_v23 = vld [vmem:[#allocation2 + $0x5c8] sm:$0xff]  ;;  %v562_v24 = vld [vmem:[#allocation2 + $0x5d8] sm:$0xff] }
 0x208   :  { %821 = vmatprep.subr.bf16.mxu1 %v456_v25  ;;  %950 = vmatprep.subr.bf16.mxu0 %v458_v26  ;;  %v559_v25 = vld [vmem:[#allocation2 + $0x5c0] sm:$0xff]  ;;  %v561_v26 = vld [vmem:[#allocation2 + $0x5d0] sm:$0xff] }
 0x20b   :  { %822 = vmatpush1.bf16.msra.mxu1 %v455_v27  ;;  %951 = vmatpush1.bf16.msra.mxu0 %v457_v28  ;;  %v568_v27 = vld [vmem:[#allocation2 + $0x608] sm:$0xff]  ;;  %v570_v28 = vld [vmem:[#allocation2 + $0x618] sm:$0xff] }
 0x20c   :  { %823 = vmatprep.subr.bf16.mxu1 %v464_v29  ;;  %952 = vmatprep.subr.bf16.mxu0 %v466_v30  ;;  %v567_v29 = vld [vmem:[#allocation2 + $0x600] sm:$0xff]  ;;  %v569_v30 = vld [vmem:[#allocation2 + $0x610] sm:$0xff] }
 0x20f   :  { %824 = vmatpush1.bf16.msra.mxu1 %v463_v31  ;;  %953 = vmatpush1.bf16.msra.mxu0 %v465_v32  ;;  %v576_v31 = vld [vmem:[#allocation2 + $0x648] sm:$0xff]  ;;  %v578_v32 = vld [vmem:[#allocation2 + $0x658] sm:$0xff] }
 0x210   :  { %825 = vmatprep.subr.bf16.mxu1 %v472_v33  ;;  %954 = vmatprep.subr.bf16.mxu0 %v474_v34  ;;  %v575_v33 = vld [vmem:[#allocation2 + $0x640] sm:$0xff]  ;;  %v577_v34 = vld [vmem:[#allocation2 + $0x650] sm:$0xff] }
 0x213   :  { %826 = vmatpush1.bf16.msra.mxu1 %v471_v37  ;;  %955 = vmatpush1.bf16.msra.mxu0 %v473_v41  ;;  %v584_v37 = vld [vmem:[#allocation2 + $0x688] sm:$0xff]  ;;  %v586_v41 = vld [vmem:[#allocation2 + $0x698] sm:$0xff] }
 0x214   :  { %827 = vmatprep.subr.bf16.mxu1 %v480_v48  ;;  %956 = vmatprep.subr.bf16.mxu0 %v482_v49  ;;  %v583_v48 = vld [vmem:[#allocation2 + $0x680] sm:$0xff]  ;;  %v585_v49 = vld [vmem:[#allocation2 + $0x690] sm:$0xff] }
 0x217   :  { %828 = vmatpush1.bf16.msra.mxu1 %v479_v50  ;;  %957 = vmatpush1.bf16.msra.mxu0 %v481_v51  ;;  %v592_v50 = vld [vmem:[#allocation2 + $0x6c8] sm:$0xff]  ;;  %v594_v51 = vld [vmem:[#allocation2 + $0x6d8] sm:$0xff] }
 0x218   :  { %829 = vmatprep.subr.bf16.mxu1 %v488_v52  ;;  %958 = vmatprep.subr.bf16.mxu0 %v490_v53  ;;  %v591_v52 = vld [vmem:[#allocation2 + $0x6c0] sm:$0xff]  ;;  %v593_v53 = vld [vmem:[#allocation2 + $0x6d0] sm:$0xff] }
 0x21b   :  { %830 = vmatpush1.bf16.msra.mxu1 %v487_v54  ;;  %959 = vmatpush1.bf16.msra.mxu0 %v489_v55  ;;  %v600_v54 = vld [vmem:[#allocation2 + $0x708] sm:$0xff]  ;;  %v602_v55 = vld [vmem:[#allocation2 + $0x718] sm:$0xff] }
 0x21c   :  { %831 = vmatprep.subr.bf16.mxu1 %v496_v56  ;;  %960 = vmatprep.subr.bf16.mxu0 %v498_v57  ;;  %v599_v56 = vld [vmem:[#allocation2 + $0x700] sm:$0xff]  ;;  %v601_v57 = vld [vmem:[#allocation2 + $0x710] sm:$0xff] }
 0x21f   :  { %832 = vmatpush1.bf16.msra.mxu1 %v495_v58  ;;  %961 = vmatpush1.bf16.msra.mxu0 %v497_v59  ;;  %v608_v58 = vld [vmem:[#allocation2 + $0x748] sm:$0xff]  ;;  %v610_v59 = vld [vmem:[#allocation2 + $0x758] sm:$0xff] }
 0x220   :  { %844 = vmatprep.subr.bf16.mxu1 %v504_v60  ;;  %973 = vmatprep.subr.bf16.mxu0 %v506_v61  ;;  %v607_v60 = vld [vmem:[#allocation2 + $0x740] sm:$0xff]  ;;  %v609_v61 = vld [vmem:[#allocation2 + $0x750] sm:$0xff] }
 0x222   :  { %834 = vmatmul.mubr.bf16.vlgmr.msra.gmra.mrb[4].mxu1 %v2920_v62  ;;  %963 = vmatmul.mubr.bf16.vlgmr.msra.gmra.mrb[8].mxu0 %v2920_v62 }
 0x223   :  { %845 = vmatpush1.bf16.msra.mxu1 %v503_v63  ;;  %974 = vmatpush1.bf16.msra.mxu0 %v505_v0  ;;  %v616_v63 = vld [vmem:[#allocation2 + $0x788] sm:$0xff]  ;;  %v618_v0 = vld [vmem:[#allocation2 + $0x798] sm:$0xff] }
 0x224   :  { %846 = vmatprep.subr.bf16.mxu1 %v512_v1  ;;  %975 = vmatprep.subr.bf16.mxu0 %v514_v2  ;;  %v615_v1 = vld [vmem:[#allocation2 + $0x780] sm:$0xff]  ;;  %v617_v2 = vld [vmem:[#allocation2 + $0x790] sm:$0xff] }
 0x225   :  { %876 = vmatprep.mubr.bf16.mxu1 %v2924_v3  ;;  %1005 = vmatprep.mubr.bf16.mxu0 %v2924_v3 }
 0x227   :  { %847 = vmatpush1.bf16.msra.mxu1 %v511_v35  ;;  %976 = vmatpush1.bf16.msra.mxu0 %v513_v39  ;;  %v624_v35 = vld [vmem:[#allocation2 + $0x7c8] sm:$0xff]  ;;  %v626_v39 = vld [vmem:[#allocation2 + $0x7d8] sm:$0xff] }
 0x228   :  { %848 = vmatprep.subr.bf16.mxu1 %v520_v4  ;;  %977 = vmatprep.subr.bf16.mxu0 %v522_v5  ;;  %v623_v4 = vld [vmem:[#allocation2 + $0x7c0] sm:$0xff]  ;;  %v625_v5 = vld [vmem:[#allocation2 + $0x7d0] sm:$0xff] }
 0x22b   :  { %849 = vmatpush1.bf16.msra.mxu1 %v519_v38  ;;  %978 = vmatpush1.bf16.msra.mxu0 %v521_v42  ;;  %v632_v38 = vld [vmem:[#allocation2 + $0x808] sm:$0xff]  ;;  %v634_v42 = vld [vmem:[#allocation2 + $0x818] sm:$0xff] }
 0x22c   :  { %850 = vmatprep.subr.bf16.mxu1 %v528_v6  ;;  %979 = vmatprep.subr.bf16.mxu0 %v530_v7  ;;  %v2932_v6 = vpack.c.bf16 %v2902_v40, %v2896_v36  ;;  %v631_v7 = vld [vmem:[#allocation2 + $0x800] sm:$0xff]  ;;  %v641_v40 = vld [vmem:[#allocation2 + $0x850] sm:$0xff] }
 0x22d   :  { %v639_v36 = vld [vmem:[#allocation2 + $0x840] sm:$0xff] }
 0x22f   :  { %851 = vmatpush1.bf16.msra.mxu1 %v527_v8  ;;  %980 = vmatpush1.bf16.msra.mxu0 %v529_v9  ;;  %v633_v8 = vld [vmem:[#allocation2 + $0x810] sm:$0xff]  ;;  %v640_v9 = vld [vmem:[#allocation2 + $0x848] sm:$0xff] }
 0x230   :  { %852 = vmatprep.subr.bf16.mxu1 %v536_v10  ;;  %981 = vmatprep.subr.bf16.mxu0 %v538_v11  ;;  %v642_v10 = vld [vmem:[#allocation2 + $0x858] sm:$0xff]  ;;  %v2936_v11 = vpack.c.bf16 %v2912_v46, %v2908_v44  ;;  %v647_v44 = vld [vmem:[#allocation2 + $0x880] sm:$0xff]  ;;  %v649_v46 = vld [vmem:[#allocation2 + $0x890] sm:$0xff] }
 0x233   :  { %853 = vmatpush1.bf16.msra.mxu1 %v535_v12  ;;  %982 = vmatpush1.bf16.msra.mxu0 %v537_v13  ;;  %v648_v12 = vld [vmem:[#allocation2 + $0x888] sm:$0xff]  ;;  %v650_v13 = vld [vmem:[#allocation2 + $0x898] sm:$0xff] }
 0x234   :  { %854 = vmatprep.subr.bf16.mxu1 %v544_v14  ;;  %983 = vmatprep.subr.bf16.mxu0 %v546_v15  ;;  %v656_v14 = vld [vmem:[#allocation2 + $0x8c8] sm:$0xff]  ;;  %v658_v15 = vld [vmem:[#allocation2 + $0x8d8] sm:$0xff] }
 0x237   :  { %855 = vmatpush1.bf16.msra.mxu1 %v543_v16  ;;  %984 = vmatpush1.bf16.msra.mxu0 %v545_v17  ;;  %v655_v16 = vld [vmem:[#allocation2 + $0x8c0] sm:$0xff]  ;;  %v657_v17 = vld [vmem:[#allocation2 + $0x8d0] sm:$0xff] }
 0x238   :  { %856 = vmatprep.subr.bf16.mxu1 %v552_v18  ;;  %985 = vmatprep.subr.bf16.mxu0 %v554_v19  ;;  %v664_v18 = vld [vmem:[#allocation2 + $0x908] sm:$0xff]  ;;  %v666_v19 = vld [vmem:[#allocation2 + $0x918] sm:$0xff] }
 0x23b   :  { %857 = vmatpush1.bf16.msra.mxu1 %v551_v20  ;;  %986 = vmatpush1.bf16.msra.mxu0 %v553_v21  ;;  %v663_v20 = vld [vmem:[#allocation2 + $0x900] sm:$0xff]  ;;  %v665_v21 = vld [vmem:[#allocation2 + $0x910] sm:$0xff] }
 0x23c   :  { %858 = vmatprep.subr.bf16.mxu1 %v560_v23  ;;  %987 = vmatprep.subr.bf16.mxu0 %v562_v24  ;;  %v672_v23 = vld [vmem:[#allocation2 + $0x948] sm:$0xff]  ;;  %v674_v24 = vld [vmem:[#allocation2 + $0x958] sm:$0xff] }
 0x23f   :  { %859 = vmatpush1.bf16.msra.mxu1 %v559_v25  ;;  %988 = vmatpush1.bf16.msra.mxu0 %v561_v26  ;;  %v671_v25 = vld [vmem:[#allocation2 + $0x940] sm:$0xff]  ;;  %v673_v26 = vld [vmem:[#allocation2 + $0x950] sm:$0xff] }
 0x240   :  { %860 = vmatprep.subr.bf16.mxu1 %v568_v27  ;;  %989 = vmatprep.subr.bf16.mxu0 %v570_v28  ;;  %v680_v27 = vld [vmem:[#allocation2 + $0x988] sm:$0xff]  ;;  %v682_v28 = vld [vmem:[#allocation2 + $0x998] sm:$0xff] }
 0x243   :  { %861 = vmatpush1.bf16.msra.mxu1 %v567_v29  ;;  %990 = vmatpush1.bf16.msra.mxu0 %v569_v30  ;;  %v679_v29 = vld [vmem:[#allocation2 + $0x980] sm:$0xff]  ;;  %v681_v30 = vld [vmem:[#allocation2 + $0x990] sm:$0xff] }
 0x244   :  { %862 = vmatprep.subr.bf16.mxu1 %v576_v31  ;;  %991 = vmatprep.subr.bf16.mxu0 %v578_v32  ;;  %v688_v31 = vld [vmem:[#allocation2 + $0x9c8] sm:$0xff]  ;;  %v690_v32 = vld [vmem:[#allocation2 + $0x9d8] sm:$0xff] }
 0x247   :  { %863 = vmatpush1.bf16.msra.mxu1 %v575_v33  ;;  %992 = vmatpush1.bf16.msra.mxu0 %v577_v34  ;;  %v687_v33 = vld [vmem:[#allocation2 + $0x9c0] sm:$0xff]  ;;  %v689_v34 = vld [vmem:[#allocation2 + $0x9d0] sm:$0xff] }
 0x248   :  { %864 = vmatprep.subr.bf16.mxu1 %v584_v37  ;;  %993 = vmatprep.subr.bf16.mxu0 %v586_v41  ;;  %v696_v37 = vld [vmem:[#allocation2 + $0xa08] sm:$0xff]  ;;  %v698_v41 = vld [vmem:[#allocation2 + $0xa18] sm:$0xff] }
 0x24b   :  { %865 = vmatpush1.bf16.msra.mxu1 %v583_v48  ;;  %994 = vmatpush1.bf16.msra.mxu0 %v585_v49  ;;  %v695_v48 = vld [vmem:[#allocation2 + $0xa00] sm:$0xff]  ;;  %v697_v49 = vld [vmem:[#allocation2 + $0xa10] sm:$0xff] }
 0x24c   :  { %866 = vmatprep.subr.bf16.mxu1 %v592_v50  ;;  %995 = vmatprep.subr.bf16.mxu0 %v594_v51  ;;  %v704_v50 = vld [vmem:[#allocation2 + $0xa48] sm:$0xff]  ;;  %v706_v51 = vld [vmem:[#allocation2 + $0xa58] sm:$0xff] }
 0x24f   :  { %867 = vmatpush1.bf16.msra.mxu1 %v591_v52  ;;  %996 = vmatpush1.bf16.msra.mxu0 %v593_v53  ;;  %v703_v52 = vld [vmem:[#allocation2 + $0xa40] sm:$0xff]  ;;  %v705_v53 = vld [vmem:[#allocation2 + $0xa50] sm:$0xff] }
 0x250   :  { %868 = vmatprep.subr.bf16.mxu1 %v600_v54  ;;  %997 = vmatprep.subr.bf16.mxu0 %v602_v55  ;;  %v712_v54 = vld [vmem:[#allocation2 + $0xa88] sm:$0xff]  ;;  %v714_v55 = vld [vmem:[#allocation2 + $0xa98] sm:$0xff] }
 0x253   :  { %869 = vmatpush1.bf16.msra.mxu1 %v599_v56  ;;  %998 = vmatpush1.bf16.msra.mxu0 %v601_v57  ;;  %v711_v56 = vld [vmem:[#allocation2 + $0xa80] sm:$0xff]  ;;  %v713_v57 = vld [vmem:[#allocation2 + $0xa90] sm:$0xff] }
 0x254   :  { %870 = vmatprep.subr.bf16.mxu1 %v608_v58  ;;  %999 = vmatprep.subr.bf16.mxu0 %v610_v59  ;;  %v720_v58 = vld [vmem:[#allocation2 + $0xac8] sm:$0xff]  ;;  %v722_v59 = vld [vmem:[#allocation2 + $0xad8] sm:$0xff] }
 0x257   :  { %871 = vmatpush1.bf16.msra.mxu1 %v607_v60  ;;  %1000 = vmatpush1.bf16.msra.mxu0 %v609_v61  ;;  %v719_v60 = vld [vmem:[#allocation2 + $0xac0] sm:$0xff]  ;;  %v721_v61 = vld [vmem:[#allocation2 + $0xad0] sm:$0xff] }
 0x258   :  { %872 = vmatprep.subr.bf16.mxu1 %v616_v63  ;;  %1001 = vmatprep.subr.bf16.mxu0 %v618_v0  ;;  %v728_v63 = vld [vmem:[#allocation2 + $0xb08] sm:$0xff]  ;;  %v730_v0 = vld [vmem:[#allocation2 + $0xb18] sm:$0xff] }
 0x25b   :  { %873 = vmatpush1.bf16.msra.mxu1 %v615_v1  ;;  %1002 = vmatpush1.bf16.msra.mxu0 %v617_v2  ;;  %v727_v1 = vld [vmem:[#allocation2 + $0xb00] sm:$0xff]  ;;  %v729_v2 = vld [vmem:[#allocation2 + $0xb10] sm:$0xff] }
 0x25c   :  { %874 = vmatprep.subr.bf16.mxu1 %v624_v35  ;;  %1003 = vmatprep.subr.bf16.mxu0 %v626_v39  ;;  %v736_v35 = vld [vmem:[#allocation2 + $0xb48] sm:$0xff]  ;;  %v738_v39 = vld [vmem:[#allocation2 + $0xb58] sm:$0xff] }
 0x25f   :  { %875 = vmatpush1.bf16.msra.mxu1 %v623_v4  ;;  %1004 = vmatpush1.bf16.msra.mxu0 %v625_v5  ;;  %v735_v4 = vld [vmem:[#allocation2 + $0xb40] sm:$0xff]  ;;  %v737_v5 = vld [vmem:[#allocation2 + $0xb50] sm:$0xff] }
 0x260   :  { %887 = vmatprep.subr.bf16.mxu1 %v632_v38  ;;  %1016 = vmatprep.subr.bf16.mxu0 %v634_v42  ;;  %v744_v38 = vld [vmem:[#allocation2 + $0xb88] sm:$0xff]  ;;  %v746_v42 = vld [vmem:[#allocation2 + $0xb98] sm:$0xff] }
 0x262   :  { %877 = vmatmul.mubr.bf16.vlgmr.msra.gmra.mrb[4].mxu1 %v2932_v6  ;;  %1006 = vmatmul.mubr.bf16.vlgmr.msra.gmra.mrb[8].mxu0 %v2932_v6 }
 0x263   :  { %888 = vmatpush1.bf16.msra.mxu1 %v631_v7  ;;  %1017 = vmatpush1.bf16.msra.mxu0 %v633_v8  ;;  %v743_v7 = vld [vmem:[#allocation2 + $0xb80] sm:$0xff]  ;;  %v745_v8 = vld [vmem:[#allocation2 + $0xb90] sm:$0xff] }
 0x264   :  { %889 = vmatprep.subr.bf16.mxu1 %v640_v9  ;;  %1018 = vmatprep.subr.bf16.mxu0 %v642_v10  ;;  %v752_v9 = vld [vmem:[#allocation2 + $0xbc8] sm:$0xff]  ;;  %v754_v10 = vld [vmem:[#allocation2 + $0xbd8] sm:$0xff] }
 0x265   :  { %919 = vmatprep.mubr.bf16.mxu1 %v2936_v11  ;;  %1048 = vmatprep.mubr.bf16.mxu0 %v2936_v11 }
 0x267   :  { %890 = vmatpush1.bf16.msra.mxu1 %v639_v36  ;;  %1019 = vmatpush1.bf16.msra.mxu0 %v641_v40  ;;  %v751_v36 = vld [vmem:[#allocation2 + $0xbc0] sm:$0xff]  ;;  %v753_v40 = vld [vmem:[#allocation2 + $0xbd0] sm:$0xff] }
 0x268   :  { %891 = vmatprep.subr.bf16.mxu1 %v648_v12  ;;  %1020 = vmatprep.subr.bf16.mxu0 %v650_v13  ;;  %v380_v12 = vld [vmem:[#allocation2 + $0x28] sm:$0xff]  ;;  %v382_v13 = vld [vmem:[#allocation2 + $0x38] sm:$0xff] }
 0x26b   :  { %892 = vmatpush1.bf16.msra.mxu1 %v647_v44  ;;  %1021 = vmatpush1.bf16.msra.mxu0 %v649_v46  ;;  %v2944_v44 = vpack.c.bf16 %v2910_v45, %v2906_v43  ;;  %v379_v46 = vld [vmem:[#allocation2 + $0x20] sm:$0xff]  ;;  %v396_v43 = vld [vmem:[#allocation2 + $0xa8] sm:$0xff]  ;;  %v398_v45 = vld [vmem:[#allocation2 + $0xb8] sm:$0xff] }
 0x26c   :  { %893 = vmatprep.subr.bf16.mxu1 %v656_v14  ;;  %1022 = vmatprep.subr.bf16.mxu0 %v658_v15  ;;  %v381_v14 = vld [vmem:[#allocation2 + $0x30] sm:$0xff]  ;;  %v388_v15 = vld [vmem:[#allocation2 + $0x68] sm:$0xff] }
 0x26f   :  { %894 = vmatpush1.bf16.msra.mxu1 %v655_v16  ;;  %1023 = vmatpush1.bf16.msra.mxu0 %v657_v17  ;;  %v390_v16 = vld [vmem:[#allocation2 + $0x78] sm:$0xff]  ;;  %v387_v17 = vld [vmem:[#allocation2 + $0x60] sm:$0xff] }
 0x270   :  { %895 = vmatprep.subr.bf16.mxu1 %v664_v18  ;;  %1024 = vmatprep.subr.bf16.mxu0 %v666_v19  ;;  %v389_v18 = vld [vmem:[#allocation2 + $0x70] sm:$0xff]  ;;  %v395_v19 = vld [vmem:[#allocation2 + $0xa0] sm:$0xff] }
 0x273   :  { %896 = vmatpush1.bf16.msra.mxu1 %v663_v20  ;;  %1025 = vmatpush1.bf16.msra.mxu0 %v665_v21  ;;  %v397_v20 = vld [vmem:[#allocation2 + $0xb0] sm:$0xff]  ;;  %v404_v21 = vld [vmem:[#allocation2 + $0xe8] sm:$0xff] }
 0x274   :  { %897 = vmatprep.subr.bf16.mxu1 %v672_v23  ;;  %1026 = vmatprep.subr.bf16.mxu0 %v674_v24  ;;  %v406_v23 = vld [vmem:[#allocation2 + $0xf8] sm:$0xff]  ;;  %v403_v24 = vld [vmem:[#allocation2 + $0xe0] sm:$0xff] }
 0x277   :  { %898 = vmatpush1.bf16.msra.mxu1 %v671_v25  ;;  %1027 = vmatpush1.bf16.msra.mxu0 %v673_v26  ;;  %v405_v25 = vld [vmem:[#allocation2 + $0xf0] sm:$0xff]  ;;  %v412_v26 = vld [vmem:[#allocation2 + $0x128] sm:$0xff] }
 0x278   :  { %899 = vmatprep.subr.bf16.mxu1 %v680_v27  ;;  %1028 = vmatprep.subr.bf16.mxu0 %v682_v28  ;;  %v414_v27 = vld [vmem:[#allocation2 + $0x138] sm:$0xff]  ;;  %v413_v28 = vld [vmem:[#allocation2 + $0x130] sm:$0xff] }
 0x27b   :  { %900 = vmatpush1.bf16.msra.mxu1 %v679_v29  ;;  %1029 = vmatpush1.bf16.msra.mxu0 %v681_v30  ;;  %v420_v29 = vld [vmem:[#allocation2 + $0x168] sm:$0xff]  ;;  %v422_v30 = vld [vmem:[#allocation2 + $0x178] sm:$0xff] }
 0x27c   :  { %901 = vmatprep.subr.bf16.mxu1 %v688_v31  ;;  %1030 = vmatprep.subr.bf16.mxu0 %v690_v32  ;;  %v419_v31 = vld [vmem:[#allocation2 + $0x160] sm:$0xff]  ;;  %v421_v32 = vld [vmem:[#allocation2 + $0x170] sm:$0xff] }
 0x27f   :  { %902 = vmatpush1.bf16.msra.mxu1 %v687_v33  ;;  %1031 = vmatpush1.bf16.msra.mxu0 %v689_v34  ;;  %v428_v33 = vld [vmem:[#allocation2 + $0x1a8] sm:$0xff]  ;;  %v430_v34 = vld [vmem:[#allocation2 + $0x1b8] sm:$0xff] }
 0x280   :  { %903 = vmatprep.subr.bf16.mxu1 %v696_v37  ;;  %1032 = vmatprep.subr.bf16.mxu0 %v698_v41  ;;  %v427_v37 = vld [vmem:[#allocation2 + $0x1a0] sm:$0xff]  ;;  %v429_v41 = vld [vmem:[#allocation2 + $0x1b0] sm:$0xff] }
 0x283   :  { %904 = vmatpush1.bf16.msra.mxu1 %v695_v48  ;;  %1033 = vmatpush1.bf16.msra.mxu0 %v697_v49  ;;  %v436_v48 = vld [vmem:[#allocation2 + $0x1e8] sm:$0xff]  ;;  %v438_v49 = vld [vmem:[#allocation2 + $0x1f8] sm:$0xff] }
 0x284   :  { %905 = vmatprep.subr.bf16.mxu1 %v704_v50  ;;  %1034 = vmatprep.subr.bf16.mxu0 %v706_v51  ;;  %v435_v50 = vld [vmem:[#allocation2 + $0x1e0] sm:$0xff]  ;;  %v437_v51 = vld [vmem:[#allocation2 + $0x1f0] sm:$0xff] }
 0x287   :  { %906 = vmatpush1.bf16.msra.mxu1 %v703_v52  ;;  %1035 = vmatpush1.bf16.msra.mxu0 %v705_v53  ;;  %v444_v52 = vld [vmem:[#allocation2 + $0x228] sm:$0xff]  ;;  %v446_v53 = vld [vmem:[#allocation2 + $0x238] sm:$0xff] }
 0x288   :  { %907 = vmatprep.subr.bf16.mxu1 %v712_v54  ;;  %1036 = vmatprep.subr.bf16.mxu0 %v714_v55  ;;  %v443_v54 = vld [vmem:[#allocation2 + $0x220] sm:$0xff]  ;;  %v445_v55 = vld [vmem:[#allocation2 + $0x230] sm:$0xff] }
 0x28b   :  { %908 = vmatpush1.bf16.msra.mxu1 %v711_v56  ;;  %1037 = vmatpush1.bf16.msra.mxu0 %v713_v57  ;;  %v452_v56 = vld [vmem:[#allocation2 + $0x268] sm:$0xff]  ;;  %v454_v57 = vld [vmem:[#allocation2 + $0x278] sm:$0xff] }
 0x28c   :  { %909 = vmatprep.subr.bf16.mxu1 %v720_v58  ;;  %1038 = vmatprep.subr.bf16.mxu0 %v722_v59  ;;  %v451_v58 = vld [vmem:[#allocation2 + $0x260] sm:$0xff]  ;;  %v453_v59 = vld [vmem:[#allocation2 + $0x270] sm:$0xff] }
 0x28f   :  { %910 = vmatpush1.bf16.msra.mxu1 %v719_v60  ;;  %1039 = vmatpush1.bf16.msra.mxu0 %v721_v61  ;;  %v460_v60 = vld [vmem:[#allocation2 + $0x2a8] sm:$0xff]  ;;  %v462_v61 = vld [vmem:[#allocation2 + $0x2b8] sm:$0xff] }
 0x290   :  { %911 = vmatprep.subr.bf16.mxu1 %v728_v63  ;;  %1040 = vmatprep.subr.bf16.mxu0 %v730_v0  ;;  %v459_v63 = vld [vmem:[#allocation2 + $0x2a0] sm:$0xff]  ;;  %v461_v0 = vld [vmem:[#allocation2 + $0x2b0] sm:$0xff] }
 0x293   :  { %912 = vmatpush1.bf16.msra.mxu1 %v727_v1  ;;  %1041 = vmatpush1.bf16.msra.mxu0 %v729_v2  ;;  %v468_v1 = vld [vmem:[#allocation2 + $0x2e8] sm:$0xff]  ;;  %v470_v2 = vld [vmem:[#allocation2 + $0x2f8] sm:$0xff] }
 0x294   :  { %913 = vmatprep.subr.bf16.mxu1 %v736_v35  ;;  %1042 = vmatprep.subr.bf16.mxu0 %v738_v39  ;;  %v467_v35 = vld [vmem:[#allocation2 + $0x2e0] sm:$0xff]  ;;  %v469_v39 = vld [vmem:[#allocation2 + $0x2f0] sm:$0xff] }
 0x297   :  { %914 = vmatpush1.bf16.msra.mxu1 %v735_v4  ;;  %1043 = vmatpush1.bf16.msra.mxu0 %v737_v5  ;;  %v476_v4 = vld [vmem:[#allocation2 + $0x328] sm:$0xff]  ;;  %v478_v5 = vld [vmem:[#allocation2 + $0x338] sm:$0xff] }
 0x298   :  { %915 = vmatprep.subr.bf16.mxu1 %v744_v38  ;;  %1044 = vmatprep.subr.bf16.mxu0 %v746_v42  ;;  %v475_v38 = vld [vmem:[#allocation2 + $0x320] sm:$0xff]  ;;  %v477_v42 = vld [vmem:[#allocation2 + $0x330] sm:$0xff] }
 0x29b   :  { %916 = vmatpush1.bf16.msra.mxu1 %v743_v7  ;;  %1045 = vmatpush1.bf16.msra.mxu0 %v745_v8  ;;  %v484_v7 = vld [vmem:[#allocation2 + $0x368] sm:$0xff]  ;;  %v486_v8 = vld [vmem:[#allocation2 + $0x378] sm:$0xff] }
 0x29c   :  { %917 = vmatprep.subr.bf16.mxu1 %v752_v9  ;;  %1046 = vmatprep.subr.bf16.mxu0 %v754_v10  ;;  %v483_v9 = vld [vmem:[#allocation2 + $0x360] sm:$0xff]  ;;  %v485_v10 = vld [vmem:[#allocation2 + $0x370] sm:$0xff] }
 0x29f   :  { %918 = vmatpush1.bf16.msra.mxu1 %v751_v36  ;;  %1047 = vmatpush1.bf16.msra.mxu0 %v753_v40  ;;  %v492_v36 = vld [vmem:[#allocation2 + $0x3a8] sm:$0xff]  ;;  %v494_v40 = vld [vmem:[#allocation2 + $0x3b8] sm:$0xff] }
 0x2a0   :  { %1059 = vmatprep.subr.bf16.mxu1 %v380_v12  ;;  %1188 = vmatprep.subr.bf16.mxu0 %v382_v13  ;;  %v491_v12 = vld [vmem:[#allocation2 + $0x3a0] sm:$0xff]  ;;  %v493_v13 = vld [vmem:[#allocation2 + $0x3b0] sm:$0xff] }
 0x2a2   :  { %920 = vmatmul.mubr.bf16.vlgmr.msra.gmra.mrb[4].mxu1 %v2944_v44  ;;  %1049 = vmatmul.mubr.bf16.vlgmr.msra.gmra.mrb[8].mxu0 %v2944_v44 }
 0x2a3   :  { %1060 = vmatpush1.bf16.msra.mxu1 %v379_v46  ;;  %1189 = vmatpush1.bf16.msra.mxu0 %v381_v14  ;;  %v500_v46 = vld [vmem:[#allocation2 + $0x3e8] sm:$0xff]  ;;  %v502_v14 = vld [vmem:[#allocation2 + $0x3f8] sm:$0xff] }
 0x2a4   :  { %1061 = vmatprep.subr.bf16.mxu1 %v388_v15  ;;  %1190 = vmatprep.subr.bf16.mxu0 %v390_v16  ;;  %v499_v15 = vld [vmem:[#allocation2 + $0x3e0] sm:$0xff]  ;;  %v501_v16 = vld [vmem:[#allocation2 + $0x3f0] sm:$0xff] }
 0x2a5   :  { %1091 = vmatprep.mubr.bf16.mxu1 %v2914_v47  ;;  %1220 = vmatprep.mubr.bf16.mxu0 %v2914_v47  ;;  %v411_v47 = vld [vmem:[#allocation2 + $0x120] sm:$0xff] }
 0x2a7   :  { %1062 = vmatpush1.bf16.msra.mxu1 %v387_v17  ;;  %1191 = vmatpush1.bf16.msra.mxu0 %v389_v18  ;;  %v508_v17 = vld [vmem:[#allocation2 + $0x428] sm:$0xff]  ;;  %v510_v18 = vld [vmem:[#allocation2 + $0x438] sm:$0xff] }
 0x2a8   :  { %1063 = vmatprep.subr.bf16.mxu1 %v396_v43  ;;  %1192 = vmatprep.subr.bf16.mxu0 %v398_v45  ;;  %v507_v43 = vld [vmem:[#allocation2 + $0x420] sm:$0xff]  ;;  %v509_v45 = vld [vmem:[#allocation2 + $0x430] sm:$0xff] }
 0x2ab   :  { %1064 = vmatpush1.bf16.msra.mxu1 %v395_v19  ;;  %1193 = vmatpush1.bf16.msra.mxu0 %v397_v20  ;;  %v516_v19 = vld [vmem:[#allocation2 + $0x468] sm:$0xff]  ;;  %v518_v20 = vld [vmem:[#allocation2 + $0x478] sm:$0xff] }
 0x2ac   :  { %1065 = vmatprep.subr.bf16.mxu1 %v404_v21  ;;  %1194 = vmatprep.subr.bf16.mxu0 %v406_v23  ;;  %v515_v21 = vld [vmem:[#allocation2 + $0x460] sm:$0xff]  ;;  %v517_v23 = vld [vmem:[#allocation2 + $0x470] sm:$0xff] }
 0x2af   :  { %1066 = vmatpush1.bf16.msra.mxu1 %v403_v24  ;;  %1195 = vmatpush1.bf16.msra.mxu0 %v405_v25  ;;  %v524_v24 = vld [vmem:[#allocation2 + $0x4a8] sm:$0xff]  ;;  %v526_v25 = vld [vmem:[#allocation2 + $0x4b8] sm:$0xff] }
 0x2b0   :  { %1067 = vmatprep.subr.bf16.mxu1 %v412_v26  ;;  %1196 = vmatprep.subr.bf16.mxu0 %v414_v27  ;;  %v523_v26 = vld [vmem:[#allocation2 + $0x4a0] sm:$0xff]  ;;  %v525_v27 = vld [vmem:[#allocation2 + $0x4b0] sm:$0xff] }
 0x2b3   :  { %1068 = vmatpush1.bf16.msra.mxu1 %v411_v47  ;;  %1197 = vmatpush1.bf16.msra.mxu0 %v413_v28  ;;  %v532_v47 = vld [vmem:[#allocation2 + $0x4e8] sm:$0xff]  ;;  %v531_v28 = vld [vmem:[#allocation2 + $0x4e0] sm:$0xff] }
 0x2b4   :  { %1069 = vmatprep.subr.bf16.mxu1 %v420_v29  ;;  %1198 = vmatprep.subr.bf16.mxu0 %v422_v30  ;;  %v533_v29 = vld [vmem:[#allocation2 + $0x4f0] sm:$0xff]  ;;  %v540_v30 = vld [vmem:[#allocation2 + $0x528] sm:$0xff] }
 0x2b7   :  { %1070 = vmatpush1.bf16.msra.mxu1 %v419_v31  ;;  %1199 = vmatpush1.bf16.msra.mxu0 %v421_v32  ;;  %v542_v31 = vld [vmem:[#allocation2 + $0x538] sm:$0xff]  ;;  %v541_v32 = vld [vmem:[#allocation2 + $0x530] sm:$0xff] }
 0x2b8   :  { %1071 = vmatprep.subr.bf16.mxu1 %v428_v33  ;;  %1200 = vmatprep.subr.bf16.mxu0 %v430_v34  ;;  %v548_v33 = vld [vmem:[#allocation2 + $0x568] sm:$0xff]  ;;  %v550_v34 = vld [vmem:[#allocation2 + $0x578] sm:$0xff] }
 0x2bb   :  { %1072 = vmatpush1.bf16.msra.mxu1 %v427_v37  ;;  %1201 = vmatpush1.bf16.msra.mxu0 %v429_v41  ;;  %v547_v37 = vld [vmem:[#allocation2 + $0x560] sm:$0xff]  ;;  %v549_v41 = vld [vmem:[#allocation2 + $0x570] sm:$0xff] }
 0x2bc   :  { %1073 = vmatprep.subr.bf16.mxu1 %v436_v48  ;;  %1202 = vmatprep.subr.bf16.mxu0 %v438_v49  ;;  %v556_v48 = vld [vmem:[#allocation2 + $0x5a8] sm:$0xff]  ;;  %v558_v49 = vld [vmem:[#allocation2 + $0x5b8] sm:$0xff] }
 0x2bf   :  { %1074 = vmatpush1.bf16.msra.mxu1 %v435_v50  ;;  %1203 = vmatpush1.bf16.msra.mxu0 %v437_v51  ;;  %v555_v50 = vld [vmem:[#allocation2 + $0x5a0] sm:$0xff]  ;;  %v557_v51 = vld [vmem:[#allocation2 + $0x5b0] sm:$0xff] }
 0x2c0   :  { %1075 = vmatprep.subr.bf16.mxu1 %v444_v52  ;;  %1204 = vmatprep.subr.bf16.mxu0 %v446_v53  ;;  %v564_v52 = vld [vmem:[#allocation2 + $0x5e8] sm:$0xff]  ;;  %v566_v53 = vld [vmem:[#allocation2 + $0x5f8] sm:$0xff] }
 0x2c3   :  { %1076 = vmatpush1.bf16.msra.mxu1 %v443_v54  ;;  %1205 = vmatpush1.bf16.msra.mxu0 %v445_v55  ;;  %v563_v54 = vld [vmem:[#allocation2 + $0x5e0] sm:$0xff]  ;;  %v565_v55 = vld [vmem:[#allocation2 + $0x5f0] sm:$0xff] }
 0x2c4   :  { %1077 = vmatprep.subr.bf16.mxu1 %v452_v56  ;;  %1206 = vmatprep.subr.bf16.mxu0 %v454_v57  ;;  %v572_v56 = vld [vmem:[#allocation2 + $0x628] sm:$0xff]  ;;  %v574_v57 = vld [vmem:[#allocation2 + $0x638] sm:$0xff] }
 0x2c7   :  { %1078 = vmatpush1.bf16.msra.mxu1 %v451_v58  ;;  %1207 = vmatpush1.bf16.msra.mxu0 %v453_v59  ;;  %v571_v58 = vld [vmem:[#allocation2 + $0x620] sm:$0xff]  ;;  %v573_v59 = vld [vmem:[#allocation2 + $0x630] sm:$0xff] }
 0x2c8   :  { %1079 = vmatprep.subr.bf16.mxu1 %v460_v60  ;;  %1208 = vmatprep.subr.bf16.mxu0 %v462_v61  ;;  %v580_v60 = vld [vmem:[#allocation2 + $0x668] sm:$0xff]  ;;  %v582_v61 = vld [vmem:[#allocation2 + $0x678] sm:$0xff] }
 0x2cb   :  { %1080 = vmatpush1.bf16.msra.mxu1 %v459_v63  ;;  %1209 = vmatpush1.bf16.msra.mxu0 %v461_v0  ;;  %v579_v63 = vld [vmem:[#allocation2 + $0x660] sm:$0xff]  ;;  %v581_v0 = vld [vmem:[#allocation2 + $0x670] sm:$0xff] }
 0x2cc   :  { %1081 = vmatprep.subr.bf16.mxu1 %v468_v1  ;;  %1210 = vmatprep.subr.bf16.mxu0 %v470_v2  ;;  %v588_v1 = vld [vmem:[#allocation2 + $0x6a8] sm:$0xff]  ;;  %v590_v2 = vld [vmem:[#allocation2 + $0x6b8] sm:$0xff] }
 0x2cf   :  { %1082 = vmatpush1.bf16.msra.mxu1 %v467_v35  ;;  %1211 = vmatpush1.bf16.msra.mxu0 %v469_v39  ;;  %v587_v35 = vld [vmem:[#allocation2 + $0x6a0] sm:$0xff]  ;;  %v589_v39 = vld [vmem:[#allocation2 + $0x6b0] sm:$0xff] }
 0x2d0   :  { %1083 = vmatprep.subr.bf16.mxu1 %v476_v4  ;;  %1212 = vmatprep.subr.bf16.mxu0 %v478_v5  ;;  %v596_v4 = vld [vmem:[#allocation2 + $0x6e8] sm:$0xff]  ;;  %v598_v5 = vld [vmem:[#allocation2 + $0x6f8] sm:$0xff] }
 0x2d3   :  { %1084 = vmatpush1.bf16.msra.mxu1 %v475_v38  ;;  %1213 = vmatpush1.bf16.msra.mxu0 %v477_v42  ;;  %v595_v38 = vld [vmem:[#allocation2 + $0x6e0] sm:$0xff]  ;;  %v597_v42 = vld [vmem:[#allocation2 + $0x6f0] sm:$0xff] }
 0x2d4   :  { %1085 = vmatprep.subr.bf16.mxu1 %v484_v7  ;;  %1214 = vmatprep.subr.bf16.mxu0 %v486_v8  ;;  %v604_v7 = vld [vmem:[#allocation2 + $0x728] sm:$0xff]  ;;  %v606_v8 = vld [vmem:[#allocation2 + $0x738] sm:$0xff] }
 0x2d7   :  { %1086 = vmatpush1.bf16.msra.mxu1 %v483_v9  ;;  %1215 = vmatpush1.bf16.msra.mxu0 %v485_v10  ;;  %v603_v9 = vld [vmem:[#allocation2 + $0x720] sm:$0xff]  ;;  %v605_v10 = vld [vmem:[#allocation2 + $0x730] sm:$0xff] }
 0x2d8   :  { %1087 = vmatprep.subr.bf16.mxu1 %v492_v36  ;;  %1216 = vmatprep.subr.bf16.mxu0 %v494_v40  ;;  %v612_v36 = vld [vmem:[#allocation2 + $0x768] sm:$0xff]  ;;  %v614_v40 = vld [vmem:[#allocation2 + $0x778] sm:$0xff] }
 0x2db   :  { %1088 = vmatpush1.bf16.msra.mxu1 %v491_v12  ;;  %1217 = vmatpush1.bf16.msra.mxu0 %v493_v13  ;;  %v611_v12 = vld [vmem:[#allocation2 + $0x760] sm:$0xff]  ;;  %v613_v13 = vld [vmem:[#allocation2 + $0x770] sm:$0xff] }
 0x2dc   :  { %1089 = vmatprep.subr.bf16.mxu1 %v500_v46  ;;  %1218 = vmatprep.subr.bf16.mxu0 %v502_v14  ;;  %v620_v46 = vld [vmem:[#allocation2 + $0x7a8] sm:$0xff]  ;;  %v622_v14 = vld [vmem:[#allocation2 + $0x7b8] sm:$0xff] }
 0x2df   :  { %1090 = vmatpush1.bf16.msra.mxu1 %v499_v15  ;;  %1219 = vmatpush1.bf16.msra.mxu0 %v501_v16  ;;  %v619_v15 = vld [vmem:[#allocation2 + $0x7a0] sm:$0xff]  ;;  %v621_v16 = vld [vmem:[#allocation2 + $0x7b0] sm:$0xff] }
 0x2e0   :  { %1102 = vmatprep.subr.bf16.mxu1 %v508_v17  ;;  %1231 = vmatprep.subr.bf16.mxu0 %v510_v18  ;;  %v628_v17 = vld [vmem:[#allocation2 + $0x7e8] sm:$0xff]  ;;  %v630_v18 = vld [vmem:[#allocation2 + $0x7f8] sm:$0xff] }
 0x2e2   :  { %1092 = vmatmul.mubr.bf16.vlgmr.msra.gmra.mrb[8].mxu1 %v2920_v62  ;;  %1221 = vmatmul.mubr.bf16.vlgmr.msra.gmra.mrb[12].mxu0 %v2920_v62  ;;  %v534_v62 = vld [vmem:[#allocation2 + $0x4f8] sm:$0xff] }
 0x2e3   :  { %1103 = vmatpush1.bf16.msra.mxu1 %v507_v43  ;;  %1232 = vmatpush1.bf16.msra.mxu0 %v509_v45  ;;  %v627_v43 = vld [vmem:[#allocation2 + $0x7e0] sm:$0xff]  ;;  %v629_v45 = vld [vmem:[#allocation2 + $0x7f0] sm:$0xff] }
 0x2e4   :  { %1104 = vmatprep.subr.bf16.mxu1 %v516_v19  ;;  %1233 = vmatprep.subr.bf16.mxu0 %v518_v20  ;;  %v636_v19 = vld [vmem:[#allocation2 + $0x828] sm:$0xff]  ;;  %v638_v20 = vld [vmem:[#allocation2 + $0x838] sm:$0xff] }
 0x2e5   :  { %1134 = vmatprep.mubr.bf16.mxu1 %v2924_v3  ;;  %1263 = vmatprep.mubr.bf16.mxu0 %v2924_v3  ;;  %v539_v3 = vld [vmem:[#allocation2 + $0x520] sm:$0xff] }
 0x2e7   :  { %1105 = vmatpush1.bf16.msra.mxu1 %v515_v21  ;;  %1234 = vmatpush1.bf16.msra.mxu0 %v517_v23  ;;  %v635_v21 = vld [vmem:[#allocation2 + $0x820] sm:$0xff]  ;;  %v637_v23 = vld [vmem:[#allocation2 + $0x830] sm:$0xff] }
 0x2e8   :  { %1106 = vmatprep.subr.bf16.mxu1 %v524_v24  ;;  %1235 = vmatprep.subr.bf16.mxu0 %v526_v25  ;;  %v644_v24 = vld [vmem:[#allocation2 + $0x868] sm:$0xff]  ;;  %v646_v25 = vld [vmem:[#allocation2 + $0x878] sm:$0xff] }
 0x2eb   :  { %1107 = vmatpush1.bf16.msra.mxu1 %v523_v26  ;;  %1236 = vmatpush1.bf16.msra.mxu0 %v525_v27  ;;  %v643_v26 = vld [vmem:[#allocation2 + $0x860] sm:$0xff]  ;;  %v645_v27 = vld [vmem:[#allocation2 + $0x870] sm:$0xff] }
 0x2ec   :  { %1108 = vmatprep.subr.bf16.mxu1 %v532_v47  ;;  %1237 = vmatprep.subr.bf16.mxu0 %v534_v62  ;;  %v652_v47 = vld [vmem:[#allocation2 + $0x8a8] sm:$0xff]  ;;  %v654_v62 = vld [vmem:[#allocation2 + $0x8b8] sm:$0xff] }
 0x2ef   :  { %1109 = vmatpush1.bf16.msra.mxu1 %v531_v28  ;;  %1238 = vmatpush1.bf16.msra.mxu0 %v533_v29  ;;  %v651_v28 = vld [vmem:[#allocation2 + $0x8a0] sm:$0xff]  ;;  %v653_v29 = vld [vmem:[#allocation2 + $0x8b0] sm:$0xff] }
 0x2f0   :  { %1110 = vmatprep.subr.bf16.mxu1 %v540_v30  ;;  %1239 = vmatprep.subr.bf16.mxu0 %v542_v31  ;;  %v660_v30 = vld [vmem:[#allocation2 + $0x8e8] sm:$0xff]  ;;  %v659_v31 = vld [vmem:[#allocation2 + $0x8e0] sm:$0xff] }
 0x2f3   :  { %1111 = vmatpush1.bf16.msra.mxu1 %v539_v3  ;;  %1240 = vmatpush1.bf16.msra.mxu0 %v541_v32  ;;  %v661_v3 = vld [vmem:[#allocation2 + $0x8f0] sm:$0xff]  ;;  %v668_v32 = vld [vmem:[#allocation2 + $0x928] sm:$0xff] }
 0x2f4   :  { %1112 = vmatprep.subr.bf16.mxu1 %v548_v33  ;;  %1241 = vmatprep.subr.bf16.mxu0 %v550_v34  ;;  %v670_v33 = vld [vmem:[#allocation2 + $0x938] sm:$0xff]  ;;  %v669_v34 = vld [vmem:[#allocation2 + $0x930] sm:$0xff] }
 0x2f7   :  { %1113 = vmatpush1.bf16.msra.mxu1 %v547_v37  ;;  %1242 = vmatpush1.bf16.msra.mxu0 %v549_v41  ;;  %v676_v37 = vld [vmem:[#allocation2 + $0x968] sm:$0xff]  ;;  %v678_v41 = vld [vmem:[#allocation2 + $0x978] sm:$0xff] }
 0x2f8   :  { %1114 = vmatprep.subr.bf16.mxu1 %v556_v48  ;;  %1243 = vmatprep.subr.bf16.mxu0 %v558_v49  ;;  %v675_v48 = vld [vmem:[#allocation2 + $0x960] sm:$0xff]  ;;  %v677_v49 = vld [vmem:[#allocation2 + $0x970] sm:$0xff] }
 0x2fb   :  { %1115 = vmatpush1.bf16.msra.mxu1 %v555_v50  ;;  %1244 = vmatpush1.bf16.msra.mxu0 %v557_v51  ;;  %v684_v50 = vld [vmem:[#allocation2 + $0x9a8] sm:$0xff]  ;;  %v686_v51 = vld [vmem:[#allocation2 + $0x9b8] sm:$0xff] }
 0x2fc   :  { %1116 = vmatprep.subr.bf16.mxu1 %v564_v52  ;;  %1245 = vmatprep.subr.bf16.mxu0 %v566_v53  ;;  %v683_v52 = vld [vmem:[#allocation2 + $0x9a0] sm:$0xff]  ;;  %v685_v53 = vld [vmem:[#allocation2 + $0x9b0] sm:$0xff] }
 0x2ff   :  { %1117 = vmatpush1.bf16.msra.mxu1 %v563_v54  ;;  %1246 = vmatpush1.bf16.msra.mxu0 %v565_v55  ;;  %v692_v54 = vld [vmem:[#allocation2 + $0x9e8] sm:$0xff]  ;;  %v694_v55 = vld [vmem:[#allocation2 + $0x9f8] sm:$0xff] }
 0x300   :  { %1118 = vmatprep.subr.bf16.mxu1 %v572_v56  ;;  %1247 = vmatprep.subr.bf16.mxu0 %v574_v57  ;;  %v691_v56 = vld [vmem:[#allocation2 + $0x9e0] sm:$0xff]  ;;  %v693_v57 = vld [vmem:[#allocation2 + $0x9f0] sm:$0xff] }
 0x303   :  { %1119 = vmatpush1.bf16.msra.mxu1 %v571_v58  ;;  %1248 = vmatpush1.bf16.msra.mxu0 %v573_v59  ;;  %v700_v58 = vld [vmem:[#allocation2 + $0xa28] sm:$0xff]  ;;  %v702_v59 = vld [vmem:[#allocation2 + $0xa38] sm:$0xff] }
 0x304   :  { %1120 = vmatprep.subr.bf16.mxu1 %v580_v60  ;;  %1249 = vmatprep.subr.bf16.mxu0 %v582_v61  ;;  %v699_v60 = vld [vmem:[#allocation2 + $0xa20] sm:$0xff]  ;;  %v701_v61 = vld [vmem:[#allocation2 + $0xa30] sm:$0xff] }
 0x307   :  { %1121 = vmatpush1.bf16.msra.mxu1 %v579_v63  ;;  %1250 = vmatpush1.bf16.msra.mxu0 %v581_v0  ;;  %v708_v63 = vld [vmem:[#allocation2 + $0xa68] sm:$0xff]  ;;  %v710_v0 = vld [vmem:[#allocation2 + $0xa78] sm:$0xff] }
 0x308   :  { %1122 = vmatprep.subr.bf16.mxu1 %v588_v1  ;;  %1251 = vmatprep.subr.bf16.mxu0 %v590_v2  ;;  %v707_v1 = vld [vmem:[#allocation2 + $0xa60] sm:$0xff]  ;;  %v709_v2 = vld [vmem:[#allocation2 + $0xa70] sm:$0xff] }
 0x30b   :  { %1123 = vmatpush1.bf16.msra.mxu1 %v587_v35  ;;  %1252 = vmatpush1.bf16.msra.mxu0 %v589_v39  ;;  %v716_v35 = vld [vmem:[#allocation2 + $0xaa8] sm:$0xff]  ;;  %v718_v39 = vld [vmem:[#allocation2 + $0xab8] sm:$0xff] }
 0x30c   :  { %1124 = vmatprep.subr.bf16.mxu1 %v596_v4  ;;  %1253 = vmatprep.subr.bf16.mxu0 %v598_v5  ;;  %v715_v4 = vld [vmem:[#allocation2 + $0xaa0] sm:$0xff]  ;;  %v717_v5 = vld [vmem:[#allocation2 + $0xab0] sm:$0xff] }
 0x30f   :  { %1125 = vmatpush1.bf16.msra.mxu1 %v595_v38  ;;  %1254 = vmatpush1.bf16.msra.mxu0 %v597_v42  ;;  %v724_v38 = vld [vmem:[#allocation2 + $0xae8] sm:$0xff]  ;;  %v726_v42 = vld [vmem:[#allocation2 + $0xaf8] sm:$0xff] }
 0x310   :  { %1126 = vmatprep.subr.bf16.mxu1 %v604_v7  ;;  %1255 = vmatprep.subr.bf16.mxu0 %v606_v8  ;;  %v723_v7 = vld [vmem:[#allocation2 + $0xae0] sm:$0xff]  ;;  %v725_v8 = vld [vmem:[#allocation2 + $0xaf0] sm:$0xff] }
 0x313   :  { %1127 = vmatpush1.bf16.msra.mxu1 %v603_v9  ;;  %1256 = vmatpush1.bf16.msra.mxu0 %v605_v10  ;;  %v732_v9 = vld [vmem:[#allocation2 + $0xb28] sm:$0xff]  ;;  %v734_v10 = vld [vmem:[#allocation2 + $0xb38] sm:$0xff] }
 0x314   :  { %1128 = vmatprep.subr.bf16.mxu1 %v612_v36  ;;  %1257 = vmatprep.subr.bf16.mxu0 %v614_v40  ;;  %v731_v36 = vld [vmem:[#allocation2 + $0xb20] sm:$0xff]  ;;  %v733_v40 = vld [vmem:[#allocation2 + $0xb30] sm:$0xff] }
 0x317   :  { %1129 = vmatpush1.bf16.msra.mxu1 %v611_v12  ;;  %1258 = vmatpush1.bf16.msra.mxu0 %v613_v13  ;;  %v740_v12 = vld [vmem:[#allocation2 + $0xb68] sm:$0xff]  ;;  %v742_v13 = vld [vmem:[#allocation2 + $0xb78] sm:$0xff] }
 0x318   :  { %1130 = vmatprep.subr.bf16.mxu1 %v620_v46  ;;  %1259 = vmatprep.subr.bf16.mxu0 %v622_v14  ;;  %v739_v46 = vld [vmem:[#allocation2 + $0xb60] sm:$0xff]  ;;  %v741_v14 = vld [vmem:[#allocation2 + $0xb70] sm:$0xff] }
 0x31b   :  { %1131 = vmatpush1.bf16.msra.mxu1 %v619_v15  ;;  %1260 = vmatpush1.bf16.msra.mxu0 %v621_v16  ;;  %v748_v15 = vld [vmem:[#allocation2 + $0xba8] sm:$0xff]  ;;  %v750_v16 = vld [vmem:[#allocation2 + $0xbb8] sm:$0xff] }
 0x31c   :  { %1132 = vmatprep.subr.bf16.mxu1 %v628_v17  ;;  %1261 = vmatprep.subr.bf16.mxu0 %v630_v18  ;;  %v747_v17 = vld [vmem:[#allocation2 + $0xba0] sm:$0xff]  ;;  %v749_v18 = vld [vmem:[#allocation2 + $0xbb0] sm:$0xff] }
 0x31f   :  { %1133 = vmatpush1.bf16.msra.mxu1 %v627_v43  ;;  %1262 = vmatpush1.bf16.msra.mxu0 %v629_v45  ;;  %v756_v43 = vld [vmem:[#allocation2 + $0xbe8] sm:$0xff]  ;;  %v758_v45 = vld [vmem:[#allocation2 + $0xbf8] sm:$0xff] }
 0x320   :  { %1145 = vmatprep.subr.bf16.mxu1 %v636_v19  ;;  %1274 = vmatprep.subr.bf16.mxu0 %v638_v20  ;;  %v755_v19 = vld [vmem:[#allocation2 + $0xbe0] sm:$0xff]  ;;  %v757_v20 = vld [vmem:[#allocation2 + $0xbf0] sm:$0xff] }
 0x322   :  { %1135 = vmatmul.mubr.bf16.vlgmr.msra.gmra.mrb[8].mxu1 %v2932_v6  ;;  %1264 = vmatmul.mubr.bf16.vlgmr.msra.gmra.mrb[12].mxu0 %v2932_v6  ;;  %v662_v6 = vld [vmem:[#allocation2 + $0x8f8] sm:$0xff] }
 0x323   :  { %1146 = vmatpush1.bf16.msra.mxu1 %v635_v21  ;;  %1275 = vmatpush1.bf16.msra.mxu0 %v637_v23  ;;  %v2961_v21 = vshrl.u32 %v185_v22, 7 }
 0x324   :  { %1147 = vmatprep.subr.bf16.mxu1 %v644_v24  ;;  %1276 = vmatprep.subr.bf16.mxu0 %v646_v25  ;;  %v759_v25 = vld [vmem:[#allocation12] sm:$0xff] }
 0x325   :  { %1177 = vmatprep.mubr.bf16.mxu1 %v2936_v11  ;;  %1306 = vmatprep.mubr.bf16.mxu0 %v2936_v11  ;;  %v667_v11 = vld [vmem:[#allocation2 + $0x920] sm:$0xff]  ;;  %v763_v23 = vsub.s32 0, %v2961_v21  ;;  %v771_v24 = vsub.s32 2, %v2961_v21 }
 0x327   :  { %1148 = vmatpush1.bf16.msra.mxu1 %v643_v26  ;;  %1277 = vmatpush1.bf16.msra.mxu0 %v645_v27  ;;  %v767_v26 = vsub.s32 1, %v2961_v21  ;;  %v775_v27 = vsub.s32 3, %v2961_v21 }
 0x328   :  { %1149 = vmatprep.subr.bf16.mxu1 %v652_v47  ;;  %1278 = vmatprep.subr.bf16.mxu0 %v654_v62  ;;  %v764_v47 = vrot.slane %v759_v25, %v763_v23  ;;  %v772_v62 = vrot.slane %v759_v25, %v771_v24 }
 0x329   :  { %v776_v22 = vrot.slane %v759_v25, %v775_v27 }
 0x32b   :  { %1150 = vmatpush1.bf16.msra.mxu1 %v651_v28  ;;  %1279 = vmatpush1.bf16.msra.mxu0 %v653_v29 }
 0x32c   :  { %1151 = vmatprep.subr.bf16.mxu1 %v660_v30  ;;  %1280 = vmatprep.subr.bf16.mxu0 %v662_v6 }
 0x32f   :  { %1152 = vmatpush1.bf16.msra.mxu1 %v659_v31  ;;  %1281 = vmatpush1.bf16.msra.mxu0 %v661_v3 }
 0x330   :  { %1153 = vmatprep.subr.bf16.mxu1 %v668_v32  ;;  %1282 = vmatprep.subr.bf16.mxu0 %v670_v33 }
 0x333   :  { %1154 = vmatpush1.bf16.msra.mxu1 %v667_v11  ;;  %1283 = vmatpush1.bf16.msra.mxu0 %v669_v34 }
 0x334   :  { %1155 = vmatprep.subr.bf16.mxu1 %v676_v37  ;;  %1284 = vmatprep.subr.bf16.mxu0 %v678_v41 }
 0x337   :  { %1156 = vmatpush1.bf16.msra.mxu1 %v675_v48  ;;  %1285 = vmatpush1.bf16.msra.mxu0 %v677_v49 }
 0x338   :  { %1157 = vmatprep.subr.bf16.mxu1 %v684_v50  ;;  %1286 = vmatprep.subr.bf16.mxu0 %v686_v51 }
 0x33b   :  { %1158 = vmatpush1.bf16.msra.mxu1 %v683_v52  ;;  %1287 = vmatpush1.bf16.msra.mxu0 %v685_v53  ;;  %v779_v52 = vsub.s32 4, %v2961_v21  ;;  %v787_v53 = vsub.s32 6, %v2961_v21 }
 0x33c   :  { %1159 = vmatprep.subr.bf16.mxu1 %v692_v54  ;;  %1288 = vmatprep.subr.bf16.mxu0 %v694_v55  ;;  %v783_v54 = vsub.s32 5, %v2961_v21  ;;  %v791_v55 = vsub.s32 7, %v2961_v21 }
 0x33f   :  { %1160 = vmatpush1.bf16.msra.mxu1 %v691_v56  ;;  %1289 = vmatpush1.bf16.msra.mxu0 %v693_v57  ;;  %v780_v56 = vrot.slane %v759_v25, %v779_v52  ;;  %v788_v57 = vrot.slane %v759_v25, %v787_v53 }
 0x340   :  { %1161 = vmatprep.subr.bf16.mxu1 %v700_v58  ;;  %1290 = vmatprep.subr.bf16.mxu0 %v702_v59  ;;  %v784_v58 = vrot.slane %v759_v25, %v783_v54  ;;  %v792_v59 = vrot.slane %v759_v25, %v791_v55 }
 0x343   :  { %1162 = vmatpush1.bf16.msra.mxu1 %v699_v60  ;;  %1291 = vmatpush1.bf16.msra.mxu0 %v701_v61 }
 0x344   :  { %1163 = vmatprep.subr.bf16.mxu1 %v708_v63  ;;  %1292 = vmatprep.subr.bf16.mxu0 %v710_v0 }
 0x347   :  { %1164 = vmatpush1.bf16.msra.mxu1 %v707_v1  ;;  %1293 = vmatpush1.bf16.msra.mxu0 %v709_v2 }
 0x348   :  { %1165 = vmatprep.subr.bf16.mxu1 %v716_v35  ;;  %1294 = vmatprep.subr.bf16.mxu0 %v718_v39 }
 0x34b   :  { %1166 = vmatpush1.bf16.msra.mxu1 %v715_v4  ;;  %1295 = vmatpush1.bf16.msra.mxu0 %v717_v5 }
 0x34c   :  { %1167 = vmatprep.subr.bf16.mxu1 %v724_v38  ;;  %1296 = vmatprep.subr.bf16.mxu0 %v726_v42 }
 0x34f   :  { %1168 = vmatpush1.bf16.msra.mxu1 %v723_v7  ;;  %1297 = vmatpush1.bf16.msra.mxu0 %v725_v8 }
 0x350   :  { %1169 = vmatprep.subr.bf16.mxu1 %v732_v9  ;;  %1298 = vmatprep.subr.bf16.mxu0 %v734_v10 }
 0x353   :  { %1170 = vmatpush1.bf16.msra.mxu1 %v731_v36  ;;  %1299 = vmatpush1.bf16.msra.mxu0 %v733_v40 }
 0x354   :  { %1171 = vmatprep.subr.bf16.mxu1 %v740_v12  ;;  %1300 = vmatprep.subr.bf16.mxu0 %v742_v13 }
 0x357   :  { %1172 = vmatpush1.bf16.msra.mxu1 %v739_v46  ;;  %1301 = vmatpush1.bf16.msra.mxu0 %v741_v14 }
 0x358   :  { %1173 = vmatprep.subr.bf16.mxu1 %v748_v15  ;;  %1302 = vmatprep.subr.bf16.mxu0 %v750_v16 }
 0x35b   :  { %1174 = vmatpush1.bf16.msra.mxu1 %v747_v17  ;;  %1303 = vmatpush1.bf16.msra.mxu0 %v749_v18 }
 0x35c   :  { %1175 = vmatprep.subr.bf16.mxu1 %v756_v43  ;;  %1304 = vmatprep.subr.bf16.mxu0 %v758_v45 }
 0x35f   :  { %1176 = vmatpush1.bf16.msra.mxu1 %v755_v19  ;;  %1305 = vmatpush1.bf16.msra.mxu0 %v757_v20 }
 0x362   :  { %1178 = vmatmul.mubr.bf16.vlgmr.msra.gmra.mrb[8].mxu1 %v2944_v44  ;;  %1307 = vmatmul.mubr.bf16.vlgmr.msra.gmra.mrb[12].mxu0 %v2944_v44  ;;  %v768_v44 = vrot.slane %v759_v25, %v767_v26 }
 0x375   :  { %v921_v28 = vpop.f32.mrb[4].mxu1  ;;  %v1050_v29 = vpop.f32.mrb[8].mxu0 }
 0x376   :  { %v2975_v30 = vadd.f32 %v921_v28, %v764_v47  ;;  %v2977_v6 = vadd.f32 %v1050_v29, %v772_v62  ;;  %v923_v31 = vpop.f32.mrb[5].mxu1  ;;  %v1052_v3 = vpop.f32.mrb[9].mxu0 }
 0x377   :  { %v2979_v32 = vadd.f32 %v923_v31, %v768_v44  ;;  %v2981_v33 = vadd.f32 %v1052_v3, %v776_v22  ;;  %v925_v11 = vpop.f32.mrb[6].mxu1  ;;  %v1054_v34 = vpop.f32.mrb[10].mxu0 }
 0x378   :  { %v2983_v37 = vadd.f32 %v925_v11, %v764_v47  ;;  %v2985_v41 = vadd.f32 %v1054_v34, %v772_v62  ;;  %v927_v48 = vpop.f32.mrb[7].mxu1  ;;  %v1056_v49 = vpop.f32.mrb[11].mxu0 }
 0x379   :  { %v2987_v50 = vadd.f32 %v927_v48, %v768_v44  ;;  %v2989_v51 = vadd.f32 %v1056_v49, %v776_v22 }
 0x435   :  { %v1179_v60 = vpop.f32.mrb[8].mxu1  ;;  %v1308_v61 = vpop.f32.mrb[12].mxu0 }
 0x436   :  { %v3003_v63 = vadd.f32 %v1179_v60, %v780_v56  ;;  %v3005_v0 = vadd.f32 %v1308_v61, %v788_v57  ;;  %v1181_v1 = vpop.f32.mrb[9].mxu1  ;;  %v1310_v2 = vpop.f32.mrb[13].mxu0 }
 0x437   :  { %v3007_v35 = vadd.f32 %v1181_v1, %v784_v58  ;;  %v3009_v39 = vadd.f32 %v1310_v2, %v792_v59  ;;  %v1183_v4 = vpop.f32.mrb[10].mxu1  ;;  %v1312_v5 = vpop.f32.mrb[14].mxu0 }
 0x438   :  { %v3011_v38 = vadd.f32 %v1183_v4, %v780_v56  ;;  %v3013_v42 = vadd.f32 %v1312_v5, %v788_v57  ;;  %v1185_v7 = vpop.f32.mrb[11].mxu1  ;;  %v1314_v8 = vpop.f32.mrb[15].mxu0 }
 0x439   :  { %v3015_v9 = vadd.f32 %v1185_v7, %v784_v58  ;;  %v3017_v10 = vadd.f32 %v1314_v8, %v792_v59 }
 0x43a   :  { %2695 = dma.done.wait [#allocation6 + $0x1], 16384 }
 0x43b   :  { %2696 = vsyncadd [#allocation6 + $0x1], 4294950912  ;;  %v1328_v36 = vld [vmem:[#allocation3 + $0x8] sm:$0xff]  ;;  %v1330_v40 = vld [vmem:[#allocation3 + $0x18] sm:$0xff] }
 0x43c   :  { %v1327_v12 = vld [vmem:[#allocation3] sm:$0xff]  ;;  %1497 = vmatprep.subr.bf16.mxu1 %v1328_v36  ;;  %1540 = vmatprep.subr.bf16.mxu0 %v1330_v40  ;;  %v1329_v13 = vld [vmem:[#allocation3 + $0x10] sm:$0xff]  ;;  %v1336_v46 = vld [vmem:[#allocation3 + $0x48] sm:$0xff] }
 0x43d   :  { %v1338_v14 = vld [vmem:[#allocation3 + $0x58] sm:$0xff]  ;;  %1498 = vmatpush1.bf16.msra.mxu1 %v1327_v12  ;;  %1541 = vmatpush1.bf16.msra.mxu0 %v1329_v13  ;;  %v1335_v15 = vld [vmem:[#allocation3 + $0x40] sm:$0xff]  ;;  %v1337_v16 = vld [vmem:[#allocation3 + $0x50] sm:$0xff] }
 0x43e   :  { %1499 = vmatprep.subr.bf16.mxu1 %v1336_v46  ;;  %1542 = vmatprep.subr.bf16.mxu0 %v1338_v14  ;;  %v1344_v17 = vld [vmem:[#allocation3 + $0x88] sm:$0xff]  ;;  %v1346_v18 = vld [vmem:[#allocation3 + $0x98] sm:$0xff]  ;;  %v1343_v43 = vld [vmem:[#allocation3 + $0x80] sm:$0xff] }
 0x43f   :  { %v1345_v45 = vld [vmem:[#allocation3 + $0x90] sm:$0xff]  ;;  %v1352_v19 = vld [vmem:[#allocation3 + $0xc8] sm:$0xff]  ;;  %v1354_v20 = vld [vmem:[#allocation3 + $0xd8] sm:$0xff] }
 0x440   :  { %v1351_v25 = vld [vmem:[#allocation3 + $0xc0] sm:$0xff]  ;;  %v1353_v47 = vld [vmem:[#allocation3 + $0xd0] sm:$0xff]  ;;  %v1360_v62 = vld [vmem:[#allocation3 + $0x108] sm:$0xff] }
 0x441   :  { %1500 = vmatpush1.bf16.msra.mxu1 %v1335_v15  ;;  %1543 = vmatpush1.bf16.msra.mxu0 %v1337_v16  ;;  %v1362_v44 = vld [vmem:[#allocation3 + $0x118] sm:$0xff]  ;;  %v1359_v22 = vld [vmem:[#allocation3 + $0x100] sm:$0xff]  ;;  %v1361_v28 = vld [vmem:[#allocation3 + $0x110] sm:$0xff] }
 0x442   :  { %1501 = vmatprep.subr.bf16.mxu1 %v1344_v17  ;;  %1544 = vmatprep.subr.bf16.mxu0 %v1346_v18  ;;  %v1368_v29 = vld [vmem:[#allocation3 + $0x148] sm:$0xff]  ;;  %v1370_v31 = vld [vmem:[#allocation3 + $0x158] sm:$0xff]  ;;  %v1367_v3 = vld [vmem:[#allocation3 + $0x140] sm:$0xff] }
 0x443   :  { %v1369_v11 = vld [vmem:[#allocation3 + $0x150] sm:$0xff]  ;;  %v1376_v34 = vld [vmem:[#allocation3 + $0x188] sm:$0xff]  ;;  %v1378_v48 = vld [vmem:[#allocation3 + $0x198] sm:$0xff] }
 0x444   :  { %v1322_v49 = vld [vmem:[#allocation10 + $0x8] sm:$0xff]  ;;  %v1324_v56 = vld [vmem:[#allocation10 + $0x18] sm:$0xff]  ;;  %v1375_v58 = vld [vmem:[#allocation3 + $0x180] sm:$0xff] }
 0x445   :  { %1502 = vmatpush1.bf16.msra.mxu1 %v1343_v43  ;;  %1545 = vmatpush1.bf16.msra.mxu0 %v1345_v45  ;;  %v3019_v57 = vpack.c.bf16 %v1324_v56, %v1322_v49  ;;  %v1377_v59 = vld [vmem:[#allocation3 + $0x190] sm:$0xff]  ;;  %v1384_v60 = vld [vmem:[#allocation3 + $0x1c8] sm:$0xff]  ;;  %v1386_v61 = vld [vmem:[#allocation3 + $0x1d8] sm:$0xff] }
 0x446   :  { %1503 = vmatprep.subr.bf16.mxu1 %v1352_v19  ;;  %1546 = vmatprep.subr.bf16.mxu0 %v1354_v20  ;;  %v1383_v1 = vld [vmem:[#allocation3 + $0x1c0] sm:$0xff]  ;;  %v1385_v2 = vld [vmem:[#allocation3 + $0x1d0] sm:$0xff]  ;;  %v1392_v4 = vld [vmem:[#allocation3 + $0x208] sm:$0xff] }
 0x447   :  { %1529 = vmatprep.mubr.bf16.mxu1 %v3019_v57  ;;  %1572 = vmatprep.mubr.bf16.mxu0 %v3019_v57  ;;  %v1394_v5 = vld [vmem:[#allocation3 + $0x218] sm:$0xff]  ;;  %v1391_v7 = vld [vmem:[#allocation3 + $0x200] sm:$0xff]  ;;  %v1393_v8 = vld [vmem:[#allocation3 + $0x210] sm:$0xff] }
 0x448   :  { %v1400_v36 = vld [vmem:[#allocation3 + $0x248] sm:$0xff]  ;;  %v1402_v40 = vld [vmem:[#allocation3 + $0x258] sm:$0xff]  ;;  %v1399_v12 = vld [vmem:[#allocation3 + $0x240] sm:$0xff] }
 0x449   :  { %1504 = vmatpush1.bf16.msra.mxu1 %v1351_v25  ;;  %1547 = vmatpush1.bf16.msra.mxu0 %v1353_v47  ;;  %v1401_v13 = vld [vmem:[#allocation3 + $0x250] sm:$0xff]  ;;  %v1408_v46 = vld [vmem:[#allocation3 + $0x288] sm:$0xff]  ;;  %v1410_v14 = vld [vmem:[#allocation3 + $0x298] sm:$0xff] }
 0x44a   :  { %1505 = vmatprep.subr.bf16.mxu1 %v1360_v62  ;;  %1548 = vmatprep.subr.bf16.mxu0 %v1362_v44  ;;  %v1407_v15 = vld [vmem:[#allocation3 + $0x280] sm:$0xff]  ;;  %v1409_v16 = vld [vmem:[#allocation3 + $0x290] sm:$0xff]  ;;  %v1416_v17 = vld [vmem:[#allocation3 + $0x2c8] sm:$0xff] }
 0x44b   :  { %v1418_v18 = vld [vmem:[#allocation3 + $0x2d8] sm:$0xff]  ;;  %v1415_v43 = vld [vmem:[#allocation3 + $0x2c0] sm:$0xff]  ;;  %v1417_v45 = vld [vmem:[#allocation3 + $0x2d0] sm:$0xff] }
 0x44c   :  { %v1424_v19 = vld [vmem:[#allocation3 + $0x308] sm:$0xff]  ;;  %v1426_v20 = vld [vmem:[#allocation3 + $0x318] sm:$0xff]  ;;  %v1423_v25 = vld [vmem:[#allocation3 + $0x300] sm:$0xff] }
 0x44d   :  { %1506 = vmatpush1.bf16.msra.mxu1 %v1359_v22  ;;  %1549 = vmatpush1.bf16.msra.mxu0 %v1361_v28  ;;  %v1425_v47 = vld [vmem:[#allocation3 + $0x310] sm:$0xff]  ;;  %v1432_v62 = vld [vmem:[#allocation3 + $0x348] sm:$0xff]  ;;  %v1434_v44 = vld [vmem:[#allocation3 + $0x358] sm:$0xff] }
 0x44e   :  { %1507 = vmatprep.subr.bf16.mxu1 %v1368_v29  ;;  %1550 = vmatprep.subr.bf16.mxu0 %v1370_v31  ;;  %v1431_v22 = vld [vmem:[#allocation3 + $0x340] sm:$0xff]  ;;  %v1433_v28 = vld [vmem:[#allocation3 + $0x350] sm:$0xff]  ;;  %v1440_v29 = vld [vmem:[#allocation3 + $0x388] sm:$0xff] }
 0x44f   :  { %v1442_v31 = vld [vmem:[#allocation3 + $0x398] sm:$0xff]  ;;  %v1321_v49 = vld [vmem:[#allocation10] sm:$0xff]  ;;  %v1323_v56 = vld [vmem:[#allocation10 + $0x10] sm:$0xff] }
 0x451   :  { %1508 = vmatpush1.bf16.msra.mxu1 %v1367_v3  ;;  %1551 = vmatpush1.bf16.msra.mxu0 %v1369_v11  ;;  %v1439_v3 = vld [vmem:[#allocation3 + $0x380] sm:$0xff]  ;;  %v1441_v11 = vld [vmem:[#allocation3 + $0x390] sm:$0xff] }
 0x452   :  { %1509 = vmatprep.subr.bf16.mxu1 %v1376_v34  ;;  %1552 = vmatprep.subr.bf16.mxu0 %v1378_v48  ;;  %v1448_v34 = vld [vmem:[#allocation3 + $0x3c8] sm:$0xff]  ;;  %v1450_v48 = vld [vmem:[#allocation3 + $0x3d8] sm:$0xff] }
 0x455   :  { %1510 = vmatpush1.bf16.msra.mxu1 %v1375_v58  ;;  %1553 = vmatpush1.bf16.msra.mxu0 %v1377_v59  ;;  %v1447_v58 = vld [vmem:[#allocation3 + $0x3c0] sm:$0xff]  ;;  %v1449_v59 = vld [vmem:[#allocation3 + $0x3d0] sm:$0xff] }
 0x456   :  { %1511 = vmatprep.subr.bf16.mxu1 %v1384_v60  ;;  %1554 = vmatprep.subr.bf16.mxu0 %v1386_v61  ;;  %v1332_v60 = vld [vmem:[#allocation3 + $0x28] sm:$0xff]  ;;  %v1334_v61 = vld [vmem:[#allocation3 + $0x38] sm:$0xff] }
 0x459   :  { %1512 = vmatpush1.bf16.msra.mxu1 %v1383_v1  ;;  %1555 = vmatpush1.bf16.msra.mxu0 %v1385_v2  ;;  %v3023_v1 = vpack.c.bf16 %v1323_v56, %v1321_v49  ;;  %v1331_v2 = vld [vmem:[#allocation3 + $0x20] sm:$0xff]  ;;  %v1397_v56 = vld [vmem:[#allocation3 + $0x230] sm:$0xff] }
 0x45a   :  { %1513 = vmatprep.subr.bf16.mxu1 %v1392_v4  ;;  %1556 = vmatprep.subr.bf16.mxu0 %v1394_v5  ;;  %v1333_v4 = vld [vmem:[#allocation3 + $0x30] sm:$0xff]  ;;  %v1340_v5 = vld [vmem:[#allocation3 + $0x68] sm:$0xff]  ;;  %v1395_v49 = vld [vmem:[#allocation3 + $0x220] sm:$0xff] }
 0x45d   :  { %1514 = vmatpush1.bf16.msra.mxu1 %v1391_v7  ;;  %1557 = vmatpush1.bf16.msra.mxu0 %v1393_v8  ;;  %v1342_v7 = vld [vmem:[#allocation3 + $0x78] sm:$0xff]  ;;  %v1339_v8 = vld [vmem:[#allocation3 + $0x60] sm:$0xff] }
 0x45e   :  { %1515 = vmatprep.subr.bf16.mxu1 %v1400_v36  ;;  %1558 = vmatprep.subr.bf16.mxu0 %v1402_v40  ;;  %v1341_v36 = vld [vmem:[#allocation3 + $0x70] sm:$0xff]  ;;  %v1348_v40 = vld [vmem:[#allocation3 + $0xa8] sm:$0xff] }
 0x461   :  { %1516 = vmatpush1.bf16.msra.mxu1 %v1399_v12  ;;  %1559 = vmatpush1.bf16.msra.mxu0 %v1401_v13  ;;  %v1350_v12 = vld [vmem:[#allocation3 + $0xb8] sm:$0xff]  ;;  %v1347_v13 = vld [vmem:[#allocation3 + $0xa0] sm:$0xff] }
 0x462   :  { %1517 = vmatprep.subr.bf16.mxu1 %v1408_v46  ;;  %1560 = vmatprep.subr.bf16.mxu0 %v1410_v14  ;;  %v1349_v46 = vld [vmem:[#allocation3 + $0xb0] sm:$0xff]  ;;  %v1356_v14 = vld [vmem:[#allocation3 + $0xe8] sm:$0xff] }
 0x465   :  { %1518 = vmatpush1.bf16.msra.mxu1 %v1407_v15  ;;  %1561 = vmatpush1.bf16.msra.mxu0 %v1409_v16  ;;  %v1358_v15 = vld [vmem:[#allocation3 + $0xf8] sm:$0xff]  ;;  %v1355_v16 = vld [vmem:[#allocation3 + $0xe0] sm:$0xff] }
 0x466   :  { %1519 = vmatprep.subr.bf16.mxu1 %v1416_v17  ;;  %1562 = vmatprep.subr.bf16.mxu0 %v1418_v18  ;;  %v1357_v17 = vld [vmem:[#allocation3 + $0xf0] sm:$0xff]  ;;  %v1364_v18 = vld [vmem:[#allocation3 + $0x128] sm:$0xff] }
 0x469   :  { %1520 = vmatpush1.bf16.msra.mxu1 %v1415_v43  ;;  %1563 = vmatpush1.bf16.msra.mxu0 %v1417_v45  ;;  %v1366_v43 = vld [vmem:[#allocation3 + $0x138] sm:$0xff]  ;;  %v1365_v45 = vld [vmem:[#allocation3 + $0x130] sm:$0xff] }
 0x46a   :  { %1521 = vmatprep.subr.bf16.mxu1 %v1424_v19  ;;  %1564 = vmatprep.subr.bf16.mxu0 %v1426_v20  ;;  %v1372_v19 = vld [vmem:[#allocation3 + $0x168] sm:$0xff]  ;;  %v1374_v20 = vld [vmem:[#allocation3 + $0x178] sm:$0xff] }
 0x46d   :  { %1522 = vmatpush1.bf16.msra.mxu1 %v1423_v25  ;;  %1565 = vmatpush1.bf16.msra.mxu0 %v1425_v47  ;;  %v1371_v25 = vld [vmem:[#allocation3 + $0x160] sm:$0xff]  ;;  %v1373_v47 = vld [vmem:[#allocation3 + $0x170] sm:$0xff] }
 0x46e   :  { %1523 = vmatprep.subr.bf16.mxu1 %v1432_v62  ;;  %1566 = vmatprep.subr.bf16.mxu0 %v1434_v44  ;;  %v1380_v62 = vld [vmem:[#allocation3 + $0x1a8] sm:$0xff]  ;;  %v1382_v44 = vld [vmem:[#allocation3 + $0x1b8] sm:$0xff] }
 0x471   :  { %1524 = vmatpush1.bf16.msra.mxu1 %v1431_v22  ;;  %1567 = vmatpush1.bf16.msra.mxu0 %v1433_v28  ;;  %v1379_v22 = vld [vmem:[#allocation3 + $0x1a0] sm:$0xff]  ;;  %v1381_v28 = vld [vmem:[#allocation3 + $0x1b0] sm:$0xff] }
 0x472   :  { %1525 = vmatprep.subr.bf16.mxu1 %v1440_v29  ;;  %1568 = vmatprep.subr.bf16.mxu0 %v1442_v31  ;;  %v1388_v29 = vld [vmem:[#allocation3 + $0x1e8] sm:$0xff]  ;;  %v1390_v31 = vld [vmem:[#allocation3 + $0x1f8] sm:$0xff] }
 0x475   :  { %1526 = vmatpush1.bf16.msra.mxu1 %v1439_v3  ;;  %1569 = vmatpush1.bf16.msra.mxu0 %v1441_v11  ;;  %v1387_v3 = vld [vmem:[#allocation3 + $0x1e0] sm:$0xff]  ;;  %v1389_v11 = vld [vmem:[#allocation3 + $0x1f0] sm:$0xff] }
 0x476   :  { %1527 = vmatprep.subr.bf16.mxu1 %v1448_v34  ;;  %1570 = vmatprep.subr.bf16.mxu0 %v1450_v48  ;;  %v1396_v34 = vld [vmem:[#allocation3 + $0x228] sm:$0xff]  ;;  %v1398_v48 = vld [vmem:[#allocation3 + $0x238] sm:$0xff] }
 0x479   :  { %1528 = vmatpush1.bf16.msra.mxu1 %v1447_v58  ;;  %1571 = vmatpush1.bf16.msra.mxu0 %v1449_v59  ;;  %v1404_v58 = vld [vmem:[#allocation3 + $0x268] sm:$0xff]  ;;  %v1406_v59 = vld [vmem:[#allocation3 + $0x278] sm:$0xff] }
 0x47a   :  { %1583 = vmatprep.subr.bf16.mxu1 %v1332_v60  ;;  %1626 = vmatprep.subr.bf16.mxu0 %v1334_v61  ;;  %v1403_v60 = vld [vmem:[#allocation3 + $0x260] sm:$0xff]  ;;  %v1405_v61 = vld [vmem:[#allocation3 + $0x270] sm:$0xff] }
 0x47c   :  { %1530 = vmatmul.mubr.bf16.vlgmr.msra.gmra.mrb[12].mxu1 %v3023_v1  ;;  %1573 = vmatmul.mubr.bf16.vlgmr.msra.gmra.mrb[16].mxu0 %v3023_v1 }
 0x47d   :  { %1584 = vmatpush1.bf16.msra.mxu1 %v1331_v2  ;;  %1627 = vmatpush1.bf16.msra.mxu0 %v1333_v4  ;;  %v1412_v2 = vld [vmem:[#allocation3 + $0x2a8] sm:$0xff]  ;;  %v1414_v4 = vld [vmem:[#allocation3 + $0x2b8] sm:$0xff] }
 0x47e   :  { %1585 = vmatprep.subr.bf16.mxu1 %v1340_v5  ;;  %1628 = vmatprep.subr.bf16.mxu0 %v1342_v7  ;;  %v1411_v5 = vld [vmem:[#allocation3 + $0x2a0] sm:$0xff]  ;;  %v1413_v7 = vld [vmem:[#allocation3 + $0x2b0] sm:$0xff] }
 0x47f   :  { %1615 = vmatprep.mubr.bf16.mxu1 %v3019_v57  ;;  %1658 = vmatprep.mubr.bf16.mxu0 %v3019_v57  ;;  %v1363_v57 = vld [vmem:[#allocation3 + $0x120] sm:$0xff] }
 0x481   :  { %1586 = vmatpush1.bf16.msra.mxu1 %v1339_v8  ;;  %1629 = vmatpush1.bf16.msra.mxu0 %v1341_v36  ;;  %v1420_v8 = vld [vmem:[#allocation3 + $0x2e8] sm:$0xff]  ;;  %v1422_v36 = vld [vmem:[#allocation3 + $0x2f8] sm:$0xff] }
 0x482   :  { %1587 = vmatprep.subr.bf16.mxu1 %v1348_v40  ;;  %1630 = vmatprep.subr.bf16.mxu0 %v1350_v12  ;;  %v1419_v40 = vld [vmem:[#allocation3 + $0x2e0] sm:$0xff]  ;;  %v1421_v12 = vld [vmem:[#allocation3 + $0x2f0] sm:$0xff] }
 0x485   :  { %1588 = vmatpush1.bf16.msra.mxu1 %v1347_v13  ;;  %1631 = vmatpush1.bf16.msra.mxu0 %v1349_v46  ;;  %v1428_v13 = vld [vmem:[#allocation3 + $0x328] sm:$0xff]  ;;  %v1430_v46 = vld [vmem:[#allocation3 + $0x338] sm:$0xff] }
 0x486   :  { %1589 = vmatprep.subr.bf16.mxu1 %v1356_v14  ;;  %1632 = vmatprep.subr.bf16.mxu0 %v1358_v15  ;;  %v1427_v14 = vld [vmem:[#allocation3 + $0x320] sm:$0xff]  ;;  %v1429_v15 = vld [vmem:[#allocation3 + $0x330] sm:$0xff] }
 0x489   :  { %1590 = vmatpush1.bf16.msra.mxu1 %v1355_v16  ;;  %1633 = vmatpush1.bf16.msra.mxu0 %v1357_v17  ;;  %v1436_v16 = vld [vmem:[#allocation3 + $0x368] sm:$0xff]  ;;  %v1438_v17 = vld [vmem:[#allocation3 + $0x378] sm:$0xff] }
 0x48a   :  { %1591 = vmatprep.subr.bf16.mxu1 %v1364_v18  ;;  %1634 = vmatprep.subr.bf16.mxu0 %v1366_v43  ;;  %v1435_v18 = vld [vmem:[#allocation3 + $0x360] sm:$0xff]  ;;  %v1437_v43 = vld [vmem:[#allocation3 + $0x370] sm:$0xff] }
 0x48d   :  { %1592 = vmatpush1.bf16.msra.mxu1 %v1363_v57  ;;  %1635 = vmatpush1.bf16.msra.mxu0 %v1365_v45  ;;  %v1444_v57 = vld [vmem:[#allocation3 + $0x3a8] sm:$0xff]  ;;  %v1446_v45 = vld [vmem:[#allocation3 + $0x3b8] sm:$0xff] }
 0x48e   :  { %1593 = vmatprep.subr.bf16.mxu1 %v1372_v19  ;;  %1636 = vmatprep.subr.bf16.mxu0 %v1374_v20  ;;  %v1443_v19 = vld [vmem:[#allocation3 + $0x3a0] sm:$0xff]  ;;  %v1445_v20 = vld [vmem:[#allocation3 + $0x3b0] sm:$0xff] }
 0x491   :  { %1594 = vmatpush1.bf16.msra.mxu1 %v1371_v25  ;;  %1637 = vmatpush1.bf16.msra.mxu0 %v1373_v47  ;;  %v1452_v25 = vld [vmem:[#allocation3 + $0x3e8] sm:$0xff]  ;;  %v1454_v47 = vld [vmem:[#allocation3 + $0x3f8] sm:$0xff] }
 0x492   :  { %1595 = vmatprep.subr.bf16.mxu1 %v1380_v62  ;;  %1638 = vmatprep.subr.bf16.mxu0 %v1382_v44  ;;  %v1451_v62 = vld [vmem:[#allocation3 + $0x3e0] sm:$0xff]  ;;  %v1453_v44 = vld [vmem:[#allocation3 + $0x3f0] sm:$0xff] }
 0x495   :  { %1596 = vmatpush1.bf16.msra.mxu1 %v1379_v22  ;;  %1639 = vmatpush1.bf16.msra.mxu0 %v1381_v28  ;;  %v1455_v22 = vld [vmem:[#allocation13] sm:$0xff] }
 0x496   :  { %1597 = vmatprep.subr.bf16.mxu1 %v1388_v29  ;;  %1640 = vmatprep.subr.bf16.mxu0 %v1390_v31  ;;  %v1460_v28 = vrot.slane %v1455_v22, %v763_v23  ;;  %v1468_v29 = vrot.slane %v1455_v22, %v771_v24  ;;  %v1464_v31 = vrot.slane %v1455_v22, %v767_v26 }
 0x499   :  { %1598 = vmatpush1.bf16.msra.mxu1 %v1387_v3  ;;  %1641 = vmatpush1.bf16.msra.mxu0 %v1389_v11  ;;  %v1472_v3 = vrot.slane %v1455_v22, %v775_v27 }
 0x49a   :  { %1599 = vmatprep.subr.bf16.mxu1 %v1396_v34  ;;  %1642 = vmatprep.subr.bf16.mxu0 %v1398_v48 }
 0x49d   :  { %1600 = vmatpush1.bf16.msra.mxu1 %v1395_v49  ;;  %1643 = vmatpush1.bf16.msra.mxu0 %v1397_v56 }
 0x49e   :  { %1601 = vmatprep.subr.bf16.mxu1 %v1404_v58  ;;  %1644 = vmatprep.subr.bf16.mxu0 %v1406_v59 }
 0x4a1   :  { %1602 = vmatpush1.bf16.msra.mxu1 %v1403_v60  ;;  %1645 = vmatpush1.bf16.msra.mxu0 %v1405_v61 }
 0x4a2   :  { %1603 = vmatprep.subr.bf16.mxu1 %v1412_v2  ;;  %1646 = vmatprep.subr.bf16.mxu0 %v1414_v4 }
 0x4a5   :  { %1604 = vmatpush1.bf16.msra.mxu1 %v1411_v5  ;;  %1647 = vmatpush1.bf16.msra.mxu0 %v1413_v7 }
 0x4a6   :  { %1605 = vmatprep.subr.bf16.mxu1 %v1420_v8  ;;  %1648 = vmatprep.subr.bf16.mxu0 %v1422_v36 }
 0x4a9   :  { %1606 = vmatpush1.bf16.msra.mxu1 %v1419_v40  ;;  %1649 = vmatpush1.bf16.msra.mxu0 %v1421_v12 }
 0x4aa   :  { %1607 = vmatprep.subr.bf16.mxu1 %v1428_v13  ;;  %1650 = vmatprep.subr.bf16.mxu0 %v1430_v46 }
 0x4ad   :  { %1608 = vmatpush1.bf16.msra.mxu1 %v1427_v14  ;;  %1651 = vmatpush1.bf16.msra.mxu0 %v1429_v15  ;;  %v1476_v14 = vrot.slane %v1455_v22, %v779_v52  ;;  %v1484_v15 = vrot.slane %v1455_v22, %v787_v53 }
 0x4ae   :  { %1609 = vmatprep.subr.bf16.mxu1 %v1436_v16  ;;  %1652 = vmatprep.subr.bf16.mxu0 %v1438_v17  ;;  %v1480_v16 = vrot.slane %v1455_v22, %v783_v54  ;;  %v1488_v17 = vrot.slane %v1455_v22, %v791_v55 }
 0x4b1   :  { %1610 = vmatpush1.bf16.msra.mxu1 %v1435_v18  ;;  %1653 = vmatpush1.bf16.msra.mxu0 %v1437_v43 }
 0x4b2   :  { %1611 = vmatprep.subr.bf16.mxu1 %v1444_v57  ;;  %1654 = vmatprep.subr.bf16.mxu0 %v1446_v45 }
 0x4b5   :  { %1612 = vmatpush1.bf16.msra.mxu1 %v1443_v19  ;;  %1655 = vmatpush1.bf16.msra.mxu0 %v1445_v20 }
 0x4b6   :  { %1613 = vmatprep.subr.bf16.mxu1 %v1452_v25  ;;  %1656 = vmatprep.subr.bf16.mxu0 %v1454_v47 }
 0x4b9   :  { %1614 = vmatpush1.bf16.msra.mxu1 %v1451_v62  ;;  %1657 = vmatpush1.bf16.msra.mxu0 %v1453_v44 }
 0x4bc   :  { %1616 = vmatmul.mubr.bf16.vlgmr.msra.gmra.mrb[16].mxu1 %v3023_v1  ;;  %1659 = vmatmul.mubr.bf16.vlgmr.msra.gmra.mrb[20].mxu0 %v3023_v1 }
 0x54f   :  { %v1531_v11 = vpop.f32.mrb[12].mxu1  ;;  %v1574_v34 = vpop.f32.mrb[16].mxu0 }
 0x550   :  { %v3039_v48 = vadd.f32 %v1531_v11, %v1460_v28  ;;  %v3041_v49 = vadd.f32 %v1574_v34, %v1468_v29  ;;  %v1533_v1 = vpop.f32.mrb[13].mxu1  ;;  %v1576_v56 = vpop.f32.mrb[17].mxu0 }
 0x551   :  { %v1534_v58 = vadd.f32 %v1533_v1, %v1464_v31  ;;  %v1577_v59 = vadd.f32 %v1576_v56, %v1472_v3  ;;  %v1535_v23 = vpop.f32.mrb[14].mxu1  ;;  %v1578_v60 = vpop.f32.mrb[18].mxu0 }
 0x552   :  { %v1669_v24 = vmax.f32 %v3039_v48, 0.0  ;;  %v1671_v61 = vmax.f32 %v3041_v49, 0.0  ;;  %v3045_v26 = vadd.f32 %v1535_v23, %v1460_v28  ;;  %v3047_v2 = vadd.f32 %v1578_v60, %v1468_v29  ;;  %v1537_v27 = vpop.f32.mrb[15].mxu1  ;;  %v1580_v4 = vpop.f32.mrb[19].mxu0 }
 0x553   :  { %v1670_v5 = vmax.f32 %v1534_v58, 0.0  ;;  %v1672_v7 = vmax.f32 %v1577_v59, 0.0  ;;  %v1538_v8 = vadd.f32 %v1537_v27, %v1464_v31  ;;  %v1581_v36 = vadd.f32 %v1580_v4, %v1472_v3 }
 0x554   :  { %v1677_v40 = vmax.f32 %v3045_v26, 0.0  ;;  %v1679_v12 = vmax.f32 %v3047_v2, 0.0 }
 0x555   :  { %v1678_v13 = vmax.f32 %v1538_v8, 0.0  ;;  %v1680_v46 = vmax.f32 %v1581_v36, 0.0 }
 0x58f   :  { %v1617_v18 = vpop.f32.mrb[16].mxu1  ;;  %v1660_v43 = vpop.f32.mrb[20].mxu0 }
 0x590   :  { %v3059_v57 = vadd.f32 %v1617_v18, %v1476_v14  ;;  %v3061_v45 = vadd.f32 %v1660_v43, %v1484_v15  ;;  %v1619_v19 = vpop.f32.mrb[17].mxu1  ;;  %v1662_v20 = vpop.f32.mrb[21].mxu0 }
 0x591   :  { %v3063_v25 = vadd.f32 %v1619_v19, %v1480_v16  ;;  %v3065_v52 = vadd.f32 %v1662_v20, %v1488_v17  ;;  %v1621_v47 = vpop.f32.mrb[18].mxu1  ;;  %v1664_v53 = vpop.f32.mrb[22].mxu0 }
 0x592   :  { %v1673_v62 = vmax.f32 %v3059_v57, 0.0  ;;  %v1675_v54 = vmax.f32 %v3061_v45, 0.0  ;;  %v3069_v21 = vadd.f32 %v1621_v47, %v1476_v14  ;;  %v3071_v55 = vadd.f32 %v1664_v53, %v1484_v15  ;;  %v1623_v44 = vpop.f32.mrb[19].mxu1  ;;  %v1666_v22 = vpop.f32.mrb[23].mxu0 }
 0x593   :  { %v1674_v28 = vmax.f32 %v3063_v25, 0.0  ;;  %v1676_v29 = vmax.f32 %v3065_v52, 0.0  ;;  %v3075_v31 = vadd.f32 %v1623_v44, %v1480_v16  ;;  %v3077_v3 = vadd.f32 %v1666_v22, %v1488_v17 }
 0x594   :  { %v1681_v11 = vmax.f32 %v3069_v21, 0.0  ;;  %v1683_v34 = vmax.f32 %v3071_v55, 0.0 }
 0x595   :  { %v1682_v1 = vmax.f32 %v3075_v31, 0.0  ;;  %v1684_v56 = vmax.f32 %v3077_v3, 0.0 }
 0x596   :  { %2697 = dma.done.wait [#allocation6 + $0x2], 8192 }
 0x597   :  { %2698 = vsyncadd [#allocation6 + $0x2], 4294959104 }
 0x598   :  { %2699 = dma.done.wait [#allocation6 + $0x3], 8192 }
 0x599   :  { %2700 = vsyncadd [#allocation6 + $0x3], 4294959104  ;;  %v1764_v58 = vpack.c.bf16 %v1678_v13, %v1670_v5  ;;  %v1766_v59 = vpack.c.bf16 %v1680_v46, %v1672_v7  ;;  %v1779_v23 = vld [vmem:[#allocation5 + $0x40] sm:$0xff]  ;;  %v1780_v8 = vld [vmem:[#allocation5 + $0x48] sm:$0xff]  ;;  %v1768_v48 = vpack.c.bf16 %v1682_v1, %v1674_v28  ;;  %v1770_v49 = vpack.c.bf16 %v1684_v56, %v1676_v29  ;;  %s2729_s8 = smov [#allocation16]  }
 0x59a   :  { %v1795_v60 = vld [vmem:[#allocation5 + $0xc0] sm:$0xff]  ;;  %2250 = vmatprep.subr.bf16.mxu1 %v1779_v23  ;;  %v1796_v36 = vld [vmem:[#allocation5 + $0xc8] sm:$0xff]  ;;  %v1781_v16 = vld [vmem:[#allocation5 + $0x50] sm:$0xff]  ;;  %v1694_v57 = vpack.c.bf16 %v2989_v51, %v2981_v33  ;;  %s2197_s11 = sshll.u32 %s2729_s8, 4  ;;  %s2198_s11 = int_to_ptr.vmem [resolvable:$true] %s2197_s11 }
 0x59b   :  { %1867 = vmatprep.mubr.bf16.mxu1 %v1764_v58  ;;  %1908 = vmatprep.mubr.bf16.mxu0 %v1766_v59  ;;  %v1771_v27 = vld [vmem:[#allocation5] sm:$0xff]  ;;  %v1772_v14 = vld [vmem:[#allocation5 + $0x8] sm:$0xff]  ;;  %v1797_v17 = vld [vmem:[#allocation5 + $0xd0] sm:$0xff]  ;;  %s2665_s4 = scalar_lea.vmem %s2198_s11, 256  ;;  %p2670_p1 = scmp.lt.s32.totalorder %s2198_s11, %s2198_s11 }
 0x59c   :  { %2272 = vmatprep.subr.bf16.mxu0 %v1795_v60  ;;  %v1787_v4 = vld [vmem:[#allocation5 + $0x80] sm:$0xff]  ;;  %2251 = vmatpush3.bf16.msra.mxu1 %v1771_v27  ;;  %v1788_v15 = vld [vmem:[#allocation5 + $0x88] sm:$0xff]  ;;  %v1773_v5 = vld [vmem:[#allocation5 + $0x10] sm:$0xff]  ;;  %p2666_p0 = scmp.ne.s32.totalorder %s2198_s11, %s2665_s4  ;;  %p2671_p2 = scmp.lt.s32.totalorder %s2665_s4, %s2665_s4 }
 0x59d   :  { %2273 = vmatpush3.bf16.msra.mxu0 %v1787_v4  ;;  %2252 = vmatprep.subr.bf16.mxu1 %v1780_v8  ;;  %v1789_v7 = vld [vmem:[#allocation5 + $0x90] sm:$0xff]  ;;  %v1782_v13 = vld [vmem:[#allocation5 + $0x58] sm:$0xff]  ;;  %v1783_v19 = vld [vmem:[#allocation5 + $0x60] sm:$0xff] }
 0x59e   :  { %2274 = vmatprep.subr.bf16.mxu0 %v1796_v36  ;;  %v1798_v46 = vld [vmem:[#allocation5 + $0xd8] sm:$0xff]  ;;  %v1799_v20 = vld [vmem:[#allocation5 + $0xe0] sm:$0xff]  ;;  %v1784_v44 = vld [vmem:[#allocation5 + $0x68] sm:$0xff]  ;;  %p2672_p3 = por %p2671_p2, %p2670_p1 }
 0x59f   :  { %v1774_v18 = vld [vmem:[#allocation5 + $0x18] sm:$0xff]  ;;  %v1775_v47 = vld [vmem:[#allocation5 + $0x20] sm:$0xff]  ;;  %v1800_v22 = vld [vmem:[#allocation5 + $0xe8] sm:$0xff] }
 0x5a0   :  { %2253 = vmatpush3.bf16.msra.mxu1 %v1772_v14  ;;  %v1790_v43 = vld [vmem:[#allocation5 + $0x98] sm:$0xff]  ;;  %v1791_v53 = vld [vmem:[#allocation5 + $0xa0] sm:$0xff]  ;;  %v1776_v58 = vld [vmem:[#allocation5 + $0x28] sm:$0xff]  ;;  %p2673_p4 = pnand %p2672_p3, %p2666_p0 }
 0x5a1   :  { %2275 = vmatpush3.bf16.msra.mxu0 %v1788_v15  ;;  %2254 = vmatprep.subr.bf16.mxu1 %v1781_v16  ;;  %v1792_v59 = vld [vmem:[#allocation5 + $0xa8] sm:$0xff]  ;;  %v1785_v23 = vld [vmem:[#allocation5 + $0x70] sm:$0xff]  ;;  %v1786_v8 = vld [vmem:[#allocation5 + $0x78] sm:$0xff] }
 0x5a2   :  { %2276 = vmatprep.subr.bf16.mxu0 %v1797_v17  ;;  %v1801_v60 = vld [vmem:[#allocation5 + $0xf0] sm:$0xff]  ;;  %v1802_v36 = vld [vmem:[#allocation5 + $0xf8] sm:$0xff]  ;;  %v1811_v16 = vld [vmem:[#allocation5 + $0x140] sm:$0xff] }
 0x5a3   :  { %v1777_v27 = vld [vmem:[#allocation5 + $0x30] sm:$0xff]  ;;  %v1778_v14 = vld [vmem:[#allocation5 + $0x38] sm:$0xff]  ;;  %v1827_v17 = vld [vmem:[#allocation5 + $0x1c0] sm:$0xff] }
 0x5a4   :  { %2255 = vmatpush3.bf16.msra.mxu1 %v1773_v5  ;;  %v1793_v4 = vld [vmem:[#allocation5 + $0xb0] sm:$0xff]  ;;  %v1794_v15 = vld [vmem:[#allocation5 + $0xb8] sm:$0xff]  ;;  %v1763_v5 = vpack.c.bf16 %v1677_v40, %v1669_v24  ;;  %v1804_v24 = vld [vmem:[#allocation5 + $0x108] sm:$0xff] }
 0x5a5   :  { %2277 = vmatpush3.bf16.msra.mxu0 %v1789_v7  ;;  %2256 = vmatprep.subr.bf16.mxu1 %v1782_v13  ;;  %v1765_v7 = vpack.c.bf16 %v1679_v12, %v1671_v61  ;;  %v1803_v13 = vld [vmem:[#allocation5 + $0x100] sm:$0xff]  ;;  %v1820_v61 = vld [vmem:[#allocation5 + $0x188] sm:$0xff]  ;;  %v1813_v26 = vld [vmem:[#allocation5 + $0x150] sm:$0xff] }
 0x5a6   :  { %2278 = vmatprep.subr.bf16.mxu0 %v1798_v46  ;;  %v1819_v46 = vld [vmem:[#allocation5 + $0x180] sm:$0xff]  ;;  %v1829_v2 = vld [vmem:[#allocation5 + $0x1d0] sm:$0xff]  ;;  %v1814_v25 = vld [vmem:[#allocation5 + $0x158] sm:$0xff] }
 0x5a7   :  { %v1805_v40 = vld [vmem:[#allocation5 + $0x110] sm:$0xff]  ;;  %v1830_v52 = vld [vmem:[#allocation5 + $0x1d8] sm:$0xff]  ;;  %v1815_v31 = vld [vmem:[#allocation5 + $0x160] sm:$0xff] }
 0x5a8   :  { %2257 = vmatpush3.bf16.msra.mxu1 %v1774_v18  ;;  %v1812_v18 = vld [vmem:[#allocation5 + $0x148] sm:$0xff]  ;;  %v1821_v12 = vld [vmem:[#allocation5 + $0x190] sm:$0xff]  ;;  %v1806_v28 = vld [vmem:[#allocation5 + $0x118] sm:$0xff] }
 0x5a9   :  { %2279 = vmatpush3.bf16.msra.mxu0 %v1790_v43  ;;  %2258 = vmatprep.subr.bf16.mxu1 %v1783_v19  ;;  %v1828_v43 = vld [vmem:[#allocation5 + $0x1c8] sm:$0xff]  ;;  %v1822_v29 = vld [vmem:[#allocation5 + $0x198] sm:$0xff]  ;;  %v1831_v3 = vld [vmem:[#allocation5 + $0x1e0] sm:$0xff] }
 0x5aa   :  { %2280 = vmatprep.subr.bf16.mxu0 %v1799_v20  ;;  %v1807_v1 = vld [vmem:[#allocation5 + $0x120] sm:$0xff]  ;;  %v1816_v19 = vld [vmem:[#allocation5 + $0x168] sm:$0xff]  ;;  %v1725_v21 = vld [vmem:[#allocation4 + $0xd0] sm:$0xff] }
 0x5ab   :  { %v1823_v56 = vld [vmem:[#allocation5 + $0x1a0] sm:$0xff]  ;;  %v1832_v20 = vld [vmem:[#allocation5 + $0x1e8] sm:$0xff]  ;;  %v1710_v55 = vld [vmem:[#allocation4 + $0x58] sm:$0xff] }
 0x5ac   :  { %2259 = vmatpush3.bf16.msra.mxu1 %v1775_v47  ;;  %v1808_v47 = vld [vmem:[#allocation5 + $0x128] sm:$0xff]  ;;  %v1726_v33 = vld [vmem:[#allocation4 + $0xd8] sm:$0xff] }
 0x5ad   :  { %2281 = vmatpush3.bf16.msra.mxu0 %v1791_v53  ;;  %2260 = vmatprep.subr.bf16.mxu1 %v1784_v44  ;;  %v1824_v53 = vld [vmem:[#allocation5 + $0x1a8] sm:$0xff]  ;;  %v1817_v44 = vld [vmem:[#allocation5 + $0x170] sm:$0xff]  ;;  %v1702_v51 = vld [vmem:[#allocation4 + $0x18] sm:$0xff] }
 0x5ae   :  { %2282 = vmatprep.subr.bf16.mxu0 %v1800_v22  ;;  %v1833_v22 = vld [vmem:[#allocation5 + $0x1f0] sm:$0xff]  ;;  %v1700_v45 = vld [vmem:[#allocation4 + $0x8] sm:$0xff] }
 0x5b0   :  { %2261 = vmatpush3.bf16.msra.mxu1 %v1776_v58  ;;  %v1809_v58 = vld [vmem:[#allocation5 + $0x130] sm:$0xff] }
 0x5b1   :  { %2283 = vmatpush3.bf16.msra.mxu0 %v1792_v59  ;;  %2262 = vmatprep.subr.bf16.mxu1 %v1785_v23  ;;  %v1825_v59 = vld [vmem:[#allocation5 + $0x1b0] sm:$0xff]  ;;  %v1818_v23 = vld [vmem:[#allocation5 + $0x178] sm:$0xff] }
 0x5b2   :  { %2284 = vmatprep.subr.bf16.mxu0 %v1801_v60  ;;  %v1834_v60 = vld [vmem:[#allocation5 + $0x1f8] sm:$0xff] }
 0x5b4   :  { %2263 = vmatpush3.bf16.msra.mxu1 %v1777_v27  ;;  %v1810_v27 = vld [vmem:[#allocation5 + $0x138] sm:$0xff] }
 0x5b5   :  { %2285 = vmatpush3.bf16.msra.mxu0 %v1793_v4  ;;  %2264 = vmatprep.subr.bf16.mxu1 %v1786_v8  ;;  %v1826_v4 = vld [vmem:[#allocation5 + $0x1b8] sm:$0xff]  ;;  %v1707_v8 = vld [vmem:[#allocation4 + $0x40] sm:$0xff] }
 0x5b6   :  { %2286 = vmatprep.subr.bf16.mxu0 %v1802_v36  ;;  %v1723_v36 = vld [vmem:[#allocation4 + $0xc0] sm:$0xff] }
 0x5b8   :  { %2265 = vmatpush3.bf16.msra.mxu1 %v1778_v14  ;;  %v1767_v14 = vpack.c.bf16 %v1681_v11, %v1673_v62  ;;  %v1716_v62 = vld [vmem:[#allocation4 + $0x88] sm:$0xff]  ;;  %v1718_v11 = vld [vmem:[#allocation4 + $0x98] sm:$0xff] }
 0x5b9   :  { %2287 = vmatpush3.bf16.msra.mxu0 %v1794_v15  ;;  %2294 = vmatprep.subr.bf16.mxu1 %v1811_v16  ;;  %v1769_v15 = vpack.c.bf16 %v1683_v34, %v1675_v54  ;;  %v1699_v16 = vld [vmem:[#allocation4] sm:$0xff]  ;;  %v1709_v54 = vld [vmem:[#allocation4 + $0x50] sm:$0xff] }
 0x5ba   :  { %2316 = vmatprep.subr.bf16.mxu0 %v1827_v17  ;;  %v1715_v17 = vld [vmem:[#allocation4 + $0x80] sm:$0xff] }
 0x5bb   :  { %1868 = vmatmul.mubr.bf16.vlgmr.msra.gmra.mrb[20].mxu1 %v1763_v5  ;;  %v1708_v5 = vld [vmem:[#allocation4 + $0x48] sm:$0xff]  ;;  %v1711_v34 = vld [vmem:[#allocation4 + $0x60] sm:$0xff] }
 0x5bc   :  { %1909 = vmatmul.mubr.bf16.vlgmr.msra.gmra.mrb[24].mxu0 %v1765_v7  ;;  %2295 = vmatpush3.bf16.msra.mxu1 %v1803_v13  ;;  %v1724_v7 = vld [vmem:[#allocation4 + $0xc8] sm:$0xff]  ;;  %v1692_v13 = vpack.c.bf16 %v2987_v50, %v2979_v32  ;;  %v1701_v32 = vld [vmem:[#allocation4 + $0x10] sm:$0xff] }
 0x5bd   :  { %2317 = vmatpush3.bf16.msra.mxu0 %v1819_v46  ;;  %2296 = vmatprep.subr.bf16.mxu1 %v1812_v18  ;;  %v1717_v50 = vld [vmem:[#allocation4 + $0x90] sm:$0xff]  ;;  %v1727_v46 = vld [vmem:[#allocation4 + $0xe0] sm:$0xff] }
 0x5be   :  { %2318 = vmatprep.subr.bf16.mxu0 %v1828_v43  ;;  %1949 = vmatprep.mubr.bf16.mxu1 %v1768_v48  ;;  %v1703_v18 = vld [vmem:[#allocation4 + $0x20] sm:$0xff]  ;;  %v1712_v48 = vld [vmem:[#allocation4 + $0x68] sm:$0xff] }
 0x5bf   :  { %1990 = vmatprep.mubr.bf16.mxu0 %v1770_v49  ;;  %v1719_v43 = vld [vmem:[#allocation4 + $0xa0] sm:$0xff]  ;;  %v1728_v49 = vld [vmem:[#allocation4 + $0xe8] sm:$0xff] }
 0x5c0   :  { %2297 = vmatpush3.bf16.msra.mxu1 %v1804_v24  ;;  %v1704_v24 = vld [vmem:[#allocation4 + $0x28] sm:$0xff] }
 0x5c1   :  { %2319 = vmatpush3.bf16.msra.mxu0 %v1820_v61  ;;  %2298 = vmatprep.subr.bf16.mxu1 %v1813_v26  ;;  %v1720_v61 = vld [vmem:[#allocation4 + $0xa8] sm:$0xff]  ;;  %v1713_v26 = vld [vmem:[#allocation4 + $0x70] sm:$0xff] }
 0x5c2   :  { %2320 = vmatprep.subr.bf16.mxu0 %v1829_v2  ;;  %v1729_v2 = vld [vmem:[#allocation4 + $0xf0] sm:$0xff] }
 0x5c4   :  { %2299 = vmatpush3.bf16.msra.mxu1 %v1805_v40  ;;  %v1705_v40 = vld [vmem:[#allocation4 + $0x30] sm:$0xff] }
 0x5c5   :  { %2321 = vmatpush3.bf16.msra.mxu0 %v1821_v12  ;;  %2300 = vmatprep.subr.bf16.mxu1 %v1814_v25  ;;  %v1721_v12 = vld [vmem:[#allocation4 + $0xb0] sm:$0xff]  ;;  %v1714_v25 = vld [vmem:[#allocation4 + $0x78] sm:$0xff] }
 0x5c6   :  { %2322 = vmatprep.subr.bf16.mxu0 %v1830_v52  ;;  %v1730_v52 = vld [vmem:[#allocation4 + $0xf8] sm:$0xff] }
 0x5c8   :  { %2301 = vmatpush3.bf16.msra.mxu1 %v1806_v28  ;;  %v1706_v28 = vld [vmem:[#allocation4 + $0x38] sm:$0xff] }
 0x5c9   :  { %2323 = vmatpush3.bf16.msra.mxu0 %v1822_v29  ;;  %2302 = vmatprep.subr.bf16.mxu1 %v1815_v31  ;;  %v1722_v29 = vld [vmem:[#allocation4 + $0xb8] sm:$0xff]  ;;  %v1739_v31 = vld [vmem:[#allocation4 + $0x140] sm:$0xff] }
 0x5ca   :  { %2324 = vmatprep.subr.bf16.mxu0 %v1831_v3  ;;  %v1755_v3 = vld [vmem:[#allocation4 + $0x1c0] sm:$0xff] }
 0x5cc   :  { %2303 = vmatpush3.bf16.msra.mxu1 %v1807_v1  ;;  %v1691_v1 = vpack.c.bf16 %v2983_v37, %v2975_v30  ;;  %v1732_v30 = vld [vmem:[#allocation4 + $0x108] sm:$0xff]  ;;  %v1741_v37 = vld [vmem:[#allocation4 + $0x150] sm:$0xff] }
 0x5cd   :  { %2325 = vmatpush3.bf16.msra.mxu0 %v1823_v56  ;;  %2304 = vmatprep.subr.bf16.mxu1 %v1816_v19  ;;  %v1693_v56 = vpack.c.bf16 %v2985_v41, %v2977_v6  ;;  %v1731_v19 = vld [vmem:[#allocation4 + $0x100] sm:$0xff]  ;;  %v1748_v6 = vld [vmem:[#allocation4 + $0x188] sm:$0xff]  ;;  %v1757_v41 = vld [vmem:[#allocation4 + $0x1d0] sm:$0xff] }
 0x5ce   :  { %2326 = vmatprep.subr.bf16.mxu0 %v1832_v20  ;;  %v1747_v20 = vld [vmem:[#allocation4 + $0x180] sm:$0xff] }
 0x5d0   :  { %2305 = vmatpush3.bf16.msra.mxu1 %v1808_v47  ;;  %v1740_v47 = vld [vmem:[#allocation4 + $0x148] sm:$0xff] }
 0x5d1   :  { %2327 = vmatpush3.bf16.msra.mxu0 %v1824_v53  ;;  %2306 = vmatprep.subr.bf16.mxu1 %v1817_v44  ;;  %v1756_v53 = vld [vmem:[#allocation4 + $0x1c8] sm:$0xff]  ;;  %v1696_v44 = vpack.c.bf16 %v3015_v9, %v3007_v35  ;;  %v1733_v35 = vld [vmem:[#allocation4 + $0x110] sm:$0xff] }
 0x5d2   :  { %2328 = vmatprep.subr.bf16.mxu0 %v1833_v22  ;;  %v1698_v22 = vpack.c.bf16 %v3017_v10, %v3009_v39  ;;  %v1749_v9 = vld [vmem:[#allocation4 + $0x190] sm:$0xff]  ;;  %v1758_v39 = vld [vmem:[#allocation4 + $0x1d8] sm:$0xff] }
 0x5d3   :  { %v1734_v10 = vld [vmem:[#allocation4 + $0x118] sm:$0xff] }
 0x5d4   :  { %2307 = vmatpush3.bf16.msra.mxu1 %v1809_v58  ;;  %v1742_v58 = vld [vmem:[#allocation4 + $0x158] sm:$0xff] }
 0x5d5   :  { %2329 = vmatpush3.bf16.msra.mxu0 %v1825_v59  ;;  %2308 = vmatprep.subr.bf16.mxu1 %v1818_v23  ;;  %v1750_v59 = vld [vmem:[#allocation4 + $0x198] sm:$0xff]  ;;  %v1743_v23 = vld [vmem:[#allocation4 + $0x160] sm:$0xff] }
 0x5d6   :  { %2330 = vmatprep.subr.bf16.mxu0 %v1834_v60  ;;  %v1759_v60 = vld [vmem:[#allocation4 + $0x1e0] sm:$0xff] }
 0x5d8   :  { %2309 = vmatpush3.bf16.msra.mxu1 %v1810_v27  ;;  %v1735_v27 = vld [vmem:[#allocation4 + $0x120] sm:$0xff] }
 0x5d9   :  { %2331 = vmatpush3.bf16.msra.mxu0 %v1826_v4  ;;  %2338 = vmatprep.subr.bf16.mxu1 %v1707_v8  ;;  %v1751_v4 = vld [vmem:[#allocation4 + $0x1a0] sm:$0xff]  ;;  %v1744_v8 = vld [vmem:[#allocation4 + $0x168] sm:$0xff] }
 0x5da   :  { %2360 = vmatprep.subr.bf16.mxu0 %v1723_v36  ;;  %v1760_v36 = vld [vmem:[#allocation4 + $0x1e8] sm:$0xff] }
 0x5db   :  { %1950 = vmatmul.mubr.bf16.vlgmr.msra.gmra.mrb[24].mxu1 %v1767_v14  ;;  %v1736_v14 = vld [vmem:[#allocation4 + $0x128] sm:$0xff] }
 0x5dc   :  { %1991 = vmatmul.mubr.bf16.vlgmr.msra.gmra.mrb[28].mxu0 %v1769_v15  ;;  %2339 = vmatpush3.bf16.msra.mxu1 %v1699_v16  ;;  %v1752_v15 = vld [vmem:[#allocation4 + $0x1a8] sm:$0xff]  ;;  %v1745_v16 = vld [vmem:[#allocation4 + $0x170] sm:$0xff] }
 0x5dd   :  { %2361 = vmatpush3.bf16.msra.mxu0 %v1715_v17  ;;  %2340 = vmatprep.subr.bf16.mxu1 %v1708_v5  ;;  %v1761_v17 = vld [vmem:[#allocation4 + $0x1f0] sm:$0xff] }
 0x5de   :  { %2362 = vmatprep.subr.bf16.mxu0 %v1724_v7  ;;  %2031 = vmatprep.mubr.bf16.mxu1 %v1692_v13  ;;  %v1737_v5 = vld [vmem:[#allocation4 + $0x130] sm:$0xff]  ;;  %v1746_v13 = vld [vmem:[#allocation4 + $0x178] sm:$0xff] }
 0x5df   :  { %2072 = vmatprep.mubr.bf16.mxu0 %v1694_v57  ;;  %v1753_v7 = vld [vmem:[#allocation4 + $0x1b0] sm:$0xff]  ;;  %v1762_v57 = vld [vmem:[#allocation4 + $0x1f8] sm:$0xff] }
 0x5e0   :  { %2341 = vmatpush3.bf16.msra.mxu1 %v1700_v45  ;;  %v1738_v45 = vld [vmem:[#allocation4 + $0x138] sm:$0xff] }
 0x5e1   :  { %2363 = vmatpush3.bf16.msra.mxu0 %v1716_v62  ;;  %2342 = vmatprep.subr.bf16.mxu1 %v1709_v54  ;;  %v1754_v62 = vld [vmem:[#allocation4 + $0x1b8] sm:$0xff]  ;;  %v1695_v54 = vpack.c.bf16 %v3011_v38, %v3003_v63 }
 0x5e2   :  { %2364 = vmatprep.subr.bf16.mxu0 %v1725_v21  ;;  %v1697_v21 = vpack.c.bf16 %v3013_v42, %v3005_v0 }
 0x5e4   :  { %2343 = vmatpush3.bf16.msra.mxu1 %v1701_v32 }
 0x5e5   :  { %2365 = vmatpush3.bf16.msra.mxu0 %v1717_v50  ;;  %2344 = vmatprep.subr.bf16.mxu1 %v1710_v55 }
 0x5e6   :  { %2366 = vmatprep.subr.bf16.mxu0 %v1726_v33 }
 0x5e8   :  { %2345 = vmatpush3.bf16.msra.mxu1 %v1702_v51 }
 0x5e9   :  { %2367 = vmatpush3.bf16.msra.mxu0 %v1718_v11  ;;  %2346 = vmatprep.subr.bf16.mxu1 %v1711_v34 }
 0x5ea   :  { %2368 = vmatprep.subr.bf16.mxu0 %v1727_v46 }
 0x5ec   :  { %2347 = vmatpush3.bf16.msra.mxu1 %v1703_v18 }
 0x5ed   :  { %2369 = vmatpush3.bf16.msra.mxu0 %v1719_v43  ;;  %2348 = vmatprep.subr.bf16.mxu1 %v1712_v48 }
 0x5ee   :  { %2370 = vmatprep.subr.bf16.mxu0 %v1728_v49 }
 0x5f0   :  { %2349 = vmatpush3.bf16.msra.mxu1 %v1704_v24 }
 0x5f1   :  { %2371 = vmatpush3.bf16.msra.mxu0 %v1720_v61  ;;  %2350 = vmatprep.subr.bf16.mxu1 %v1713_v26 }
 0x5f2   :  { %2372 = vmatprep.subr.bf16.mxu0 %v1729_v2 }
 0x5f4   :  { %2351 = vmatpush3.bf16.msra.mxu1 %v1705_v40 }
 0x5f5   :  { %2373 = vmatpush3.bf16.msra.mxu0 %v1721_v12  ;;  %2352 = vmatprep.subr.bf16.mxu1 %v1714_v25 }
 0x5f6   :  { %2374 = vmatprep.subr.bf16.mxu0 %v1730_v52 }
 0x5f8   :  { %2353 = vmatpush3.bf16.msra.mxu1 %v1706_v28 }
 0x5f9   :  { %2375 = vmatpush3.bf16.msra.mxu0 %v1722_v29  ;;  %2382 = vmatprep.subr.bf16.mxu1 %v1739_v31 }
 0x5fa   :  { %2404 = vmatprep.subr.bf16.mxu0 %v1755_v3 }
 0x5fb   :  { %2032 = vmatmul.mubr.bf16.vlgmr.msra.gmra.mrb[28].mxu1 %v1691_v1 }
 0x5fc   :  { %2073 = vmatmul.mubr.bf16.vlgmr.msra.gmra.mrb[32].mxu0 %v1693_v56  ;;  %2383 = vmatpush3.bf16.msra.mxu1 %v1731_v19 }
 0x5fd   :  { %2405 = vmatpush3.bf16.msra.mxu0 %v1747_v20  ;;  %2384 = vmatprep.subr.bf16.mxu1 %v1740_v47 }
 0x5fe   :  { %2406 = vmatprep.subr.bf16.mxu0 %v1756_v53  ;;  %2113 = vmatprep.mubr.bf16.mxu1 %v1696_v44 }
 0x5ff   :  { %2154 = vmatprep.mubr.bf16.mxu0 %v1698_v22 }
 0x600   :  { %2385 = vmatpush3.bf16.msra.mxu1 %v1732_v30 }
 0x601   :  { %2407 = vmatpush3.bf16.msra.mxu0 %v1748_v6  ;;  %2386 = vmatprep.subr.bf16.mxu1 %v1741_v37 }
 0x602   :  { %2408 = vmatprep.subr.bf16.mxu0 %v1757_v41 }
 0x604   :  { %2387 = vmatpush3.bf16.msra.mxu1 %v1733_v35 }
 0x605   :  { %2409 = vmatpush3.bf16.msra.mxu0 %v1749_v9  ;;  %2388 = vmatprep.subr.bf16.mxu1 %v1742_v58 }
 0x606   :  { %2410 = vmatprep.subr.bf16.mxu0 %v1758_v39 }
 0x608   :  { %2389 = vmatpush3.bf16.msra.mxu1 %v1734_v10 }
 0x609   :  { %2411 = vmatpush3.bf16.msra.mxu0 %v1750_v59  ;;  %2390 = vmatprep.subr.bf16.mxu1 %v1743_v23 }
 0x60a   :  { %2412 = vmatprep.subr.bf16.mxu0 %v1759_v60 }
 0x60c   :  { %2391 = vmatpush3.bf16.msra.mxu1 %v1735_v27 }
 0x60d   :  { %2413 = vmatpush3.bf16.msra.mxu0 %v1751_v4  ;;  %2392 = vmatprep.subr.bf16.mxu1 %v1744_v8 }
 0x60e   :  { %2414 = vmatprep.subr.bf16.mxu0 %v1760_v36 }
 0x610   :  { %2393 = vmatpush3.bf16.msra.mxu1 %v1736_v14 }
 0x611   :  { %2415 = vmatpush3.bf16.msra.mxu0 %v1752_v15  ;;  %2394 = vmatprep.subr.bf16.mxu1 %v1745_v16 }
 0x612   :  { %2416 = vmatprep.subr.bf16.mxu0 %v1761_v17 }
 0x614   :  { %2395 = vmatpush3.bf16.msra.mxu1 %v1737_v5 }
 0x615   :  { %2417 = vmatpush3.bf16.msra.mxu0 %v1753_v7  ;;  %2396 = vmatprep.subr.bf16.mxu1 %v1746_v13 }
 0x616   :  { %2418 = vmatprep.subr.bf16.mxu0 %v1762_v57  ;;  %v2245_v57 = vld [vmem:[#allocation15] ss:$0 sm:$0xff] }
 0x618   :  { %2397 = vmatpush3.bf16.msra.mxu1 %v1738_v45 }
 0x619   :  { %2419 = vmatpush3.bf16.msra.mxu0 %v1754_v62 }
 0x61b   :  { %2114 = vmatmul.mubr.bf16.vlgmr.msra.gmra.mrb[32].mxu1 %v1695_v54 }
 0x61c   :  { %2155 = vmatmul.mubr.bf16.vlgmr.msra.gmra.mrb[36].mxu0 %v1697_v21 }
 0x68e   :  { %v2266_v32 = vpop.f32.mrb[20].mxu1 }
 0x68f   :  { %v2288_v50 = vpop.f32.mrb[24].mxu0  ;;  %v2267_v55 = vpop.f32.mrb[21].mxu1 }
 0x690   :  { %v2289_v33 = vpop.f32.mrb[25].mxu0  ;;  %v2268_v51 = vadd.f32 %v2267_v55, %v2266_v32  ;;  %v2269_v34 = vpop.f32.mrb[22].mxu1 }
 0x691   :  { %v2290_v11 = vadd.f32 %v2289_v33, %v2288_v50  ;;  %v2291_v46 = vpop.f32.mrb[26].mxu0  ;;  %v2270_v18 = vpop.f32.mrb[23].mxu1 }
 0x692   :  { %v2292_v43 = vpop.f32.mrb[27].mxu0  ;;  %v2271_v49 = vadd.f32 %v2270_v18, %v2269_v34 }
 0x693   :  { %v1911_v48 = vadd.f32 %v2290_v11, %v2268_v51  ;;  %v2293_v63 = vadd.f32 %v2292_v43, %v2291_v46 }
 0x695   :  { %v1914_v38 = vadd.f32 %v2293_v63, %v2271_v49 }
 0x6ae   :  { %v2310_v24 = vpop.f32.mrb[24].mxu1 }
 0x6af   :  { %v2332_v0 = vpop.f32.mrb[28].mxu0  ;;  %v2311_v42 = vpop.f32.mrb[25].mxu1 }
 0x6b0   :  { %v2333_v61 = vpop.f32.mrb[29].mxu0  ;;  %v2312_v26 = vadd.f32 %v2311_v42, %v2310_v24  ;;  %v2313_v40 = vpop.f32.mrb[26].mxu1 }
 0x6b1   :  { %v2334_v2 = vadd.f32 %v2333_v61, %v2332_v0  ;;  %v2335_v12 = vpop.f32.mrb[30].mxu0  ;;  %v2314_v25 = vpop.f32.mrb[27].mxu1 }
 0x6b2   :  { %v2336_v52 = vpop.f32.mrb[31].mxu0  ;;  %v1952_v28 = vadd.f32 %v2312_v26, %v1911_v48  ;;  %v2315_v29 = vadd.f32 %v2314_v25, %v2313_v40 }
 0x6b3   :  { %v2337_v31 = vadd.f32 %v2336_v52, %v2335_v12 }
 0x6b4   :  { %v1993_v3 = vadd.f32 %v2334_v2, %v1952_v28  ;;  %v1955_v1 = vadd.f32 %v2315_v29, %v1914_v38 }
 0x6b6   :  { %v1996_v56 = vadd.f32 %v2337_v31, %v1955_v1 }
 0x6ce   :  { %v2354_v19 = vpop.f32.mrb[28].mxu1 }
 0x6cf   :  { %v2376_v20 = vpop.f32.mrb[32].mxu0  ;;  %v2355_v47 = vpop.f32.mrb[29].mxu1 }
 0x6d0   :  { %v2377_v53 = vpop.f32.mrb[33].mxu0  ;;  %v2356_v44 = vadd.f32 %v2355_v47, %v2354_v19  ;;  %v2357_v30 = vpop.f32.mrb[30].mxu1 }
 0x6d1   :  { %v2378_v22 = vadd.f32 %v2377_v53, %v2376_v20  ;;  %v2379_v6 = vpop.f32.mrb[34].mxu0  ;;  %v2358_v37 = vpop.f32.mrb[31].mxu1 }
 0x6d2   :  { %v2380_v41 = vpop.f32.mrb[35].mxu0  ;;  %v2034_v35 = vadd.f32 %v2356_v44, %v1993_v3  ;;  %v2359_v9 = vadd.f32 %v2358_v37, %v2357_v30 }
 0x6d3   :  { %v2381_v58 = vadd.f32 %v2380_v41, %v2379_v6 }
 0x6d4   :  { %v2075_v39 = vadd.f32 %v2378_v22, %v2034_v35  ;;  %v2037_v10 = vadd.f32 %v2359_v9, %v1996_v56 }
 0x6d6   :  { %v2078_v59 = vadd.f32 %v2381_v58, %v2037_v10 }
 0x6ee   :  { %v2398_v23 = vpop.f32.mrb[32].mxu1 }
 0x6ef   :  { %v2420_v60 = vpop.f32.mrb[36].mxu0  ;;  %v2399_v27 = vpop.f32.mrb[33].mxu1 }
 0x6f0   :  { %v2421_v4 = vpop.f32.mrb[37].mxu0  ;;  %v2400_v8 = vadd.f32 %v2399_v27, %v2398_v23  ;;  %v2401_v14 = vpop.f32.mrb[34].mxu1 }
 0x6f1   :  { %v2422_v36 = vadd.f32 %v2421_v4, %v2420_v60  ;;  %v2423_v15 = vpop.f32.mrb[38].mxu0  ;;  %v2402_v16 = vpop.f32.mrb[35].mxu1 }
 0x6f2   :  { %v2424_v17 = vpop.f32.mrb[39].mxu0  ;;  %v2116_v5 = vadd.f32 %v2400_v8, %v2075_v39  ;;  %v2403_v7 = vadd.f32 %v2402_v16, %v2401_v14 }
 0x6f3   :  { %v2425_v13 = vadd.f32 %v2424_v17, %v2423_v15 }
 0x6f4   :  { %v2157_v45 = vadd.f32 %v2422_v36, %v2116_v5  ;;  %v2119_v62 = vadd.f32 %v2403_v7, %v2078_v59 }
 0x6f6   :  { %v2160_v54 = vadd.f32 %v2425_v13, %v2119_v62  ;;  %v2170_v21 = vadd.f32 %v2245_v57, %v2157_v45 }
 0x6f8   :  { %2172 = vmax.xlane.f32.xlu0 %v2170_v21  ;;  %v2171_v32 = vadd.f32 %v2245_v57, %v2160_v54 }
 0x6fc   :  { %2174 = vmax.xlane.f32.xlu0 %v2171_v32 }
 0x785   :  { %v2173_v50 = vpop.xlane.xlu0 %2172 }
 0x786   :  { %v2176_v55 = vsub.f32 %v2170_v21, %v2173_v50 }
 0x788   :  { %v2178_v33 = vmul.f32 1.442695, %v2176_v55 }
 0x789   :  { %v2175_v51 = vpop.xlane.xlu0 %2174 }
 0x78a   :  { %2503 = vpow2.f32 %v2178_v33  ;;  %v2177_v11 = vsub.f32 %v2171_v32, %v2175_v51 }
 0x78c   :  { %v2180_v34 = vmul.f32 1.442695, %v2177_v11 }
 0x78e   :  { %2505 = vpow2.f32 %v2180_v34 }
 0x794   :  { %v2504_v46 = vpop.eup %2503 }
 0x795   :  { %2182 = vadd.xlane.f32.xlu1 %v2504_v46 }
 0x798   :  { %v2506_v18 = vpop.eup %2505 }
 0x799   :  { %2184 = vadd.xlane.f32.xlu1 %v2506_v18 }
 0x822   :  { %v2183_v43 = vpop.xlane.xlu1 %2182 }
 0x823   :  { %2507 = vrcp.f32 %v2183_v43 }
 0x826   :  { %v2185_v48 = vpop.xlane.xlu1 %2184 }
 0x827   :  { %2509 = vrcp.f32 %v2185_v48 }
 0x82d   :  { %v2508_v49 = vpop.eup %2507 }
 0x82e   :  { %v2187_v63 = vmul.f32 %v2508_v49, %v2504_v46 }
 0x830   :  { %2190 = vst [vmem:[#allocation16] sm:$0xff] %v2187_v63 }
 0x831   :  { %v2510_v38 = vpop.eup %2509 }
 0x832   :  { %v2189_v24 = vmul.f32 %v2510_v38, %v2506_v18 }
 0x834   :  { %2191 = vst [vmem:[#allocation16 + $0x8] sm:$0xff] %v2189_v24 }
 0x835   :  { %2676 = shalt.err (!%p2673_p4)
}
 0x836   :  { %s2677_s5 = scalar_lea.hbm %s3148_s10, 256 }
 0x837   :  { %p2678_p5 = scmp.ne.s32.totalorder %s3148_s10, %s2677_s5  ;;  %p2681_p6 = scmp.lt.u32.totalorder %s2677_s5, %s3148_s10 }
 0x839   :  { %p2683_p7 = pnand %p2681_p6, %p2678_p5 }
 0x83b   :  { %2686 = shalt.err (!%p2683_p7)
}
 0x83c   :  { %2203 = dma.vmem_to_hbm [thread:$0]  %s2198_s11, 256, %s3148_s10, [#allocation9], %s2717_s2, %s2717_s2, %s2715_s9  }
 0x83d   :  { %2701 = dma.done.wait [#allocation9], 256  }
 0x83e   :  { %2702 = vsyncadd [#allocation9], 4294967040 }
 0x83f   :  { %2207 = vsyncpa [#allocation8], 1 }
 0x840   :  { %2208 = vsyncpa [#allocation11], 1 }
 0x841   :  { %2209 = vsyncpa [#allocation14], 1 }
 0x842   :  { %2210 = vsyncpa [#allocation9], 1 }
 0x843   :  { %2211 = vsyncmov [#allocation6] }
 0x846   :  { %s2212_s19 = vpop.sfrf %2211 }
 0x847   :  { %p2246_p8 = scmp.ne.s32.totalorder %s2212_s19, 0 }
 0x849   :  { %2216 = shalt.err (%p2246_p8)  }
 0x84a   :  { %2218 = vsyncmov [#allocation6 + $0x1] }
 0x84d   :  { %s2219_s20 = vpop.sfrf %2218 }
 0x84e   :  { %p2247_p9 = scmp.ne.s32.totalorder %s2219_s20, 0 }
 0x850   :  { %2223 = shalt.err (%p2247_p9)  }
 0x851   :  { %2225 = vsyncmov [#allocation6 + $0x2] }
 0x854   :  { %s2226_s21 = vpop.sfrf %2225 }
 0x855   :  { %p2248_p10 = scmp.ne.s32.totalorder %s2226_s21, 0 }
 0x857   :  { %2230 = shalt.err (%p2248_p10)  }
 0x858   :  { %2232 = vsyncmov [#allocation6 + $0x3] }
 0x85b   :  { %s2233_s10 = vpop.sfrf %2232 }
 0x85c   :  { %p2249_p11 = scmp.ne.s32.totalorder %s2233_s10, 0 }
 0x85e   :  { %2237 = shalt.err (%p2249_p11)  }

</bundles_post_ra>
